<compile_context>
chip_gen: v6e
topology: v6e:2x2x1
jax: 0.10.0
libtpu: 0.0.40
codegen_flags: <defaults>
</compile_context>

<pallas_src>
import functools

import jax
import jax.numpy as jnp
from jax import lax
from jax.experimental import pallas as pl
from jax.experimental.pallas import tpu as pltpu

_VMEM_LIMIT = 32 * 1024 * 1024  # safe scoped-VMEM request on v5e / v6e / v7x


# ----------------------------------------------------------------------------
# small helpers
# ----------------------------------------------------------------------------

def _bf16(x):
    return x.astype(jnp.bfloat16)


def _init(key, shape, scale=0.1, dtype=jnp.float32):
    return (scale * jax.random.normal(key, shape, dtype=jnp.float32)).astype(dtype)


def _const_spec(arr):
    """Full-array block, same block for every grid step (weights / biases)."""
    nd = arr.ndim
    return pl.BlockSpec(arr.shape, lambda b, _nd=nd: (0,) * _nd)


def _batch_spec(arr):
    """One batch row per grid step; trailing dims kept whole."""
    nd = arr.ndim
    return pl.BlockSpec((1,) + arr.shape[1:], lambda b, _nd=nd: (b,) + (0,) * (_nd - 1))


def _log_softmax(logits):
    m = jnp.max(logits, axis=-1, keepdims=True)
    lse = m + jnp.log(jnp.sum(jnp.exp(logits - m), axis=-1, keepdims=True))
    return logits - lse


def _head_logits(x1, w1a, x2, w1b, b1, wo, bo, activate):
    """Two-layer head: (x1 ++ x2) @ W1 + b1 -> (relu?) -> @ Wo + bo.
    The lane-axis concat is replaced by a split matmul (no minor-dim concatenate)."""
    h = jnp.dot(_bf16(x1), w1a[...], preferred_element_type=jnp.float32)
    if x2 is not None:
        h = h + jnp.dot(_bf16(x2), w1b[...], preferred_element_type=jnp.float32)
    h = h + b1[...]
    if activate:
        h = jnp.maximum(h, 0.0)
    return jnp.dot(_bf16(h), wo[...], preferred_element_type=jnp.float32) + bo[...]


# ----------------------------------------------------------------------------
# Kernel 1: fused encoder (char-CNN + feature fusion + uni/bi projection chain)
# ----------------------------------------------------------------------------

def _encoder_kernel(*refs, kernel_sizes, out_ch, word_emb_size, has_char):
    it = iter(refs)
    wemb_ref = next(it)                                    # [1, T, We]
    if has_char:
        cemb_ref = next(it)                                # [1, T, L, Ce]
        conv_w_refs = [next(it) for _ in kernel_sizes]     # each [k*Ce, C]  bf16
        conv_b_refs = [next(it) for _ in kernel_sizes]     # each [1, C]
    else:
        cemb_ref = None
        conv_w_refs, conv_b_refs = [], []
    uni_w_word_ref = next(it)                              # [We, 2u] bf16
    uni_w_conv_refs = [next(it) for _ in kernel_sizes] if has_char else []
    uni_b_ref = next(it)                                   # [1, 2u]
    bi_w_ref = next(it)                                    # [2u, 2b] bf16
    bi_b_ref = next(it)                                    # [1, 2b]
    wr_ref = next(it)                                      # [1, T, wr_size]
    un_ref = next(it)                                      # [1, T, 2u]
    bi_out_ref = next(it)                                  # [1, T, 2b]

    w = wemb_ref[0]                                        # [T, We]
    we = word_emb_size

    # word-embedding slice of wr, and its contribution to the uni projection
    wr_ref[0, :, 0:we] = w
    un_pre = jnp.dot(_bf16(w), uni_w_word_ref[...], preferred_element_type=jnp.float32)

    if has_char:
        l = cemb_ref.shape[2]
        ce = cemb_ref.shape[3]
        off = we
        for ki, k in enumerate(kernel_sizes):
            nwin = l - k + 1
            pooled = None
            # conv over char windows as k shifted [T,Ce]x[Ce,C] matmuls, all in VMEM
            for i in range(nwin):
                acc = None
                for j in range(k):
                    xj = cemb_ref[0, :, i + j, :]                       # [T, Ce]
                    wj = conv_w_refs[ki][j * ce:(j + 1) * ce, :]        # [Ce, C]
                    d = jnp.dot(_bf16(xj), wj, preferred_element_type=jnp.float32)
                    acc = d if acc is None else acc + d
                conv = jnp.maximum(acc + conv_b_refs[ki][...], 0.0)     # [T, C]
                pooled = conv if pooled is None else jnp.maximum(pooled, conv)
            wr_ref[0, :, off:off + out_ch] = pooled
            un_pre = un_pre + jnp.dot(_bf16(pooled), uni_w_conv_refs[ki][...],
                                      preferred_element_type=jnp.float32)
            off += out_ch

    # fused uni/bi projection chain; `un` is re-used directly from VMEM
    un = jnp.tanh(un_pre + uni_b_ref[...])
    bi = jnp.tanh(jnp.dot(_bf16(un), bi_w_ref[...], preferred_element_type=jnp.float32)
                  + bi_b_ref[...])
    un_ref[0] = un
    bi_out_ref[0] = bi


# ----------------------------------------------------------------------------
# Kernel 2: labeled-mode loss (primary head, masked-mean cross-entropy)
# ----------------------------------------------------------------------------

def _primary_hard_loss_kernel(un_ref, bi_ref, lab_ref, mask_ref,
                              w1a_ref, w1b_ref, b1_ref, wo_ref, bo_ref,
                              out_ref, num_ref, den_ref, *, activate):
    @pl.when(pl.program_id(0) == 0)
    def _():
        num_ref[...] = jnp.zeros_like(num_ref)
        den_ref[...] = jnp.zeros_like(den_ref)

    un = un_ref[0]                               # [T, 2u]
    bi = bi_ref[0]                               # [T, 2b]
    logits = _head_logits(un, w1a_ref, bi, w1b_ref, b1_ref, wo_ref, bo_ref, activate)
    logp = _log_softmax(logits)                  # [T, NT]
    onehot = (lax.broadcasted_iota(jnp.int32, logp.shape, 1) == lab_ref[0]).astype(jnp.float32)
    nll = -jnp.sum(logp * onehot, axis=-1, keepdims=True)   # [T, 1]
    msk = mask_ref[0]                                        # [T, 1]

    num_ref[...] += jnp.sum(nll * msk, axis=(0, 1), keepdims=True)
    den_ref[...] += jnp.sum(msk, axis=(0, 1), keepdims=True)
    out_ref[...] = num_ref[...] / jnp.maximum(den_ref[...], 1.0)


# ----------------------------------------------------------------------------
# Kernel 3: unlabeled-mode CVT loss (primary teacher + full + 4 directional heads)
# ----------------------------------------------------------------------------

def _unlabeled_cvt_loss_kernel(un_ref, bi_ref, mask_ref,
                               w1pa_ref, w1pb_ref, b1p_ref, wop_ref, bop_ref,
                               w1fa_ref, w1fb_ref, b1f_ref, wof_ref, bof_ref,
                               w1d_ref, b1d_ref, wod_ref, bod_ref,
                               out_ref, num_ref, den_ref,
                               *, uni_size, act_primary, act_full):
    @pl.when(pl.program_id(0) == 0)
    def _():
        num_ref[...] = jnp.zeros_like(num_ref)
        den_ref[...] = jnp.zeros_like(den_ref)

    un = un_ref[0]                               # [T, 2u]
    bi = bi_ref[0]                               # [T, 2b]
    msk = mask_ref[0]                            # [T, 1]
    t = un.shape[0]
    u = uni_size

    # primary head (frozen teacher; forward-only so stop_gradient is implicit):
    # soft-target distribution computed ONCE and shared by all student heads.
    logits_p = _head_logits(un, w1pa_ref, bi, w1pb_ref, b1p_ref, wop_ref, bop_ref, act_primary)
    pe = jnp.exp(logits_p - jnp.max(logits_p, axis=-1, keepdims=True))
    tprob = pe * pl.reciprocal(jnp.sum(pe, axis=-1, keepdims=True), approx=True)   # [T, NT]

    # full head (activate=False)
    logits_f = _head_logits(un, w1fa_ref, bi, w1fb_ref, b1f_ref, wof_ref, bof_ref, act_full)
    xent = -jnp.sum(tprob * _log_softmax(logits_f), axis=-1, keepdims=True)        # [T, 1]

    # directional heads: forwards / backwards / future / past.
    # future/past see a zero-padded (non-circular) time shift, implemented as a tiny
    # shift-matrix matmul so it stays in VMEM and on the MXU (no wrapper-side jnp.roll).
    un_f = un[:, :u]
    un_b = un[:, u:]
    rows = lax.broadcasted_iota(jnp.int32, (t, t), 0)
    cols = lax.broadcasted_iota(jnp.int32, (t, t), 1)
    sh_fwd = (cols == rows - 1).astype(jnp.float32)      # fut[i] = un_f[i-1], 0 at i=0
    sh_bwd = (cols == rows + 1).astype(jnp.float32)      # pst[i] = un_b[i+1], 0 at i=T-1
    fut = jnp.dot(sh_fwd, un_f, preferred_element_type=jnp.float32)
    pst = jnp.dot(sh_bwd, un_b, preferred_element_type=jnp.float32)

    for h, xh in enumerate((un_f, un_b, fut, pst)):
        logits_h = _head_logits(xh, w1d_ref[h], None, None,
                                b1d_ref[h], wod_ref[h], bod_ref[h], True)
        xent = xent - jnp.sum(tprob * _log_softmax(logits_h), axis=-1, keepdims=True)

    num_ref[...] += jnp.sum(xent * msk, axis=(0, 1), keepdims=True)
    den_ref[...] += jnp.sum(msk, axis=(0, 1), keepdims=True)
    out_ref[...] = num_ref[...] / jnp.maximum(den_ref[...], 1.0)


# ----------------------------------------------------------------------------
# Parameter containers
# ----------------------------------------------------------------------------

class PredictionModule:
    def __init__(self, key, name, input_size, num_tags, input_size_2=0,
                 pre_output_layer_size=200, activate=True, roll_direction=0,
                 use_crf=False):
        self.name = name
        self.num_tags = num_tags
        self.activate = activate
        self.roll_direction = roll_direction
        self.use_crf = use_crf  # TODO(synk): CRF forward-algorithm / Viterbi not implemented.
        k1, k2, k3 = jax.random.split(key, 3)
        # W1 is stored pre-split by input block so the fused kernels never have to
        # concatenate features or row-slice weights at awkward offsets.
        self.w1_a = _init(k1, (input_size, pre_output_layer_size), dtype=jnp.bfloat16)
        self.w1_b = (_init(k2, (input_size_2, pre_output_layer_size), dtype=jnp.bfloat16)
                     if input_size_2 > 0 else None)
        self.b1 = jnp.zeros((1, pre_output_layer_size), jnp.float32)
        self.wo = _init(k3, (pre_output_layer_size, num_tags), dtype=jnp.bfloat16)
        self.bo = jnp.zeros((1, num_tags), jnp.float32)


class Encoder:
    # TODO(synk): the reference Encoder's LSTM recurrence is approximated by per-token
    # tanh projections (forward/backward halves); dropout is omitted.
    def __init__(self, key, num_words, num_chars, word_embedding_size,
                 char_embedding_size, out_channels_size, kernel_size_list,
                 uni_encoder_hidden_size, bi_encoder_hidden_size):
        self.word_embedding_size = word_embedding_size
        self.char_embedding_size = char_embedding_size
        self.out_channels_size = out_channels_size
        self.kernel_size_list = list(kernel_size_list)
        self.uni_hid = uni_encoder_hidden_size
        self.bi_hid = bi_encoder_hidden_size
        self.has_char = num_chars > 0

        nk = len(self.kernel_size_list)
        keys = jax.random.split(key, 8 + 2 * nk)
        self.word_emb = _init(keys[0], (num_words, word_embedding_size), 0.5)
        self.char_emb = (_init(keys[1], (num_chars, char_embedding_size), 0.5)
                         if self.has_char else None)

        self.conv_w, self.conv_b = [], []
        for i, k in enumerate(self.kernel_size_list):
            self.conv_w.append(_init(keys[2 + i], (k * char_embedding_size, out_channels_size),
                                     dtype=jnp.bfloat16))
            self.conv_b.append(jnp.zeros((1, out_channels_size), jnp.float32))

        nconv = out_channels_size * nk if self.has_char else 0
        self.wr_size = word_embedding_size + nconv

        # Fused uni projection (forward+backward halves concatenated on the output axis),
        # stored pre-split by input feature block (word part / one part per conv size).
        kb = 2 + nk
        self.uni_w_word = jnp.concatenate(
            [_init(keys[kb], (word_embedding_size, self.uni_hid), dtype=jnp.bfloat16),
             _init(keys[kb + 1], (word_embedding_size, self.uni_hid), dtype=jnp.bfloat16)],
            axis=1)
        self.uni_w_conv = []
        for i in range(nk if self.has_char else 0):
            kf, kbk = jax.random.split(keys[kb + 2 + i])
            self.uni_w_conv.append(jnp.concatenate(
                [_init(kf, (out_channels_size, self.uni_hid), dtype=jnp.bfloat16),
                 _init(kbk, (out_channels_size, self.uni_hid), dtype=jnp.bfloat16)], axis=1))
        self.uni_b = jnp.zeros((1, 2 * self.uni_hid), jnp.float32)
        self.bi_w = jnp.concatenate(
            [_init(keys[kb + 2 + nk], (2 * self.uni_hid, self.bi_hid), dtype=jnp.bfloat16),
             _init(keys[kb + 3 + nk], (2 * self.uni_hid, self.bi_hid), dtype=jnp.bfloat16)],
            axis=1)
        self.bi_b = jnp.zeros((1, 2 * self.bi_hid), jnp.float32)

    def get_input_sizes(self):
        return self.wr_size, self.uni_hid, self.bi_hid

    def get_representations(self, word_input, mode, char_tensor=None, mask=None):
        del mode, mask  # dropout omitted (eval-style forward)
        b, t = word_input.shape
        w_emb = self.word_emb[word_input]                 # [B,T,We]  (gather stays in JAX)
        use_char = self.has_char and char_tensor is not None

        inputs = [w_emb]
        specs = [_batch_spec(w_emb)]
        if use_char:
            c_emb = self.char_emb[char_tensor]            # [B,T,L,Ce]
            inputs.append(c_emb)
            specs.append(_batch_spec(c_emb))
            inputs += self.conv_w
            specs += [_const_spec(a) for a in self.conv_w]
            inputs += self.conv_b
            specs += [_const_spec(a) for a in self.conv_b]
        inputs.append(self.uni_w_word)
        specs.append(_const_spec(self.uni_w_word))
        if use_char:
            inputs += self.uni_w_conv
            specs += [_const_spec(a) for a in self.uni_w_conv]
        inputs += [self.uni_b, self.bi_w, self.bi_b]
        specs += [_const_spec(self.uni_b), _const_spec(self.bi_w), _const_spec(self.bi_b)]

        out_shapes = (
            jax.ShapeDtypeStruct((b, t, self.wr_size), jnp.float32),
            jax.ShapeDtypeStruct((b, t, 2 * self.uni_hid), jnp.float32),
            jax.ShapeDtypeStruct((b, t, 2 * self.bi_hid), jnp.float32),
        )
        out_specs = (
            pl.BlockSpec((1, t, self.wr_size), lambda i: (i, 0, 0)),
            pl.BlockSpec((1, t, 2 * self.uni_hid), lambda i: (i, 0, 0)),
            pl.BlockSpec((1, t, 2 * self.bi_hid), lambda i: (i, 0, 0)),
        )
        kern = functools.partial(
            _encoder_kernel,
            kernel_sizes=tuple(self.kernel_size_list) if use_char else (),
            out_ch=self.out_channels_size,
            word_emb_size=self.word_embedding_size,
            has_char=use_char)
        wr, un, bi = pl.pallas_call(
            kern, grid=(b,), in_specs=specs, out_specs=out_specs, out_shape=out_shapes,
            compiler_params=pltpu.CompilerParams(
                dimension_semantics=("parallel",), vmem_limit_bytes=_VMEM_LIMIT),
        )(*inputs)
        return wr, un, bi


# ----------------------------------------------------------------------------
# CVTModel
# ----------------------------------------------------------------------------

class CVTModel:
    def __init__(self, num_words, num_tags, num_chars=0,
                 word_embedding_size=32, char_embedding_size=16,
                 uni_encoder_hidden_size=32, bi_encoder_hidden_size=16,
                 out_channels_size=8, kernel_size_list=None,
                 pre_output_layer_size=32, use_crf=False, seed=0):
        self.num_words = num_words
        self.num_tags = num_tags
        self.num_chars = num_chars
        self.word_embedding_size = word_embedding_size
        self.char_embedding_size = char_embedding_size
        self.uni_encoder_hidden_size = uni_encoder_hidden_size
        self.bi_encoder_hidden_size = bi_encoder_hidden_size
        self.out_channels_size = out_channels_size
        self.kernel_size_list = kernel_size_list or [2, 3, 4]
        self.pre_output_layer_size = pre_output_layer_size
        self.use_crf = use_crf  # TODO(synk): CRF path not implemented; soft-projection path used.
        self.seed = seed

    def initialize(self):
        key = jax.random.PRNGKey(self.seed)
        ks = jax.random.split(key, 8)
        self.encoder = Encoder(ks[0], self.num_words, self.num_chars,
                               self.word_embedding_size, self.char_embedding_size,
                               self.out_channels_size, self.kernel_size_list,
                               self.uni_encoder_hidden_size, self.bi_encoder_hidden_size)
        self.wr_size, self.uni_input_size, self.bi_input_size = self.encoder.get_input_sizes()
        p = self.pre_output_layer_size
        self.primary = PredictionModule(ks[1], "primary", self.uni_input_size * 2,
                                        self.num_tags, input_size_2=self.bi_input_size * 2,
                                        pre_output_layer_size=p, use_crf=self.use_crf)
        self.full = PredictionModule(ks[2], "full", self.uni_input_size * 2,
                                     self.num_tags, input_size_2=self.bi_input_size * 2,
                                     pre_output_layer_size=p, activate=False,
                                     use_crf=self.use_crf)
        self.forwards = PredictionModule(ks[3], "forwards", self.uni_input_size,
                                         self.num_tags, pre_output_layer_size=p,
                                         use_crf=self.use_crf)
        self.backwards = PredictionModule(ks[4], "backwards", self.uni_input_size,
                                          self.num_tags, pre_output_layer_size=p,
                                          use_crf=self.use_crf)
        self.future = PredictionModule(ks[5], "future", self.uni_input_size,
                                       self.num_tags, pre_output_layer_size=p,
                                       roll_direction=1, use_crf=self.use_crf)
        self.past = PredictionModule(ks[6], "past", self.uni_input_size,
                                     self.num_tags, pre_output_layer_size=p,
                                     roll_direction=-1, use_crf=self.use_crf)
        # Pre-stack the four directional heads so the unlabeled kernel reads one set of
        # stacked weight tensors instead of 16 separate arrays.
        dirs = (self.forwards, self.backwards, self.future, self.past)
        self._dir_w1 = jnp.stack([m.w1_a for m in dirs])   # [4, u, P]  bf16
        self._dir_b1 = jnp.stack([m.b1 for m in dirs])     # [4, 1, P]
        self._dir_wo = jnp.stack([m.wo for m in dirs])     # [4, P, NT] bf16
        self._dir_bo = jnp.stack([m.bo for m in dirs])     # [4, 1, NT]

    def forward(self, word_input, mode, char_input=None, mask=None, label=None, unk_id=None):
        del unk_id  # only used by the 'rnn' char_compose_method path (not implemented)
        wr, un, bi = self.encoder.get_representations(word_input, mode,
                                                      char_tensor=char_input, mask=mask)
        del wr  # only needed by the 'rnn' char_compose_method losses
        b, t = word_input.shape
        if mask is None:
            mask = jnp.ones((b, t), jnp.float32)
        mask3 = mask.reshape(b, t, 1).astype(jnp.float32)

        loss_params = pltpu.CompilerParams(dimension_semantics=("arbitrary",),
                                           vmem_limit_bytes=_VMEM_LIMIT)
        loss_out_shape = jax.ShapeDtypeStruct((1, 1), jnp.float32)
        loss_out_spec = pl.BlockSpec((1, 1), lambda i: (0, 0))
        scratch = [pltpu.VMEM((1, 1), jnp.float32), pltpu.VMEM((1, 1), jnp.float32)]

        if mode == "labeled":
            lab3 = label.reshape(b, t, 1).astype(jnp.int32)
            p = self.primary
            inputs = [un, bi, lab3, mask3, p.w1_a, p.w1_b, p.b1, p.wo, p.bo]
            specs = ([_batch_spec(un), _batch_spec(bi), _batch_spec(lab3), _batch_spec(mask3)]
                     + [_const_spec(a) for a in inputs[4:]])
            out = pl.pallas_call(
                functools.partial(_primary_hard_loss_kernel, activate=p.activate),
                grid=(b,), in_specs=specs, out_specs=loss_out_spec,
                out_shape=loss_out_shape, scratch_shapes=scratch,
                compiler_params=loss_params)(*inputs)
            return out[0, 0]
        elif mode == "unlabeled":
            # primary is the frozen teacher; forward-only here so no gradients flow anyway.
            p, f = self.primary, self.full
            inputs = [un, bi, mask3,
                      p.w1_a, p.w1_b, p.b1, p.wo, p.bo,
                      f.w1_a, f.w1_b, f.b1, f.wo, f.bo,
                      self._dir_w1, self._dir_b1, self._dir_wo, self._dir_bo]
            specs = ([_batch_spec(un), _batch_spec(bi), _batch_spec(mask3)]
                     + [_const_spec(a) for a in inputs[3:]])
            out = pl.pallas_call(
                functools.partial(_unlabeled_cvt_loss_kernel,
                                  uni_size=self.uni_input_size,
                                  act_primary=p.activate, act_full=f.activate),
                grid=(b,), in_specs=specs, out_specs=loss_out_spec,
                out_shape=loss_out_shape, scratch_shapes=scratch,
                compiler_params=loss_params)(*inputs)
            return out[0, 0]
        else:
            raise ValueError(f"unknown mode {mode}")


# ----------------------------------------------------------------------------
# Demo
# ----------------------------------------------------------------------------

if __name__ == "__main__":
    B, T, L = 2, 8, 6
    NUM_WORDS, NUM_TAGS, NUM_CHARS = 100, 8, 30

    model = CVTModel(NUM_WORDS, NUM_TAGS, num_chars=NUM_CHARS,
                     word_embedding_size=32, char_embedding_size=16,
                     uni_encoder_hidden_size=32, bi_encoder_hidden_size=16,
                     out_channels_size=8, kernel_size_list=[2, 3, 4],
                     pre_output_layer_size=32, use_crf=False, seed=0)
    model.initialize()

    key = jax.random.PRNGKey(0)
    k_w, k_c, k_l = jax.random.split(key, 3)
    word_input = jax.random.randint(k_w, (B, T), 0, NUM_WORDS, dtype=jnp.int32)
    char_input = jax.random.randint(k_c, (B, T, L), 0, NUM_CHARS, dtype=jnp.int32)
    label = jax.random.randint(k_l, (B, T), 0, NUM_TAGS, dtype=jnp.int32)
    mask = jnp.ones((B, T), jnp.float32).at[:, -2:].set(0.0)  # last 2 positions padded

    loss_lab = model.forward(word_input, "labeled", char_input=char_input,
                             mask=mask, label=label)
    loss_unlab = model.forward(word_input, "unlabeled", char_input=char_input,
                               mask=mask)
    jax.block_until_ready((loss_lab, loss_unlab))

    assert jnp.isfinite(loss_lab) and jnp.isfinite(loss_unlab)
    print("KERNEL_OK")
</pallas_src>

<mosaic_0001>
module attributes {stable_mosaic.version = 11 : i64} {
  func.func @_encoder_kernel(%arg0: i32, %arg1: memref<1x8x32xf32, #tpu.memory_space<vmem>>, %arg2: memref<1x8x6x16xf32, #tpu.memory_space<vmem>>, %arg3: memref<32x8xbf16, #tpu.memory_space<vmem>>, %arg4: memref<48x8xbf16, #tpu.memory_space<vmem>>, %arg5: memref<64x8xbf16, #tpu.memory_space<vmem>>, %arg6: memref<1x8xf32, #tpu.memory_space<vmem>>, %arg7: memref<1x8xf32, #tpu.memory_space<vmem>>, %arg8: memref<1x8xf32, #tpu.memory_space<vmem>>, %arg9: memref<32x64xbf16, #tpu.memory_space<vmem>>, %arg10: memref<8x64xbf16, #tpu.memory_space<vmem>>, %arg11: memref<8x64xbf16, #tpu.memory_space<vmem>>, %arg12: memref<8x64xbf16, #tpu.memory_space<vmem>>, %arg13: memref<1x64xf32, #tpu.memory_space<vmem>>, %arg14: memref<64x32xbf16, #tpu.memory_space<vmem>>, %arg15: memref<1x32xf32, #tpu.memory_space<vmem>>, %arg16: memref<1x8x56xf32, #tpu.memory_space<vmem>>, %arg17: memref<1x8x64xf32, #tpu.memory_space<vmem>>, %arg18: memref<1x8x32xf32, #tpu.memory_space<vmem>>) attributes {dimension_semantics = [#tpu.dimension_semantics<parallel>], iteration_bounds = array<i64: 2>, scalar_prefetch = 0 : i64, scratch_operands = 0 : i64, tpu.core_type = #tpu.core_type<tc>, window_params = [{transform_indices = @transform_0, window_bounds = array<i64: 1, 8, 32>}, {transform_indices = @transform_1, window_bounds = array<i64: 1, 8, 6, 16>}, {pipeline_mode = #tpu.pipeline_mode<synchronous>, transform_indices = @transform_2, window_bounds = array<i64: 32, 8>}, {pipeline_mode = #tpu.pipeline_mode<synchronous>, transform_indices = @transform_3, window_bounds = array<i64: 48, 8>}, {pipeline_mode = #tpu.pipeline_mode<synchronous>, transform_indices = @transform_4, window_bounds = array<i64: 64, 8>}, {pipeline_mode = #tpu.pipeline_mode<synchronous>, transform_indices = @transform_5, window_bounds = array<i64: 1, 8>}, {pipeline_mode = #tpu.pipeline_mode<synchronous>, transform_indices = @transform_6, window_bounds = array<i64: 1, 8>}, {pipeline_mode = #tpu.pipeline_mode<synchronous>, transform_indices = @transform_7, window_bounds = array<i64: 1, 8>}, {pipeline_mode = #tpu.pipeline_mode<synchronous>, transform_indices = @transform_8, window_bounds = array<i64: 32, 64>}, {pipeline_mode = #tpu.pipeline_mode<synchronous>, transform_indices = @transform_9, window_bounds = array<i64: 8, 64>}, {pipeline_mode = #tpu.pipeline_mode<synchronous>, transform_indices = @transform_10, window_bounds = array<i64: 8, 64>}, {pipeline_mode = #tpu.pipeline_mode<synchronous>, transform_indices = @transform_11, window_bounds = array<i64: 8, 64>}, {pipeline_mode = #tpu.pipeline_mode<synchronous>, transform_indices = @transform_12, window_bounds = array<i64: 1, 64>}, {pipeline_mode = #tpu.pipeline_mode<synchronous>, transform_indices = @transform_13, window_bounds = array<i64: 64, 32>}, {pipeline_mode = #tpu.pipeline_mode<synchronous>, transform_indices = @transform_14, window_bounds = array<i64: 1, 32>}, {transform_indices = @transform_15, window_bounds = array<i64: 1, 8, 56>}, {transform_indices = @transform_16, window_bounds = array<i64: 1, 8, 64>}, {transform_indices = @transform_17, window_bounds = array<i64: 1, 8, 32>}]} {
    %c0 = arith.constant 0 : index
    %c0_0 = arith.constant 0 : index
    %c0_1 = arith.constant 0 : index
    %0 = vector.load %arg1[%c0, %c0_0, %c0_1] : memref<1x8x32xf32, #tpu.memory_space<vmem>>, vector<1x8x32xf32>
    %1 = vector.shape_cast %0 : vector<1x8x32xf32> to vector<8x32xf32>
    %c0_2 = arith.constant 0 : index
    %c0_3 = arith.constant 0 : index
    %c0_4 = arith.constant 0 : index
    %2 = vector.load %arg16[%c0_2, %c0_3, %c0_4] : memref<1x8x56xf32, #tpu.memory_space<vmem>>, vector<1x8x32xf32>
    %3 = vector.shape_cast %2 : vector<1x8x32xf32> to vector<8x32xf32>
    %4 = vector.shape_cast %1 : vector<8x32xf32> to vector<1x8x32xf32>
    tpu.vector_store %arg16[%c0_2, %c0_3, %c0_4], %4 {strides = array<i32>} : memref<1x8x56xf32, #tpu.memory_space<vmem>>, vector<1x8x32xf32>,
    %5 = arith.truncf %1 : vector<8x32xf32> to vector<8x32xbf16>
    %c0_5 = arith.constant 0 : index
    %c0_6 = arith.constant 0 : index
    %6 = vector.load %arg9[%c0_5, %c0_6] : memref<32x64xbf16, #tpu.memory_space<vmem>>, vector<32x64xbf16>
    %cst = arith.constant dense<0.000000e+00> : vector<8x64xf32>
    %7 = tpu.matmul %5, %6, %cst {dimension_numbers = #tpu.dot_dimension_numbers<[1], [0], [0], [1], [0, 0, 1, 1], [], []>} : vector<8x32xbf16>, vector<32x64xbf16>, vector<8x64xf32> -> vector<8x64xf32>
    %c0_7 = arith.constant 0 : index
    %c0_8 = arith.constant 0 : index
    %c0_9 = arith.constant 0 : index
    %c0_10 = arith.constant 0 : index
    %8 = vector.load %arg2[%c0_7, %c0_8, %c0_9, %c0_10] : memref<1x8x6x16xf32, #tpu.memory_space<vmem>>, vector<1x8x1x16xf32>
    %9 = vector.shape_cast %8 : vector<1x8x1x16xf32> to vector<8x16xf32>
    %c0_11 = arith.constant 0 : index
    %c0_12 = arith.constant 0 : index
    %10 = vector.load %arg3[%c0_11, %c0_12] : memref<32x8xbf16, #tpu.memory_space<vmem>>, vector<16x8xbf16>
    %11 = arith.truncf %9 : vector<8x16xf32> to vector<8x16xbf16>
    %cst_13 = arith.constant dense<0.000000e+00> : vector<8x8xf32>
    %12 = tpu.matmul %11, %10, %cst_13 {dimension_numbers = #tpu.dot_dimension_numbers<[1], [0], [0], [1], [0, 0, 1, 1], [], []>} : vector<8x16xbf16>, vector<16x8xbf16>, vector<8x8xf32> -> vector<8x8xf32>
    %c0_14 = arith.constant 0 : index
    %c0_15 = arith.constant 0 : index
    %c1 = arith.constant 1 : index
    %c0_16 = arith.constant 0 : index
    %13 = vector.load %arg2[%c0_14, %c0_15, %c1, %c0_16] : memref<1x8x6x16xf32, #tpu.memory_space<vmem>>, vector<1x8x1x16xf32>
    %14 = vector.shape_cast %13 : vector<1x8x1x16xf32> to vector<8x16xf32>
    %c16 = arith.constant 16 : index
    %c0_17 = arith.constant 0 : index
    %15 = vector.load %arg3[%c16, %c0_17] : memref<32x8xbf16, #tpu.memory_space<vmem>>, vector<16x8xbf16>
    %16 = arith.truncf %14 : vector<8x16xf32> to vector<8x16xbf16>
    %cst_18 = arith.constant dense<0.000000e+00> : vector<8x8xf32>
    %17 = tpu.matmul %16, %15, %cst_18 {dimension_numbers = #tpu.dot_dimension_numbers<[1], [0], [0], [1], [0, 0, 1, 1], [], []>} : vector<8x16xbf16>, vector<16x8xbf16>, vector<8x8xf32> -> vector<8x8xf32>
    %18 = arith.addf %12, %17 : vector<8x8xf32>
    %c0_19 = arith.constant 0 : index
    %c0_20 = arith.constant 0 : index
    %19 = vector.load %arg6[%c0_19, %c0_20] : memref<1x8xf32, #tpu.memory_space<vmem>>, vector<1x8xf32>
    %20 = vector.broadcast %19 : vector<1x8xf32> to vector<8x8xf32>
    %21 = arith.addf %18, %20 : vector<8x8xf32>
    %cst_21 = arith.constant 0.000000e+00 : f32
    %22 = vector.broadcast %cst_21 : f32 to vector<8x8xf32>
    %23 = arith.maximumf %21, %22 : vector<8x8xf32>
    %c0_22 = arith.constant 0 : index
    %c0_23 = arith.constant 0 : index
    %c1_24 = arith.constant 1 : index
    %c0_25 = arith.constant 0 : index
    %24 = vector.load %arg2[%c0_22, %c0_23, %c1_24, %c0_25] : memref<1x8x6x16xf32, #tpu.memory_space<vmem>>, vector<1x8x1x16xf32>
    %25 = vector.shape_cast %24 : vector<1x8x1x16xf32> to vector<8x16xf32>
    %c0_26 = arith.constant 0 : index
    %c0_27 = arith.constant 0 : index
    %26 = vector.load %arg3[%c0_26, %c0_27] : memref<32x8xbf16, #tpu.memory_space<vmem>>, vector<16x8xbf16>
    %27 = arith.truncf %25 : vector<8x16xf32> to vector<8x16xbf16>
    %cst_28 = arith.constant dense<0.000000e+00> : vector<8x8xf32>
    %28 = tpu.matmul %27, %26, %cst_28 {dimension_numbers = #tpu.dot_dimension_numbers<[1], [0], [0], [1], [0, 0, 1, 1], [], []>} : vector<8x16xbf16>, vector<16x8xbf16>, vector<8x8xf32> -> vector<8x8xf32>
    %c0_29 = arith.constant 0 : index
    %c0_30 = arith.constant 0 : index
    %c2 = arith.constant 2 : index
    %c0_31 = arith.constant 0 : index
    %29 = vector.load %arg2[%c0_29, %c0_30, %c2, %c0_31] : memref<1x8x6x16xf32, #tpu.memory_space<vmem>>, vector<1x8x1x16xf32>
    %30 = vector.shape_cast %29 : vector<1x8x1x16xf32> to vector<8x16xf32>
    %c16_32 = arith.constant 16 : index
    %c0_33 = arith.constant 0 : index
    %31 = vector.load %arg3[%c16_32, %c0_33] : memref<32x8xbf16, #tpu.memory_space<vmem>>, vector<16x8xbf16>
    %32 = arith.truncf %30 : vector<8x16xf32> to vector<8x16xbf16>
    %cst_34 = arith.constant dense<0.000000e+00> : vector<8x8xf32>
    %33 = tpu.matmul %32, %31, %cst_34 {dimension_numbers = #tpu.dot_dimension_numbers<[1], [0], [0], [1], [0, 0, 1, 1], [], []>} : vector<8x16xbf16>, vector<16x8xbf16>, vector<8x8xf32> -> vector<8x8xf32>
    %34 = arith.addf %28, %33 : vector<8x8xf32>
    %c0_35 = arith.constant 0 : index
    %c0_36 = arith.constant 0 : index
    %35 = vector.load %arg6[%c0_35, %c0_36] : memref<1x8xf32, #tpu.memory_space<vmem>>, vector<1x8xf32>
    %36 = vector.broadcast %35 : vector<1x8xf32> to vector<8x8xf32>
    %37 = arith.addf %34, %36 : vector<8x8xf32>
    %cst_37 = arith.constant 0.000000e+00 : f32
    %38 = vector.broadcast %cst_37 : f32 to vector<8x8xf32>
    %39 = arith.maximumf %37, %38 : vector<8x8xf32>
    %40 = arith.maximumf %23, %39 : vector<8x8xf32>
    %c0_38 = arith.constant 0 : index
    %c0_39 = arith.constant 0 : index
    %c2_40 = arith.constant 2 : index
    %c0_41 = arith.constant 0 : index
    %41 = vector.load %arg2[%c0_38, %c0_39, %c2_40, %c0_41] : memref<1x8x6x16xf32, #tpu.memory_space<vmem>>, vector<1x8x1x16xf32>
    %42 = vector.shape_cast %41 : vector<1x8x1x16xf32> to vector<8x16xf32>
    %c0_42 = arith.constant 0 : index
    %c0_43 = arith.constant 0 : index
    %43 = vector.load %arg3[%c0_42, %c0_43] : memref<32x8xbf16, #tpu.memory_space<vmem>>, vector<16x8xbf16>
    %44 = arith.truncf %42 : vector<8x16xf32> to vector<8x16xbf16>
    %cst_44 = arith.constant dense<0.000000e+00> : vector<8x8xf32>
    %45 = tpu.matmul %44, %43, %cst_44 {dimension_numbers = #tpu.dot_dimension_numbers<[1], [0], [0], [1], [0, 0, 1, 1], [], []>} : vector<8x16xbf16>, vector<16x8xbf16>, vector<8x8xf32> -> vector<8x8xf32>
    %c0_45 = arith.constant 0 : index
    %c0_46 = arith.constant 0 : index
    %c3 = arith.constant 3 : index
    %c0_47 = arith.constant 0 : index
    %46 = vector.load %arg2[%c0_45, %c0_46, %c3, %c0_47] : memref<1x8x6x16xf32, #tpu.memory_space<vmem>>, vector<1x8x1x16xf32>
    %47 = vector.shape_cast %46 : vector<1x8x1x16xf32> to vector<8x16xf32>
    %c16_48 = arith.constant 16 : index
    %c0_49 = arith.constant 0 : index
    %48 = vector.load %arg3[%c16_48, %c0_49] : memref<32x8xbf16, #tpu.memory_space<vmem>>, vector<16x8xbf16>
    %49 = arith.truncf %47 : vector<8x16xf32> to vector<8x16xbf16>
    %cst_50 = arith.constant dense<0.000000e+00> : vector<8x8xf32>
    %50 = tpu.matmul %49, %48, %cst_50 {dimension_numbers = #tpu.dot_dimension_numbers<[1], [0], [0], [1], [0, 0, 1, 1], [], []>} : vector<8x16xbf16>, vector<16x8xbf16>, vector<8x8xf32> -> vector<8x8xf32>
    %51 = arith.addf %45, %50 : vector<8x8xf32>
    %c0_51 = arith.constant 0 : index
    %c0_52 = arith.constant 0 : index
    %52 = vector.load %arg6[%c0_51, %c0_52] : memref<1x8xf32, #tpu.memory_space<vmem>>, vector<1x8xf32>
    %53 = vector.broadcast %52 : vector<1x8xf32> to vector<8x8xf32>
    %54 = arith.addf %51, %53 : vector<8x8xf32>
    %cst_53 = arith.constant 0.000000e+00 : f32
    %55 = vector.broadcast %cst_53 : f32 to vector<8x8xf32>
    %56 = arith.maximumf %54, %55 : vector<8x8xf32>
    %57 = arith.maximumf %40, %56 : vector<8x8xf32>
    %c0_54 = arith.constant 0 : index
    %c0_55 = arith.constant 0 : index
    %c3_56 = arith.constant 3 : index
    %c0_57 = arith.constant 0 : index
    %58 = vector.load %arg2[%c0_54, %c0_55, %c3_56, %c0_57] : memref<1x8x6x16xf32, #tpu.memory_space<vmem>>, vector<1x8x1x16xf32>
    %59 = vector.shape_cast %58 : vector<1x8x1x16xf32> to vector<8x16xf32>
    %c0_58 = arith.constant 0 : index
    %c0_59 = arith.constant 0 : index
    %60 = vector.load %arg3[%c0_58, %c0_59] : memref<32x8xbf16, #tpu.memory_space<vmem>>, vector<16x8xbf16>
    %61 = arith.truncf %59 : vector<8x16xf32> to vector<8x16xbf16>
    %cst_60 = arith.constant dense<0.000000e+00> : vector<8x8xf32>
    %62 = tpu.matmul %61, %60, %cst_60 {dimension_numbers = #tpu.dot_dimension_numbers<[1], [0], [0], [1], [0, 0, 1, 1], [], []>} : vector<8x16xbf16>, vector<16x8xbf16>, vector<8x8xf32> -> vector<8x8xf32>
    %c0_61 = arith.constant 0 : index
    %c0_62 = arith.constant 0 : index
    %c4 = arith.constant 4 : index
    %c0_63 = arith.constant 0 : index
    %63 = vector.load %arg2[%c0_61, %c0_62, %c4, %c0_63] : memref<1x8x6x16xf32, #tpu.memory_space<vmem>>, vector<1x8x1x16xf32>
    %64 = vector.shape_cast %63 : vector<1x8x1x16xf32> to vector<8x16xf32>
    %c16_64 = arith.constant 16 : index
    %c0_65 = arith.constant 0 : index
    %65 = vector.load %arg3[%c16_64, %c0_65] : memref<32x8xbf16, #tpu.memory_space<vmem>>, vector<16x8xbf16>
    %66 = arith.truncf %64 : vector<8x16xf32> to vector<8x16xbf16>
    %cst_66 = arith.constant dense<0.000000e+00> : vector<8x8xf32>
    %67 = tpu.matmul %66, %65, %cst_66 {dimension_numbers = #tpu.dot_dimension_numbers<[1], [0], [0], [1], [0, 0, 1, 1], [], []>} : vector<8x16xbf16>, vector<16x8xbf16>, vector<8x8xf32> -> vector<8x8xf32>
    %68 = arith.addf %62, %67 : vector<8x8xf32>
    %c0_67 = arith.constant 0 : index
    %c0_68 = arith.constant 0 : index
    %69 = vector.load %arg6[%c0_67, %c0_68] : memref<1x8xf32, #tpu.memory_space<vmem>>, vector<1x8xf32>
    %70 = vector.broadcast %69 : vector<1x8xf32> to vector<8x8xf32>
    %71 = arith.addf %68, %70 : vector<8x8xf32>
    %cst_69 = arith.constant 0.000000e+00 : f32
    %72 = vector.broadcast %cst_69 : f32 to vector<8x8xf32>
    %73 = arith.maximumf %71, %72 : vector<8x8xf32>
    %74 = arith.maximumf %57, %73 : vector<8x8xf32>
    %c0_70 = arith.constant 0 : index
    %c0_71 = arith.constant 0 : index
    %c4_72 = arith.constant 4 : index
    %c0_73 = arith.constant 0 : index
    %75 = vector.load %arg2[%c0_70, %c0_71, %c4_72, %c0_73] : memref<1x8x6x16xf32, #tpu.memory_space<vmem>>, vector<1x8x1x16xf32>
    %76 = vector.shape_cast %75 : vector<1x8x1x16xf32> to vector<8x16xf32>
    %c0_74 = arith.constant 0 : index
    %c0_75 = arith.constant 0 : index
    %77 = vector.load %arg3[%c0_74, %c0_75] : memref<32x8xbf16, #tpu.memory_space<vmem>>, vector<16x8xbf16>
    %78 = arith.truncf %76 : vector<8x16xf32> to vector<8x16xbf16>
    %cst_76 = arith.constant dense<0.000000e+00> : vector<8x8xf32>
    %79 = tpu.matmul %78, %77, %cst_76 {dimension_numbers = #tpu.dot_dimension_numbers<[1], [0], [0], [1], [0, 0, 1, 1], [], []>} : vector<8x16xbf16>, vector<16x8xbf16>, vector<8x8xf32> -> vector<8x8xf32>
    %c0_77 = arith.constant 0 : index
    %c0_78 = arith.constant 0 : index
    %c5 = arith.constant 5 : index
    %c0_79 = arith.constant 0 : index
    %80 = vector.load %arg2[%c0_77, %c0_78, %c5, %c0_79] : memref<1x8x6x16xf32, #tpu.memory_space<vmem>>, vector<1x8x1x16xf32>
    %81 = vector.shape_cast %80 : vector<1x8x1x16xf32> to vector<8x16xf32>
    %c16_80 = arith.constant 16 : index
    %c0_81 = arith.constant 0 : index
    %82 = vector.load %arg3[%c16_80, %c0_81] : memref<32x8xbf16, #tpu.memory_space<vmem>>, vector<16x8xbf16>
    %83 = arith.truncf %81 : vector<8x16xf32> to vector<8x16xbf16>
    %cst_82 = arith.constant dense<0.000000e+00> : vector<8x8xf32>
    %84 = tpu.matmul %83, %82, %cst_82 {dimension_numbers = #tpu.dot_dimension_numbers<[1], [0], [0], [1], [0, 0, 1, 1], [], []>} : vector<8x16xbf16>, vector<16x8xbf16>, vector<8x8xf32> -> vector<8x8xf32>
    %85 = arith.addf %79, %84 : vector<8x8xf32>
    %c0_83 = arith.constant 0 : index
    %c0_84 = arith.constant 0 : index
    %86 = vector.load %arg6[%c0_83, %c0_84] : memref<1x8xf32, #tpu.memory_space<vmem>>, vector<1x8xf32>
    %87 = vector.broadcast %86 : vector<1x8xf32> to vector<8x8xf32>
    %88 = arith.addf %85, %87 : vector<8x8xf32>
    %cst_85 = arith.constant 0.000000e+00 : f32
    %89 = vector.broadcast %cst_85 : f32 to vector<8x8xf32>
    %90 = arith.maximumf %88, %89 : vector<8x8xf32>
    %91 = arith.maximumf %74, %90 : vector<8x8xf32>
    %c0_86 = arith.constant 0 : index
    %c0_87 = arith.constant 0 : index
    %c32 = arith.constant 32 : index
    %92 = vector.load %arg16[%c0_86, %c0_87, %c32] : memref<1x8x56xf32, #tpu.memory_space<vmem>>, vector<1x8x8xf32>
    %93 = vector.shape_cast %92 : vector<1x8x8xf32> to vector<8x8xf32>
    %94 = vector.shape_cast %91 : vector<8x8xf32> to vector<1x8x8xf32>
    tpu.vector_store %arg16[%c0_86, %c0_87, %c32], %94 {strides = array<i32>} : memref<1x8x56xf32, #tpu.memory_space<vmem>>, vector<1x8x8xf32>,
    %95 = arith.truncf %91 : vector<8x8xf32> to vector<8x8xbf16>
    %c0_88 = arith.constant 0 : index
    %c0_89 = arith.constant 0 : index
    %96 = vector.load %arg10[%c0_88, %c0_89] : memref<8x64xbf16, #tpu.memory_space<vmem>>, vector<8x64xbf16>
    %cst_90 = arith.constant dense<0.000000e+00> : vector<8x64xf32>
    %97 = tpu.matmul %95, %96, %cst_90 {dimension_numbers = #tpu.dot_dimension_numbers<[1], [0], [0], [1], [0, 0, 1, 1], [], []>} : vector<8x8xbf16>, vector<8x64xbf16>, vector<8x64xf32> -> vector<8x64xf32>
    %98 = arith.addf %7, %97 : vector<8x64xf32>
    %c0_91 = arith.constant 0 : index
    %c0_92 = arith.constant 0 : index
    %c0_93 = arith.constant 0 : index
    %c0_94 = arith.constant 0 : index
    %99 = vector.load %arg2[%c0_91, %c0_92, %c0_93, %c0_94] : memref<1x8x6x16xf32, #tpu.memory_space<vmem>>, vector<1x8x1x16xf32>
    %100 = vector.shape_cast %99 : vector<1x8x1x16xf32> to vector<8x16xf32>
    %c0_95 = arith.constant 0 : index
    %c0_96 = arith.constant 0 : index
    %101 = vector.load %arg4[%c0_95, %c0_96] : memref<48x8xbf16, #tpu.memory_space<vmem>>, vector<16x8xbf16>
    %102 = arith.truncf %100 : vector<8x16xf32> to vector<8x16xbf16>
    %cst_97 = arith.constant dense<0.000000e+00> : vector<8x8xf32>
    %103 = tpu.matmul %102, %101, %cst_97 {dimension_numbers = #tpu.dot_dimension_numbers<[1], [0], [0], [1], [0, 0, 1, 1], [], []>} : vector<8x16xbf16>, vector<16x8xbf16>, vector<8x8xf32> -> vector<8x8xf32>
    %c0_98 = arith.constant 0 : index
    %c0_99 = arith.constant 0 : index
    %c1_100 = arith.constant 1 : index
    %c0_101 = arith.constant 0 : index
    %104 = vector.load %arg2[%c0_98, %c0_99, %c1_100, %c0_101] : memref<1x8x6x16xf32, #tpu.memory_space<vmem>>, vector<1x8x1x16xf32>
    %105 = vector.shape_cast %104 : vector<1x8x1x16xf32> to vector<8x16xf32>
    %c16_102 = arith.constant 16 : index
    %c0_103 = arith.constant 0 : index
    %106 = vector.load %arg4[%c16_102, %c0_103] : memref<48x8xbf16, #tpu.memory_space<vmem>>, vector<16x8xbf16>
    %107 = arith.truncf %105 : vector<8x16xf32> to vector<8x16xbf16>
    %cst_104 = arith.constant dense<0.000000e+00> : vector<8x8xf32>
    %108 = tpu.matmul %107, %106, %cst_104 {dimension_numbers = #tpu.dot_dimension_numbers<[1], [0], [0], [1], [0, 0, 1, 1], [], []>} : vector<8x16xbf16>, vector<16x8xbf16>, vector<8x8xf32> -> vector<8x8xf32>
    %109 = arith.addf %103, %108 : vector<8x8xf32>
    %c0_105 = arith.constant 0 : index
    %c0_106 = arith.constant 0 : index
    %c2_107 = arith.constant 2 : index
    %c0_108 = arith.constant 0 : index
    %110 = vector.load %arg2[%c0_105, %c0_106, %c2_107, %c0_108] : memref<1x8x6x16xf32, #tpu.memory_space<vmem>>, vector<1x8x1x16xf32>
    %111 = vector.shape_cast %110 : vector<1x8x1x16xf32> to vector<8x16xf32>
    %c32_109 = arith.constant 32 : index
    %c0_110 = arith.constant 0 : index
    %112 = vector.load %arg4[%c32_109, %c0_110] : memref<48x8xbf16, #tpu.memory_space<vmem>>, vector<16x8xbf16>
    %113 = arith.truncf %111 : vector<8x16xf32> to vector<8x16xbf16>
    %cst_111 = arith.constant dense<0.000000e+00> : vector<8x8xf32>
    %114 = tpu.matmul %113, %112, %cst_111 {dimension_numbers = #tpu.dot_dimension_numbers<[1], [0], [0], [1], [0, 0, 1, 1], [], []>} : vector<8x16xbf16>, vector<16x8xbf16>, vector<8x8xf32> -> vector<8x8xf32>
    %115 = arith.addf %109, %114 : vector<8x8xf32>
    %c0_112 = arith.constant 0 : index
    %c0_113 = arith.constant 0 : index
    %116 = vector.load %arg7[%c0_112, %c0_113] : memref<1x8xf32, #tpu.memory_space<vmem>>, vector<1x8xf32>
    %117 = vector.broadcast %116 : vector<1x8xf32> to vector<8x8xf32>
    %118 = arith.addf %115, %117 : vector<8x8xf32>
    %cst_114 = arith.constant 0.000000e+00 : f32
    %119 = vector.broadcast %cst_114 : f32 to vector<8x8xf32>
    %120 = arith.maximumf %118, %119 : vector<8x8xf32>
    %c0_115 = arith.constant 0 : index
    %c0_116 = arith.constant 0 : index
    %c1_117 = arith.constant 1 : index
    %c0_118 = arith.constant 0 : index
    %121 = vector.load %arg2[%c0_115, %c0_116, %c1_117, %c0_118] : memref<1x8x6x16xf32, #tpu.memory_space<vmem>>, vector<1x8x1x16xf32>
    %122 = vector.shape_cast %121 : vector<1x8x1x16xf32> to vector<8x16xf32>
    %c0_119 = arith.constant 0 : index
    %c0_120 = arith.constant 0 : index
    %123 = vector.load %arg4[%c0_119, %c0_120] : memref<48x8xbf16, #tpu.memory_space<vmem>>, vector<16x8xbf16>
    %124 = arith.truncf %122 : vector<8x16xf32> to vector<8x16xbf16>
    %cst_121 = arith.constant dense<0.000000e+00> : vector<8x8xf32>
    %125 = tpu.matmul %124, %123, %cst_121 {dimension_numbers = #tpu.dot_dimension_numbers<[1], [0], [0], [1], [0, 0, 1, 1], [], []>} : vector<8x16xbf16>, vector<16x8xbf16>, vector<8x8xf32> -> vector<8x8xf32>
    %c0_122 = arith.constant 0 : index
    %c0_123 = arith.constant 0 : index
    %c2_124 = arith.constant 2 : index
    %c0_125 = arith.constant 0 : index
    %126 = vector.load %arg2[%c0_122, %c0_123, %c2_124, %c0_125] : memref<1x8x6x16xf32, #tpu.memory_space<vmem>>, vector<1x8x1x16xf32>
    %127 = vector.shape_cast %126 : vector<1x8x1x16xf32> to vector<8x16xf32>
    %c16_126 = arith.constant 16 : index
    %c0_127 = arith.constant 0 : index
    %128 = vector.load %arg4[%c16_126, %c0_127] : memref<48x8xbf16, #tpu.memory_space<vmem>>, vector<16x8xbf16>
    %129 = arith.truncf %127 : vector<8x16xf32> to vector<8x16xbf16>
    %cst_128 = arith.constant dense<0.000000e+00> : vector<8x8xf32>
    %130 = tpu.matmul %129, %128, %cst_128 {dimension_numbers = #tpu.dot_dimension_numbers<[1], [0], [0], [1], [0, 0, 1, 1], [], []>} : vector<8x16xbf16>, vector<16x8xbf16>, vector<8x8xf32> -> vector<8x8xf32>
    %131 = arith.addf %125, %130 : vector<8x8xf32>
    %c0_129 = arith.constant 0 : index
    %c0_130 = arith.constant 0 : index
    %c3_131 = arith.constant 3 : index
    %c0_132 = arith.constant 0 : index
    %132 = vector.load %arg2[%c0_129, %c0_130, %c3_131, %c0_132] : memref<1x8x6x16xf32, #tpu.memory_space<vmem>>, vector<1x8x1x16xf32>
    %133 = vector.shape_cast %132 : vector<1x8x1x16xf32> to vector<8x16xf32>
    %c32_133 = arith.constant 32 : index
    %c0_134 = arith.constant 0 : index
    %134 = vector.load %arg4[%c32_133, %c0_134] : memref<48x8xbf16, #tpu.memory_space<vmem>>, vector<16x8xbf16>
    %135 = arith.truncf %133 : vector<8x16xf32> to vector<8x16xbf16>
    %cst_135 = arith.constant dense<0.000000e+00> : vector<8x8xf32>
    %136 = tpu.matmul %135, %134, %cst_135 {dimension_numbers = #tpu.dot_dimension_numbers<[1], [0], [0], [1], [0, 0, 1, 1], [], []>} : vector<8x16xbf16>, vector<16x8xbf16>, vector<8x8xf32> -> vector<8x8xf32>
    %137 = arith.addf %131, %136 : vector<8x8xf32>
    %c0_136 = arith.constant 0 : index
    %c0_137 = arith.constant 0 : index
    %138 = vector.load %arg7[%c0_136, %c0_137] : memref<1x8xf32, #tpu.memory_space<vmem>>, vector<1x8xf32>
    %139 = vector.broadcast %138 : vector<1x8xf32> to vector<8x8xf32>
    %140 = arith.addf %137, %139 : vector<8x8xf32>
    %cst_138 = arith.constant 0.000000e+00 : f32
    %141 = vector.broadcast %cst_138 : f32 to vector<8x8xf32>
    %142 = arith.maximumf %140, %141 : vector<8x8xf32>
    %143 = arith.maximumf %120, %142 : vector<8x8xf32>
    %c0_139 = arith.constant 0 : index
    %c0_140 = arith.constant 0 : index
    %c2_141 = arith.constant 2 : index
    %c0_142 = arith.constant 0 : index
    %144 = vector.load %arg2[%c0_139, %c0_140, %c2_141, %c0_142] : memref<1x8x6x16xf32, #tpu.memory_space<vmem>>, vector<1x8x1x16xf32>
    %145 = vector.shape_cast %144 : vector<1x8x1x16xf32> to vector<8x16xf32>
    %c0_143 = arith.constant 0 : index
    %c0_144 = arith.constant 0 : index
    %146 = vector.load %arg4[%c0_143, %c0_144] : memref<48x8xbf16, #tpu.memory_space<vmem>>, vector<16x8xbf16>
    %147 = arith.truncf %145 : vector<8x16xf32> to vector<8x16xbf16>
    %cst_145 = arith.constant dense<0.000000e+00> : vector<8x8xf32>
    %148 = tpu.matmul %147, %146, %cst_145 {dimension_numbers = #tpu.dot_dimension_numbers<[1], [0], [0], [1], [0, 0, 1, 1], [], []>} : vector<8x16xbf16>, vector<16x8xbf16>, vector<8x8xf32> -> vector<8x8xf32>
    %c0_146 = arith.constant 0 : index
    %c0_147 = arith.constant 0 : index
    %c3_148 = arith.constant 3 : index
    %c0_149 = arith.constant 0 : index
    %149 = vector.load %arg2[%c0_146, %c0_147, %c3_148, %c0_149] : memref<1x8x6x16xf32, #tpu.memory_space<vmem>>, vector<1x8x1x16xf32>
    %150 = vector.shape_cast %149 : vector<1x8x1x16xf32> to vector<8x16xf32>
    %c16_150 = arith.constant 16 : index
    %c0_151 = arith.constant 0 : index
    %151 = vector.load %arg4[%c16_150, %c0_151] : memref<48x8xbf16, #tpu.memory_space<vmem>>, vector<16x8xbf16>
    %152 = arith.truncf %150 : vector<8x16xf32> to vector<8x16xbf16>
    %cst_152 = arith.constant dense<0.000000e+00> : vector<8x8xf32>
    %153 = tpu.matmul %152, %151, %cst_152 {dimension_numbers = #tpu.dot_dimension_numbers<[1], [0], [0], [1], [0, 0, 1, 1], [], []>} : vector<8x16xbf16>, vector<16x8xbf16>, vector<8x8xf32> -> vector<8x8xf32>
    %154 = arith.addf %148, %153 : vector<8x8xf32>
    %c0_153 = arith.constant 0 : index
    %c0_154 = arith.constant 0 : index
    %c4_155 = arith.constant 4 : index
    %c0_156 = arith.constant 0 : index
    %155 = vector.load %arg2[%c0_153, %c0_154, %c4_155, %c0_156] : memref<1x8x6x16xf32, #tpu.memory_space<vmem>>, vector<1x8x1x16xf32>
    %156 = vector.shape_cast %155 : vector<1x8x1x16xf32> to vector<8x16xf32>
    %c32_157 = arith.constant 32 : index
    %c0_158 = arith.constant 0 : index
    %157 = vector.load %arg4[%c32_157, %c0_158] : memref<48x8xbf16, #tpu.memory_space<vmem>>, vector<16x8xbf16>
    %158 = arith.truncf %156 : vector<8x16xf32> to vector<8x16xbf16>
    %cst_159 = arith.constant dense<0.000000e+00> : vector<8x8xf32>
    %159 = tpu.matmul %158, %157, %cst_159 {dimension_numbers = #tpu.dot_dimension_numbers<[1], [0], [0], [1], [0, 0, 1, 1], [], []>} : vector<8x16xbf16>, vector<16x8xbf16>, vector<8x8xf32> -> vector<8x8xf32>
    %160 = arith.addf %154, %159 : vector<8x8xf32>
    %c0_160 = arith.constant 0 : index
    %c0_161 = arith.constant 0 : index
    %161 = vector.load %arg7[%c0_160, %c0_161] : memref<1x8xf32, #tpu.memory_space<vmem>>, vector<1x8xf32>
    %162 = vector.broadcast %161 : vector<1x8xf32> to vector<8x8xf32>
    %163 = arith.addf %160, %162 : vector<8x8xf32>
    %cst_162 = arith.constant 0.000000e+00 : f32
    %164 = vector.broadcast %cst_162 : f32 to vector<8x8xf32>
    %165 = arith.maximumf %163, %164 : vector<8x8xf32>
    %166 = arith.maximumf %143, %165 : vector<8x8xf32>
    %c0_163 = arith.constant 0 : index
    %c0_164 = arith.constant 0 : index
    %c3_165 = arith.constant 3 : index
    %c0_166 = arith.constant 0 : index
    %167 = vector.load %arg2[%c0_163, %c0_164, %c3_165, %c0_166] : memref<1x8x6x16xf32, #tpu.memory_space<vmem>>, vector<1x8x1x16xf32>
    %168 = vector.shape_cast %167 : vector<1x8x1x16xf32> to vector<8x16xf32>
    %c0_167 = arith.constant 0 : index
    %c0_168 = arith.constant 0 : index
    %169 = vector.load %arg4[%c0_167, %c0_168] : memref<48x8xbf16, #tpu.memory_space<vmem>>, vector<16x8xbf16>
    %170 = arith.truncf %168 : vector<8x16xf32> to vector<8x16xbf16>
    %cst_169 = arith.constant dense<0.000000e+00> : vector<8x8xf32>
    %171 = tpu.matmul %170, %169, %cst_169 {dimension_numbers = #tpu.dot_dimension_numbers<[1], [0], [0], [1], [0, 0, 1, 1], [], []>} : vector<8x16xbf16>, vector<16x8xbf16>, vector<8x8xf32> -> vector<8x8xf32>
    %c0_170 = arith.constant 0 : index
    %c0_171 = arith.constant 0 : index
    %c4_172 = arith.constant 4 : index
    %c0_173 = arith.constant 0 : index
    %172 = vector.load %arg2[%c0_170, %c0_171, %c4_172, %c0_173] : memref<1x8x6x16xf32, #tpu.memory_space<vmem>>, vector<1x8x1x16xf32>
    %173 = vector.shape_cast %172 : vector<1x8x1x16xf32> to vector<8x16xf32>
    %c16_174 = arith.constant 16 : index
    %c0_175 = arith.constant 0 : index
    %174 = vector.load %arg4[%c16_174, %c0_175] : memref<48x8xbf16, #tpu.memory_space<vmem>>, vector<16x8xbf16>
    %175 = arith.truncf %173 : vector<8x16xf32> to vector<8x16xbf16>
    %cst_176 = arith.constant dense<0.000000e+00> : vector<8x8xf32>
    %176 = tpu.matmul %175, %174, %cst_176 {dimension_numbers = #tpu.dot_dimension_numbers<[1], [0], [0], [1], [0, 0, 1, 1], [], []>} : vector<8x16xbf16>, vector<16x8xbf16>, vector<8x8xf32> -> vector<8x8xf32>
    %177 = arith.addf %171, %176 : vector<8x8xf32>
    %c0_177 = arith.constant 0 : index
    %c0_178 = arith.constant 0 : index
    %c5_179 = arith.constant 5 : index
    %c0_180 = arith.constant 0 : index
    %178 = vector.load %arg2[%c0_177, %c0_178, %c5_179, %c0_180] : memref<1x8x6x16xf32, #tpu.memory_space<vmem>>, vector<1x8x1x16xf32>
    %179 = vector.shape_cast %178 : vector<1x8x1x16xf32> to vector<8x16xf32>
    %c32_181 = arith.constant 32 : index
    %c0_182 = arith.constant 0 : index
    %180 = vector.load %arg4[%c32_181, %c0_182] : memref<48x8xbf16, #tpu.memory_space<vmem>>, vector<16x8xbf16>
    %181 = arith.truncf %179 : vector<8x16xf32> to vector<8x16xbf16>
    %cst_183 = arith.constant dense<0.000000e+00> : vector<8x8xf32>
    %182 = tpu.matmul %181, %180, %cst_183 {dimension_numbers = #tpu.dot_dimension_numbers<[1], [0], [0], [1], [0, 0, 1, 1], [], []>} : vector<8x16xbf16>, vector<16x8xbf16>, vector<8x8xf32> -> vector<8x8xf32>
    %183 = arith.addf %177, %182 : vector<8x8xf32>
    %c0_184 = arith.constant 0 : index
    %c0_185 = arith.constant 0 : index
    %184 = vector.load %arg7[%c0_184, %c0_185] : memref<1x8xf32, #tpu.memory_space<vmem>>, vector<1x8xf32>
    %185 = vector.broadcast %184 : vector<1x8xf32> to vector<8x8xf32>
    %186 = arith.addf %183, %185 : vector<8x8xf32>
    %cst_186 = arith.constant 0.000000e+00 : f32
    %187 = vector.broadcast %cst_186 : f32 to vector<8x8xf32>
    %188 = arith.maximumf %186, %187 : vector<8x8xf32>
    %189 = arith.maximumf %166, %188 : vector<8x8xf32>
    %c0_187 = arith.constant 0 : index
    %c0_188 = arith.constant 0 : index
    %c40 = arith.constant 40 : index
    %190 = vector.load %arg16[%c0_187, %c0_188, %c40] : memref<1x8x56xf32, #tpu.memory_space<vmem>>, vector<1x8x8xf32>
    %191 = vector.shape_cast %190 : vector<1x8x8xf32> to vector<8x8xf32>
    %192 = vector.shape_cast %189 : vector<8x8xf32> to vector<1x8x8xf32>
    tpu.vector_store %arg16[%c0_187, %c0_188, %c40], %192 {strides = array<i32>} : memref<1x8x56xf32, #tpu.memory_space<vmem>>, vector<1x8x8xf32>,
    %193 = arith.truncf %189 : vector<8x8xf32> to vector<8x8xbf16>
    %c0_189 = arith.constant 0 : index
    %c0_190 = arith.constant 0 : index
    %194 = vector.load %arg11[%c0_189, %c0_190] : memref<8x64xbf16, #tpu.memory_space<vmem>>, vector<8x64xbf16>
    %cst_191 = arith.constant dense<0.000000e+00> : vector<8x64xf32>
    %195 = tpu.matmul %193, %194, %cst_191 {dimension_numbers = #tpu.dot_dimension_numbers<[1], [0], [0], [1], [0, 0, 1, 1], [], []>} : vector<8x8xbf16>, vector<8x64xbf16>, vector<8x64xf32> -> vector<8x64xf32>
    %196 = arith.addf %98, %195 : vector<8x64xf32>
    %c0_192 = arith.constant 0 : index
    %c0_193 = arith.constant 0 : index
    %c0_194 = arith.constant 0 : index
    %c0_195 = arith.constant 0 : index
    %197 = vector.load %arg2[%c0_192, %c0_193, %c0_194, %c0_195] : memref<1x8x6x16xf32, #tpu.memory_space<vmem>>, vector<1x8x1x16xf32>
    %198 = vector.shape_cast %197 : vector<1x8x1x16xf32> to vector<8x16xf32>
    %c0_196 = arith.constant 0 : index
    %c0_197 = arith.constant 0 : index
    %199 = vector.load %arg5[%c0_196, %c0_197] : memref<64x8xbf16, #tpu.memory_space<vmem>>, vector<16x8xbf16>
    %200 = arith.truncf %198 : vector<8x16xf32> to vector<8x16xbf16>
    %cst_198 = arith.constant dense<0.000000e+00> : vector<8x8xf32>
    %201 = tpu.matmul %200, %199, %cst_198 {dimension_numbers = #tpu.dot_dimension_numbers<[1], [0], [0], [1], [0, 0, 1, 1], [], []>} : vector<8x16xbf16>, vector<16x8xbf16>, vector<8x8xf32> -> vector<8x8xf32>
    %c0_199 = arith.constant 0 : index
    %c0_200 = arith.constant 0 : index
    %c1_201 = arith.constant 1 : index
    %c0_202 = arith.constant 0 : index
    %202 = vector.load %arg2[%c0_199, %c0_200, %c1_201, %c0_202] : memref<1x8x6x16xf32, #tpu.memory_space<vmem>>, vector<1x8x1x16xf32>
    %203 = vector.shape_cast %202 : vector<1x8x1x16xf32> to vector<8x16xf32>
    %c16_203 = arith.constant 16 : index
    %c0_204 = arith.constant 0 : index
    %204 = vector.load %arg5[%c16_203, %c0_204] : memref<64x8xbf16, #tpu.memory_space<vmem>>, vector<16x8xbf16>
    %205 = arith.truncf %203 : vector<8x16xf32> to vector<8x16xbf16>
    %cst_205 = arith.constant dense<0.000000e+00> : vector<8x8xf32>
    %206 = tpu.matmul %205, %204, %cst_205 {dimension_numbers = #tpu.dot_dimension_numbers<[1], [0], [0], [1], [0, 0, 1, 1], [], []>} : vector<8x16xbf16>, vector<16x8xbf16>, vector<8x8xf32> -> vector<8x8xf32>
    %207 = arith.addf %201, %206 : vector<8x8xf32>
    %c0_206 = arith.constant 0 : index
    %c0_207 = arith.constant 0 : index
    %c2_208 = arith.constant 2 : index
    %c0_209 = arith.constant 0 : index
    %208 = vector.load %arg2[%c0_206, %c0_207, %c2_208, %c0_209] : memref<1x8x6x16xf32, #tpu.memory_space<vmem>>, vector<1x8x1x16xf32>
    %209 = vector.shape_cast %208 : vector<1x8x1x16xf32> to vector<8x16xf32>
    %c32_210 = arith.constant 32 : index
    %c0_211 = arith.constant 0 : index
    %210 = vector.load %arg5[%c32_210, %c0_211] : memref<64x8xbf16, #tpu.memory_space<vmem>>, vector<16x8xbf16>
    %211 = arith.truncf %209 : vector<8x16xf32> to vector<8x16xbf16>
    %cst_212 = arith.constant dense<0.000000e+00> : vector<8x8xf32>
    %212 = tpu.matmul %211, %210, %cst_212 {dimension_numbers = #tpu.dot_dimension_numbers<[1], [0], [0], [1], [0, 0, 1, 1], [], []>} : vector<8x16xbf16>, vector<16x8xbf16>, vector<8x8xf32> -> vector<8x8xf32>
    %213 = arith.addf %207, %212 : vector<8x8xf32>
    %c0_213 = arith.constant 0 : index
    %c0_214 = arith.constant 0 : index
    %c3_215 = arith.constant 3 : index
    %c0_216 = arith.constant 0 : index
    %214 = vector.load %arg2[%c0_213, %c0_214, %c3_215, %c0_216] : memref<1x8x6x16xf32, #tpu.memory_space<vmem>>, vector<1x8x1x16xf32>
    %215 = vector.shape_cast %214 : vector<1x8x1x16xf32> to vector<8x16xf32>
    %c48 = arith.constant 48 : index
    %c0_217 = arith.constant 0 : index
    %216 = vector.load %arg5[%c48, %c0_217] : memref<64x8xbf16, #tpu.memory_space<vmem>>, vector<16x8xbf16>
    %217 = arith.truncf %215 : vector<8x16xf32> to vector<8x16xbf16>
    %cst_218 = arith.constant dense<0.000000e+00> : vector<8x8xf32>
    %218 = tpu.matmul %217, %216, %cst_218 {dimension_numbers = #tpu.dot_dimension_numbers<[1], [0], [0], [1], [0, 0, 1, 1], [], []>} : vector<8x16xbf16>, vector<16x8xbf16>, vector<8x8xf32> -> vector<8x8xf32>
    %219 = arith.addf %213, %218 : vector<8x8xf32>
    %c0_219 = arith.constant 0 : index
    %c0_220 = arith.constant 0 : index
    %220 = vector.load %arg8[%c0_219, %c0_220] : memref<1x8xf32, #tpu.memory_space<vmem>>, vector<1x8xf32>
    %221 = vector.broadcast %220 : vector<1x8xf32> to vector<8x8xf32>
    %222 = arith.addf %219, %221 : vector<8x8xf32>
    %cst_221 = arith.constant 0.000000e+00 : f32
    %223 = vector.broadcast %cst_221 : f32 to vector<8x8xf32>
    %224 = arith.maximumf %222, %223 : vector<8x8xf32>
    %c0_222 = arith.constant 0 : index
    %c0_223 = arith.constant 0 : index
    %c1_224 = arith.constant 1 : index
    %c0_225 = arith.constant 0 : index
    %225 = vector.load %arg2[%c0_222, %c0_223, %c1_224, %c0_225] : memref<1x8x6x16xf32, #tpu.memory_space<vmem>>, vector<1x8x1x16xf32>
    %226 = vector.shape_cast %225 : vector<1x8x1x16xf32> to vector<8x16xf32>
    %c0_226 = arith.constant 0 : index
    %c0_227 = arith.constant 0 : index
    %227 = vector.load %arg5[%c0_226, %c0_227] : memref<64x8xbf16, #tpu.memory_space<vmem>>, vector<16x8xbf16>
    %228 = arith.truncf %226 : vector<8x16xf32> to vector<8x16xbf16>
    %cst_228 = arith.constant dense<0.000000e+00> : vector<8x8xf32>
    %229 = tpu.matmul %228, %227, %cst_228 {dimension_numbers = #tpu.dot_dimension_numbers<[1], [0], [0], [1], [0, 0, 1, 1], [], []>} : vector<8x16xbf16>, vector<16x8xbf16>, vector<8x8xf32> -> vector<8x8xf32>
    %c0_229 = arith.constant 0 : index
    %c0_230 = arith.constant 0 : index
    %c2_231 = arith.constant 2 : index
    %c0_232 = arith.constant 0 : index
    %230 = vector.load %arg2[%c0_229, %c0_230, %c2_231, %c0_232] : memref<1x8x6x16xf32, #tpu.memory_space<vmem>>, vector<1x8x1x16xf32>
    %231 = vector.shape_cast %230 : vector<1x8x1x16xf32> to vector<8x16xf32>
    %c16_233 = arith.constant 16 : index
    %c0_234 = arith.constant 0 : index
    %232 = vector.load %arg5[%c16_233, %c0_234] : memref<64x8xbf16, #tpu.memory_space<vmem>>, vector<16x8xbf16>
    %233 = arith.truncf %231 : vector<8x16xf32> to vector<8x16xbf16>
    %cst_235 = arith.constant dense<0.000000e+00> : vector<8x8xf32>
    %234 = tpu.matmul %233, %232, %cst_235 {dimension_numbers = #tpu.dot_dimension_numbers<[1], [0], [0], [1], [0, 0, 1, 1], [], []>} : vector<8x16xbf16>, vector<16x8xbf16>, vector<8x8xf32> -> vector<8x8xf32>
    %235 = arith.addf %229, %234 : vector<8x8xf32>
    %c0_236 = arith.constant 0 : index
    %c0_237 = arith.constant 0 : index
    %c3_238 = arith.constant 3 : index
    %c0_239 = arith.constant 0 : index
    %236 = vector.load %arg2[%c0_236, %c0_237, %c3_238, %c0_239] : memref<1x8x6x16xf32, #tpu.memory_space<vmem>>, vector<1x8x1x16xf32>
    %237 = vector.shape_cast %236 : vector<1x8x1x16xf32> to vector<8x16xf32>
    %c32_240 = arith.constant 32 : index
    %c0_241 = arith.constant 0 : index
    %238 = vector.load %arg5[%c32_240, %c0_241] : memref<64x8xbf16, #tpu.memory_space<vmem>>, vector<16x8xbf16>
    %239 = arith.truncf %237 : vector<8x16xf32> to vector<8x16xbf16>
    %cst_242 = arith.constant dense<0.000000e+00> : vector<8x8xf32>
    %240 = tpu.matmul %239, %238, %cst_242 {dimension_numbers = #tpu.dot_dimension_numbers<[1], [0], [0], [1], [0, 0, 1, 1], [], []>} : vector<8x16xbf16>, vector<16x8xbf16>, vector<8x8xf32> -> vector<8x8xf32>
    %241 = arith.addf %235, %240 : vector<8x8xf32>
    %c0_243 = arith.constant 0 : index
    %c0_244 = arith.constant 0 : index
    %c4_245 = arith.constant 4 : index
    %c0_246 = arith.constant 0 : index
    %242 = vector.load %arg2[%c0_243, %c0_244, %c4_245, %c0_246] : memref<1x8x6x16xf32, #tpu.memory_space<vmem>>, vector<1x8x1x16xf32>
    %243 = vector.shape_cast %242 : vector<1x8x1x16xf32> to vector<8x16xf32>
    %c48_247 = arith.constant 48 : index
    %c0_248 = arith.constant 0 : index
    %244 = vector.load %arg5[%c48_247, %c0_248] : memref<64x8xbf16, #tpu.memory_space<vmem>>, vector<16x8xbf16>
    %245 = arith.truncf %243 : vector<8x16xf32> to vector<8x16xbf16>
    %cst_249 = arith.constant dense<0.000000e+00> : vector<8x8xf32>
    %246 = tpu.matmul %245, %244, %cst_249 {dimension_numbers = #tpu.dot_dimension_numbers<[1], [0], [0], [1], [0, 0, 1, 1], [], []>} : vector<8x16xbf16>, vector<16x8xbf16>, vector<8x8xf32> -> vector<8x8xf32>
    %247 = arith.addf %241, %246 : vector<8x8xf32>
    %c0_250 = arith.constant 0 : index
    %c0_251 = arith.constant 0 : index
    %248 = vector.load %arg8[%c0_250, %c0_251] : memref<1x8xf32, #tpu.memory_space<vmem>>, vector<1x8xf32>
    %249 = vector.broadcast %248 : vector<1x8xf32> to vector<8x8xf32>
    %250 = arith.addf %247, %249 : vector<8x8xf32>
    %cst_252 = arith.constant 0.000000e+00 : f32
    %251 = vector.broadcast %cst_252 : f32 to vector<8x8xf32>
    %252 = arith.maximumf %250, %251 : vector<8x8xf32>
    %253 = arith.maximumf %224, %252 : vector<8x8xf32>
    %c0_253 = arith.constant 0 : index
    %c0_254 = arith.constant 0 : index
    %c2_255 = arith.constant 2 : index
    %c0_256 = arith.constant 0 : index
    %254 = vector.load %arg2[%c0_253, %c0_254, %c2_255, %c0_256] : memref<1x8x6x16xf32, #tpu.memory_space<vmem>>, vector<1x8x1x16xf32>
    %255 = vector.shape_cast %254 : vector<1x8x1x16xf32> to vector<8x16xf32>
    %c0_257 = arith.constant 0 : index
    %c0_258 = arith.constant 0 : index
    %256 = vector.load %arg5[%c0_257, %c0_258] : memref<64x8xbf16, #tpu.memory_space<vmem>>, vector<16x8xbf16>
    %257 = arith.truncf %255 : vector<8x16xf32> to vector<8x16xbf16>
    %cst_259 = arith.constant dense<0.000000e+00> : vector<8x8xf32>
    %258 = tpu.matmul %257, %256, %cst_259 {dimension_numbers = #tpu.dot_dimension_numbers<[1], [0], [0], [1], [0, 0, 1, 1], [], []>} : vector<8x16xbf16>, vector<16x8xbf16>, vector<8x8xf32> -> vector<8x8xf32>
    %c0_260 = arith.constant 0 : index
    %c0_261 = arith.constant 0 : index
    %c3_262 = arith.constant 3 : index
    %c0_263 = arith.constant 0 : index
    %259 = vector.load %arg2[%c0_260, %c0_261, %c3_262, %c0_263] : memref<1x8x6x16xf32, #tpu.memory_space<vmem>>, vector<1x8x1x16xf32>
    %260 = vector.shape_cast %259 : vector<1x8x1x16xf32> to vector<8x16xf32>
    %c16_264 = arith.constant 16 : index
    %c0_265 = arith.constant 0 : index
    %261 = vector.load %arg5[%c16_264, %c0_265] : memref<64x8xbf16, #tpu.memory_space<vmem>>, vector<16x8xbf16>
    %262 = arith.truncf %260 : vector<8x16xf32> to vector<8x16xbf16>
    %cst_266 = arith.constant dense<0.000000e+00> : vector<8x8xf32>
    %263 = tpu.matmul %262, %261, %cst_266 {dimension_numbers = #tpu.dot_dimension_numbers<[1], [0], [0], [1], [0, 0, 1, 1], [], []>} : vector<8x16xbf16>, vector<16x8xbf16>, vector<8x8xf32> -> vector<8x8xf32>
    %264 = arith.addf %258, %263 : vector<8x8xf32>
    %c0_267 = arith.constant 0 : index
    %c0_268 = arith.constant 0 : index
    %c4_269 = arith.constant 4 : index
    %c0_270 = arith.constant 0 : index
    %265 = vector.load %arg2[%c0_267, %c0_268, %c4_269, %c0_270] : memref<1x8x6x16xf32, #tpu.memory_space<vmem>>, vector<1x8x1x16xf32>
    %266 = vector.shape_cast %265 : vector<1x8x1x16xf32> to vector<8x16xf32>
    %c32_271 = arith.constant 32 : index
    %c0_272 = arith.constant 0 : index
    %267 = vector.load %arg5[%c32_271, %c0_272] : memref<64x8xbf16, #tpu.memory_space<vmem>>, vector<16x8xbf16>
    %268 = arith.truncf %266 : vector<8x16xf32> to vector<8x16xbf16>
    %cst_273 = arith.constant dense<0.000000e+00> : vector<8x8xf32>
    %269 = tpu.matmul %268, %267, %cst_273 {dimension_numbers = #tpu.dot_dimension_numbers<[1], [0], [0], [1], [0, 0, 1, 1], [], []>} : vector<8x16xbf16>, vector<16x8xbf16>, vector<8x8xf32> -> vector<8x8xf32>
    %270 = arith.addf %264, %269 : vector<8x8xf32>
    %c0_274 = arith.constant 0 : index
    %c0_275 = arith.constant 0 : index
    %c5_276 = arith.constant 5 : index
    %c0_277 = arith.constant 0 : index
    %271 = vector.load %arg2[%c0_274, %c0_275, %c5_276, %c0_277] : memref<1x8x6x16xf32, #tpu.memory_space<vmem>>, vector<1x8x1x16xf32>
    %272 = vector.shape_cast %271 : vector<1x8x1x16xf32> to vector<8x16xf32>
    %c48_278 = arith.constant 48 : index
    %c0_279 = arith.constant 0 : index
    %273 = vector.load %arg5[%c48_278, %c0_279] : memref<64x8xbf16, #tpu.memory_space<vmem>>, vector<16x8xbf16>
    %274 = arith.truncf %272 : vector<8x16xf32> to vector<8x16xbf16>
    %cst_280 = arith.constant dense<0.000000e+00> : vector<8x8xf32>
    %275 = tpu.matmul %274, %273, %cst_280 {dimension_numbers = #tpu.dot_dimension_numbers<[1], [0], [0], [1], [0, 0, 1, 1], [], []>} : vector<8x16xbf16>, vector<16x8xbf16>, vector<8x8xf32> -> vector<8x8xf32>
    %276 = arith.addf %270, %275 : vector<8x8xf32>
    %c0_281 = arith.constant 0 : index
    %c0_282 = arith.constant 0 : index
    %277 = vector.load %arg8[%c0_281, %c0_282] : memref<1x8xf32, #tpu.memory_space<vmem>>, vector<1x8xf32>
    %278 = vector.broadcast %277 : vector<1x8xf32> to vector<8x8xf32>
    %279 = arith.addf %276, %278 : vector<8x8xf32>
    %cst_283 = arith.constant 0.000000e+00 : f32
    %280 = vector.broadcast %cst_283 : f32 to vector<8x8xf32>
    %281 = arith.maximumf %279, %280 : vector<8x8xf32>
    %282 = arith.maximumf %253, %281 : vector<8x8xf32>
    %c0_284 = arith.constant 0 : index
    %c0_285 = arith.constant 0 : index
    %c48_286 = arith.constant 48 : index
    %283 = vector.load %arg16[%c0_284, %c0_285, %c48_286] : memref<1x8x56xf32, #tpu.memory_space<vmem>>, vector<1x8x8xf32>
    %284 = vector.shape_cast %283 : vector<1x8x8xf32> to vector<8x8xf32>
    %285 = vector.shape_cast %282 : vector<8x8xf32> to vector<1x8x8xf32>
    tpu.vector_store %arg16[%c0_284, %c0_285, %c48_286], %285 {strides = array<i32>} : memref<1x8x56xf32, #tpu.memory_space<vmem>>, vector<1x8x8xf32>,
    %286 = arith.truncf %282 : vector<8x8xf32> to vector<8x8xbf16>
    %c0_287 = arith.constant 0 : index
    %c0_288 = arith.constant 0 : index
    %287 = vector.load %arg12[%c0_287, %c0_288] : memref<8x64xbf16, #tpu.memory_space<vmem>>, vector<8x64xbf16>
    %cst_289 = arith.constant dense<0.000000e+00> : vector<8x64xf32>
    %288 = tpu.matmul %286, %287, %cst_289 {dimension_numbers = #tpu.dot_dimension_numbers<[1], [0], [0], [1], [0, 0, 1, 1], [], []>} : vector<8x8xbf16>, vector<8x64xbf16>, vector<8x64xf32> -> vector<8x64xf32>
    %289 = arith.addf %196, %288 : vector<8x64xf32>
    %c0_290 = arith.constant 0 : index
    %c0_291 = arith.constant 0 : index
    %290 = vector.load %arg13[%c0_290, %c0_291] : memref<1x64xf32, #tpu.memory_space<vmem>>, vector<1x64xf32>
    %291 = vector.broadcast %290 : vector<1x64xf32> to vector<8x64xf32>
    %292 = arith.addf %289, %291 : vector<8x64xf32>
    %293 = math.tanh %292 : vector<8x64xf32>
    %294 = arith.truncf %293 : vector<8x64xf32> to vector<8x64xbf16>
    %c0_292 = arith.constant 0 : index
    %c0_293 = arith.constant 0 : index
    %295 = vector.load %arg14[%c0_292, %c0_293] : memref<64x32xbf16, #tpu.memory_space<vmem>>, vector<64x32xbf16>
    %cst_294 = arith.constant dense<0.000000e+00> : vector<8x32xf32>
    %296 = tpu.matmul %294, %295, %cst_294 {dimension_numbers = #tpu.dot_dimension_numbers<[1], [0], [0], [1], [0, 0, 1, 1], [], []>} : vector<8x64xbf16>, vector<64x32xbf16>, vector<8x32xf32> -> vector<8x32xf32>
    %c0_295 = arith.constant 0 : index
    %c0_296 = arith.constant 0 : index
    %297 = vector.load %arg15[%c0_295, %c0_296] : memref<1x32xf32, #tpu.memory_space<vmem>>, vector<1x32xf32>
    %298 = vector.broadcast %297 : vector<1x32xf32> to vector<8x32xf32>
    %299 = arith.addf %296, %298 : vector<8x32xf32>
    %300 = math.tanh %299 : vector<8x32xf32>
    %c0_297 = arith.constant 0 : index
    %c0_298 = arith.constant 0 : index
    %c0_299 = arith.constant 0 : index
    %301 = vector.load %arg17[%c0_297, %c0_298, %c0_299] : memref<1x8x64xf32, #tpu.memory_space<vmem>>, vector<1x8x64xf32>
    %302 = vector.shape_cast %301 : vector<1x8x64xf32> to vector<8x64xf32>
    %303 = vector.shape_cast %293 : vector<8x64xf32> to vector<1x8x64xf32>
    tpu.vector_store %arg17[%c0_297, %c0_298, %c0_299], %303 {strides = array<i32>} : memref<1x8x64xf32, #tpu.memory_space<vmem>>, vector<1x8x64xf32>,
    %c0_300 = arith.constant 0 : index
    %c0_301 = arith.constant 0 : index
    %c0_302 = arith.constant 0 : index
    %304 = vector.load %arg18[%c0_300, %c0_301, %c0_302] : memref<1x8x32xf32, #tpu.memory_space<vmem>>, vector<1x8x32xf32>
    %305 = vector.shape_cast %304 : vector<1x8x32xf32> to vector<8x32xf32>
    %306 = vector.shape_cast %300 : vector<8x32xf32> to vector<1x8x32xf32>
    tpu.vector_store %arg18[%c0_300, %c0_301, %c0_302], %306 {strides = array<i32>} : memref<1x8x32xf32, #tpu.memory_space<vmem>>, vector<1x8x32xf32>,
    return
  }
  func.func @transform_0(%arg0: i32) -> (i32, i32, i32) {
    %c0_i32 = arith.constant 0 : i32
    %c0_i32_0 = arith.constant 0 : i32
    %c0_i32_1 = arith.constant 0 : i32
    return %arg0, %c0_i32, %c0_i32_0 : i32, i32, i32
  }
  func.func @transform_1(%arg0: i32) -> (i32, i32, i32, i32) {
    %c0_i32 = arith.constant 0 : i32
    %c0_i32_0 = arith.constant 0 : i32
    %c0_i32_1 = arith.constant 0 : i32
    %c0_i32_2 = arith.constant 0 : i32
    return %arg0, %c0_i32, %c0_i32_0, %c0_i32_1 : i32, i32, i32, i32
  }
  func.func @transform_2(%arg0: i32) -> (i32, i32) {
    %c0_i32 = arith.constant 0 : i32
    %c0_i32_0 = arith.constant 0 : i32
    %c0_i32_1 = arith.constant 0 : i32
    return %c0_i32, %c0_i32_0 : i32, i32
  }
  func.func @transform_3(%arg0: i32) -> (i32, i32) {
    %c0_i32 = arith.constant 0 : i32
    %c0_i32_0 = arith.constant 0 : i32
    %c0_i32_1 = arith.constant 0 : i32
    return %c0_i32, %c0_i32_0 : i32, i32
  }
  func.func @transform_4(%arg0: i32) -> (i32, i32) {
    %c0_i32 = arith.constant 0 : i32
    %c0_i32_0 = arith.constant 0 : i32
    %c0_i32_1 = arith.constant 0 : i32
    return %c0_i32, %c0_i32_0 : i32, i32
  }
  func.func @transform_5(%arg0: i32) -> (i32, i32) {
    %c0_i32 = arith.constant 0 : i32
    %c0_i32_0 = arith.constant 0 : i32
    %c0_i32_1 = arith.constant 0 : i32
    return %c0_i32, %c0_i32_0 : i32, i32
  }
  func.func @transform_6(%arg0: i32) -> (i32, i32) {
    %c0_i32 = arith.constant 0 : i32
    %c0_i32_0 = arith.constant 0 : i32
    %c0_i32_1 = arith.constant 0 : i32
    return %c0_i32, %c0_i32_0 : i32, i32
  }
  func.func @transform_7(%arg0: i32) -> (i32, i32) {
    %c0_i32 = arith.constant 0 : i32
    %c0_i32_0 = arith.constant 0 : i32
    %c0_i32_1 = arith.constant 0 : i32
    return %c0_i32, %c0_i32_0 : i32, i32
  }
  func.func @transform_8(%arg0: i32) -> (i32, i32) {
    %c0_i32 = arith.constant 0 : i32
    %c0_i32_0 = arith.constant 0 : i32
    %c0_i32_1 = arith.constant 0 : i32
    return %c0_i32, %c0_i32_0 : i32, i32
  }
  func.func @transform_9(%arg0: i32) -> (i32, i32) {
    %c0_i32 = arith.constant 0 : i32
    %c0_i32_0 = arith.constant 0 : i32
    %c0_i32_1 = arith.constant 0 : i32
    return %c0_i32, %c0_i32_0 : i32, i32
  }
  func.func @transform_10(%arg0: i32) -> (i32, i32) {
    %c0_i32 = arith.constant 0 : i32
    %c0_i32_0 = arith.constant 0 : i32
    %c0_i32_1 = arith.constant 0 : i32
    return %c0_i32, %c0_i32_0 : i32, i32
  }
  func.func @transform_11(%arg0: i32) -> (i32, i32) {
    %c0_i32 = arith.constant 0 : i32
    %c0_i32_0 = arith.constant 0 : i32
    %c0_i32_1 = arith.constant 0 : i32
    return %c0_i32, %c0_i32_0 : i32, i32
  }
  func.func @transform_12(%arg0: i32) -> (i32, i32) {
    %c0_i32 = arith.constant 0 : i32
    %c0_i32_0 = arith.constant 0 : i32
    %c0_i32_1 = arith.constant 0 : i32
    return %c0_i32, %c0_i32_0 : i32, i32
  }
  func.func @transform_13(%arg0: i32) -> (i32, i32) {
    %c0_i32 = arith.constant 0 : i32
    %c0_i32_0 = arith.constant 0 : i32
    %c0_i32_1 = arith.constant 0 : i32
    return %c0_i32, %c0_i32_0 : i32, i32
  }
  func.func @transform_14(%arg0: i32) -> (i32, i32) {
    %c0_i32 = arith.constant 0 : i32
    %c0_i32_0 = arith.constant 0 : i32
    %c0_i32_1 = arith.constant 0 : i32
    return %c0_i32, %c0_i32_0 : i32, i32
  }
  func.func @transform_15(%arg0: i32) -> (i32, i32, i32) {
    %c0_i32 = arith.constant 0 : i32
    %c0_i32_0 = arith.constant 0 : i32
    %c0_i32_1 = arith.constant 0 : i32
    return %arg0, %c0_i32, %c0_i32_0 : i32, i32, i32
  }
  func.func @transform_16(%arg0: i32) -> (i32, i32, i32) {
    %c0_i32 = arith.constant 0 : i32
    %c0_i32_0 = arith.constant 0 : i32
    %c0_i32_1 = arith.constant 0 : i32
    return %arg0, %c0_i32, %c0_i32_0 : i32, i32, i32
  }
  func.func @transform_17(%arg0: i32) -> (i32, i32, i32) {
    %c0_i32 = arith.constant 0 : i32
    %c0_i32_0 = arith.constant 0 : i32
    %c0_i32_1 = arith.constant 0 : i32
    return %arg0, %c0_i32, %c0_i32_0 : i32, i32, i32
  }
}

</mosaic_0001>

<bundles_post_ra>
// kernel: tpu_custom_call.1
= control target key start
LH: loop header
LB: loop body
LE: loop exit
PB: predicated region body
PF: predicated region fallthrough
CT: control target
= control target key end

     0   :  { %s4970_s0 = inlined_call_operand.vmem [shape: f32[2,8,32], index: 0, kind: input, shape index: {}]   ;;  %s4971_s1 = inlined_call_operand.vmem [shape: f32[2,8,6,16], index: 1, kind: input, shape index: {}]   ;;  %s4972_s2 = inlined_call_operand.vmem [shape: bf16[32,8], index: 2, kind: input, shape index: {}]   ;;  %s4973_s3 = inlined_call_operand.vmem [shape: bf16[48,8], index: 3, kind: input, shape index: {}]   ;;  %s4974_s4 = inlined_call_operand.vmem [shape: bf16[64,8], index: 4, kind: input, shape index: {}]   ;;  %s4975_s5 = inlined_call_operand.vmem [shape: f32[1,8], index: 5, kind: input, shape index: {}]   ;;  %s4976_s6 = inlined_call_operand.vmem [shape: f32[1,8], index: 6, kind: input, shape index: {}]   ;;  %s4977_s7 = inlined_call_operand.vmem [shape: f32[1,8], index: 7, kind: input, shape index: {}]   ;;  %s4978_s8 = inlined_call_operand.vmem [shape: bf16[32,64], index: 8, kind: input, shape index: {}]   ;;  %s4979_s9 = inlined_call_operand.vmem [shape: bf16[8,64], index: 9, kind: input, shape index: {}]   ;;  %s4980_s10 = inlined_call_operand.vmem [shape: bf16[8,64], index: 10, kind: input, shape index: {}]   ;;  %s4981_s11 = inlined_call_operand.vmem [shape: bf16[8,64], index: 11, kind: input, shape index: {}]   ;;  %s4982_s12 = inlined_call_operand.vmem [shape: f32[1,64], index: 12, kind: input, shape index: {}]   ;;  %s4983_s13 = inlined_call_operand.vmem [shape: bf16[64,32], index: 13, kind: input, shape index: {}]   ;;  %s4984_s14 = inlined_call_operand.vmem [shape: f32[1,32], index: 14, kind: input, shape index: {}]   ;;  %s4985_s15 = inlined_call_operand.hbm [shape: f32[2,8,56], index: 15, kind: output, shape index: {0}]   ;;  %s4986_s16 = inlined_call_operand.hbm [shape: f32[2,8,64], index: 16, kind: output, shape index: {1}]   ;;  %s4987_s17 = inlined_call_operand.hbm [shape: f32[2,8,32], index: 17, kind: output, shape index: {2}]  }
   0x1   :  { %4990 = sst [smem:[#allocation10_spill]] %s4970_s0 }
   0x2   :  { %4991 = sst [smem:[#allocation11_spill]] %s4971_s1 }
   0x3   :  { %4992 = sst [smem:[#allocation12_spill]] %s4972_s2 }
   0x4   :  { %4993 = sst [smem:[#allocation13_spill]] %s4973_s3 }
   0x5   :  { %4994 = sst [smem:[#allocation14_spill]] %s4974_s4 }
   0x6   :  { %4995 = sst [smem:[#allocation15_spill]] %s4975_s5 }
   0x7   :  { %4996 = sst [smem:[#allocation16_spill]] %s4976_s6 }
   0x8   :  { %4997 = sst [smem:[#allocation17_spill]] %s4977_s7 }
   0x9   :  { %4998 = sst [smem:[#allocation18_spill]] %s4978_s8 }
   0xa   :  { %4999 = sst [smem:[#allocation19_spill]] %s4979_s9 }
   0xb   :  { %23 = vsyncpa [#allocation3], 0 }
   0xc   :  { %25 = vsyncpa [#allocation3 + $0x1], 0 }
   0xd   :  { %26 = vsyncpa [#allocation5], 0 }
   0xe   :  { %28 = vsyncpa [#allocation5 + $0x1], 0  ;;  %s4185_s24 = smov 0   ;;  %s4187_s25 = smov 0  }
   0xf   :  { %s4189_s26 = smov 0   ;;  %s4191_s27 = smov 0  }
  0x10 LB: > { %s4206_s28 = sadd.s32 4294967295, %s4085_s27   ;;  %s4988_s29 = sadd.s32 4294967294, %s4085_s27   ;;  %s4085_s27 = sphi %s4191_s27, %s5019_s27   ;;  %s4081_s26 = sphi %s4189_s26, %s5018_s26   ;;  %s4077_s25 = sphi %s4187_s25, %s5017_s25   ;;  %s4073_s24 = sphi %s4185_s24, %s5016_s24  }
  0x11   : > { %s4210_s0 = sadd.s32 1, %s4085_s27   ;;  %s366_s30 = sadd.s32 1, %s4081_s26 }
  0x12   : > { %s363_s18 = ssub.s32 %s4085_s27, %s4210_s0  ;;  %p376_p0 = scmp.ne.s32.totalorder %s4081_s26, %s4077_s25 }
  0x13   : > { %p364_p1 = scmp.eq.s32.totalorder %s363_s18, 0  ;;  %p377_p2 = scmp.eq.s32.totalorder %s4206_s28, 1 }
  0x14   : > { %p382_p3 = scmp.ne.s32.totalorder %s4077_s25, %s4073_s24  ;;  %p383_p4 = scmp.eq.s32.totalorder %s4988_s29, 1 }
  0x15   : > { %s4223_s19 = scalar_select %p364_p1, %s4081_s26, %s366_s30  }
  0x16   : > { %p4225_p5 = por %p377_p2, %p376_p0  ;;  %p4229_p6 = por %p383_p4, %p382_p3 }
  0x17   : > { %5000 = sst [smem:[#allocation9_spill]] %s4223_s19  ;;  %p3497_p7 = scmp.ge.s32.totalorder %s4085_s27, 1 }
  0x18   : > { %p507_p8 = scmp.lt.s32.totalorder %s4085_s27, 3 }
  0x1a   : > { %p508_p9 = pnand %p3497_p7, %p507_p8 }
  0x1b   : > { %s5003_s2 = sld [smem:[#allocation12_spill]] (!%p508_p9)  ;;  %p573_p10 = scmp.lt.s32.totalorder (!%p508_p9), %s4206_s28, 1 }
  0x1c   : > { %511 = sbr.rel (%p508_p9) target bundleno = 1235 (0x4d3), region = 80  ;;  %s5004_s22 = sld [smem:[#allocation11_spill]] (!%p508_p9) }
  0x1d   : > { %s5005_s8 = sld [smem:[#allocation18_spill]] (!%p508_p9) }
  0x1e   : > { %s5006_s9 = sld [smem:[#allocation19_spill]] (!%p508_p9) }
  0x1f   : > { %s5007_s18 = sld [smem:[#allocation10_spill]] (!%p508_p9) }
  0x20   : > { %s5008_s3 = sld [smem:[#allocation13_spill]] (!%p508_p9) }
  0x21   : > { %v4238_v0 = vld [vmem:[%s5003_s2 + $0x8] sm:$0xff]   ;;  %v4087_v1 = vmov 0.0   ;;  %vm4088_vm0 = vmmov 0   ;;  %s4248_s23 = scalar_select %p573_p10, %s4206_s28, 1  ;;  %vm644_vm1 = vcmask 1041409   ;;  %vm647_vm2 = vcmask 1042434  }
  0x22   : > { %3654 = vmatprep.subr.bf16.mxu1 %v4087_v1  ;;  %3666 = vmatprep.subr.bf16.mxu0 %v4087_v1  ;;  %vm650_vm3 = vcmask 1043459   ;;  %vm653_vm4 = vcmask 1044484   ;;  %vm656_vm5 = vcmask 1045509   ;;  %vm659_vm6 = vcmask 1046534   ;;  %s5009_s5 = sld [smem:[#allocation15_spill]] }
  0x23   : > { %3655 = vmatpush3.bf16.msra.mxu1 %v4238_v0  ;;  %3656 = vmatprep.mubr.msk.bf16.mxu1 %vm4088_vm0, %v4087_v1  ;;  %s3571_s30 = sshll.u32 %s4248_s23, 6  ;;  %vm662_vm7 = vcmask 1047559   ;;  %vm671_vm8 = vcmask 130048   ;;  %vm1348_vm9 = vcmask 1043456   ;;  %s3501_s21 = sshll.u32 %s4248_s23, 3  ;;  %vm584_vm10 = vcmask 261120  }
  0x24   : > { %3660 = vmatprep.subr.bf16.mxu1 %v4087_v1  ;;  %3667 = vmatpush3.bf16.msra.mxu0 %v4238_v0  ;;  %s4258_s29 = scalar_lea.vmem %s5004_s22, %s3571_s30  ;;  %vm1344_vm11 = vcmask 64512   ;;  %s4089_s23 = smov 32   ;;  %vm1340_vm12 = vcmask 326912   ;;  %vm2277_vm13 = vcmask 392512   ;;  %vm3165_vm14 = vcmask 458112  }
  0x25   : > { %3668 = vmatprep.mubr.msk.bf16.mxu0 %vm4088_vm0, %v4087_v1  ;;  %3678 = vmatprep.subr.bf16.mxu0 %v4087_v1  ;;  %v609_v2 = vld [vmem:[%s4258_s29 + $0x1] sm:$0x1]  ;;  %v610_v3 = vld [vmem:[%s4258_s29 + $0x9] sm:$0x1]  ;;  %v611_v4 = vld [vmem:[%s4258_s29 + $0x11] sm:$0x1] }
  0x26   : > { %v612_v5 = vld [vmem:[%s4258_s29 + $0x19] sm:$0x1]  ;;  %v613_v6 = vld [vmem:[%s4258_s29 + $0x21] sm:$0x1]  ;;  %v614_v7 = vld [vmem:[%s4258_s29 + $0x29] sm:$0x1]  ;;  %v619_v8 = vpack.c.bf16 %v609_v2, %v609_v2  ;;  %v620_v9 = vpack.c.bf16 %v610_v3, %v610_v3  ;;  %v621_v10 = vpack.c.bf16 %v611_v4, %v611_v4 }
  0x27   : > { %v615_v11 = vld [vmem:[%s4258_s29 + $0x31] sm:$0x1]  ;;  %v616_v12 = vld [vmem:[%s4258_s29 + $0x39] sm:$0x1]  ;;  %v622_v13 = vpack.c.bf16 %v612_v5, %v612_v5  ;;  %v623_v14 = vpack.c.bf16 %v613_v6, %v613_v6  ;;  %v624_v15 = vpack.c.bf16 %v614_v7, %v614_v7  ;;  %v591_v16 = vld [vmem:[%s4258_s29] sm:$0x1] }
  0x28   : > { %v625_v17 = vpack.c.bf16 %v615_v11, %v615_v11  ;;  %v626_v18 = vpack.c.bf16 %v616_v12, %v616_v12  ;;  %v635_v19 = vunpack.c.l.b16 %v619_v8  ;;  %v636_v20 = vunpack.c.l.b16 %v620_v9  ;;  %v592_v21 = vld [vmem:[%s4258_s29 + $0x8] sm:$0x1]  ;;  %v593_v26 = vld [vmem:[%s4258_s29 + $0x10] sm:$0x1]  ;;  %v594_v27 = vld [vmem:[%s4258_s29 + $0x18] sm:$0x1] }
  0x29   : > { %v637_v22 = vunpack.c.l.b16 %v621_v10  ;;  %v638_v23 = vunpack.c.l.b16 %v622_v13  ;;  %v639_v24 = vunpack.c.l.b16 %v623_v14  ;;  %v640_v25 = vunpack.c.l.b16 %v624_v15  ;;  %v595_v28 = vld [vmem:[%s4258_s29 + $0x20] sm:$0x1]  ;;  %v596_v32 = vld [vmem:[%s4258_s29 + $0x28] sm:$0x1]  ;;  %v597_v33 = vld [vmem:[%s4258_s29 + $0x30] sm:$0x1] }
  0x2a   : > { %v641_v29 = vunpack.c.l.b16 %v625_v17  ;;  %v642_v30 = vunpack.c.l.b16 %v626_v18  ;;  %v643_v31 = vrot.slane %v636_v20, 7  ;;  %v601_v34 = vpack.c.bf16 %v591_v16, %v591_v16  ;;  %v598_v39 = vld [vmem:[%s4258_s29 + $0x38] sm:$0x1]  ;;  %v804_v60 = vld [vmem:[%s4258_s29 + $0x2] sm:$0x1]  ;;  %s5010_s4 = sld [smem:[#allocation14_spill]] }
  0x2b   : > { %v646_v35 = vrot.slane %v637_v22, 6  ;;  %v649_v36 = vrot.slane %v638_v23, 5  ;;  %v652_v37 = vrot.slane %v639_v24, 4  ;;  %v655_v38 = vrot.slane %v640_v25, 3  ;;  %v805_v61 = vld [vmem:[%s4258_s29 + $0xa] sm:$0x1] }
  0x2c   : > { %v645_v40 = vsel %vm644_vm1, %v643_v31, %v635_v19  ;;  %v658_v41 = vrot.slane %v641_v29, 2  ;;  %v661_v42 = vrot.slane %v642_v30, 1  ;;  %v602_v43 = vpack.c.bf16 %v592_v21, %v592_v21  ;;  %v806_v4 = vld [vmem:[%s4258_s29 + $0x12] sm:$0x1]  ;;  %v807_v5 = vld [vmem:[%s4258_s29 + $0x1a] sm:$0x1] }
  0x2d   : > { %v648_v44 = vsel %vm647_vm2, %v646_v35, %v645_v40  ;;  %v603_v45 = vpack.c.bf16 %v593_v26, %v593_v26  ;;  %v604_v46 = vpack.c.bf16 %v594_v27, %v594_v27  ;;  %v605_v47 = vpack.c.bf16 %v595_v28, %v595_v28  ;;  %v4290_v7 = vld [vmem:[%s5003_s2] sm:$0xff]   ;;  %v809_v16 = vld [vmem:[%s4258_s29 + $0x2a] sm:$0x1]  ;;  %v810_v17 = vld [vmem:[%s4258_s29 + $0x32] sm:$0x1]  ;;  %s4989_s2 = sand.u32 1, %s4077_s25  }
  0x2e   : > { %v651_v48 = vsel %vm650_vm3, %v649_v36, %v648_v44  ;;  %v606_v49 = vpack.c.bf16 %v596_v32, %v596_v32  ;;  %v607_v50 = vpack.c.bf16 %v597_v33, %v597_v33  ;;  %v608_v51 = vpack.c.bf16 %v598_v39, %v598_v39  ;;  %v808_v11 = vld [vmem:[%s4258_s29 + $0x22] sm:$0x1]  ;;  %v811_v20 = vld [vmem:[%s4258_s29 + $0x3a] sm:$0x1]  ;;  %v937_v35 = vld [vmem:[%s4258_s29 + $0x3] sm:$0x1] }
  0x2f   : > { %v654_v52 = vsel %vm653_vm4, %v652_v37, %v651_v48  ;;  %v723_v53 = vunpack.c.l.b16 %v601_v34  ;;  %v724_v54 = vunpack.c.l.b16 %v602_v43  ;;  %v725_v55 = vunpack.c.l.b16 %v603_v45  ;;  %v938_v36 = vld [vmem:[%s4258_s29 + $0xb] sm:$0x1]  ;;  %v939_v37 = vld [vmem:[%s4258_s29 + $0x13] sm:$0x1]  ;;  %v941_v43 = vld [vmem:[%s4258_s29 + $0x23] sm:$0x1] }
  0x30   : > { %v657_v56 = vsel %vm656_vm5, %v655_v38, %v654_v52  ;;  %v726_v57 = vunpack.c.l.b16 %v604_v46  ;;  %v727_v58 = vunpack.c.l.b16 %v605_v47  ;;  %v728_v59 = vunpack.c.l.b16 %v606_v49  ;;  %v942_v44 = vld [vmem:[%s4258_s29 + $0x2b] sm:$0x1]  ;;  %v943_v49 = vld [vmem:[%s4258_s29 + $0x33] sm:$0x1]  ;;  %s5011_s6 = sld [smem:[#allocation16_spill]]  ;;  %s4091_s22 = smov 48  }
  0x31   : > { %v660_v62 = vsel %vm659_vm6, %v658_v41, %v657_v56  ;;  %v729_v63 = vunpack.c.l.b16 %v607_v50  ;;  %v730_v2 = vunpack.c.l.b16 %v608_v51  ;;  %v731_v3 = vrot.slane %v724_v54, 7  ;;  %v944_v50 = vld [vmem:[%s4258_s29 + $0x3b] sm:$0x1]  ;;  %s5012_s7 = sld [smem:[#allocation17_spill]] }
  0x32   : > { %v663_v6 = vsel %vm662_vm7, %v661_v42, %v660_v62  ;;  %v733_v8 = vrot.slane %v725_v55, 6  ;;  %v735_v9 = vrot.slane %v726_v57, 5  ;;  %v737_v10 = vrot.slane %v727_v58, 4  ;;  %v940_v42 = vld [vmem:[%s4258_s29 + $0x1b] sm:$0x1] }
  0x33   : > { %v4293_v12 = vpack.c.b16 %v663_v6, %v663_v6  ;;  %v732_v13 = vsel %vm644_vm1, %v731_v3, %v723_v53  ;;  %v739_v14 = vrot.slane %v728_v59, 3  ;;  %v741_v15 = vrot.slane %v729_v63, 2 }
  0x34   : > { %v734_v18 = vsel %vm647_vm2, %v733_v8, %v732_v13  ;;  %v743_v19 = vrot.slane %v730_v2, 1  ;;  %v812_v21 = vpack.c.bf16 %v804_v60, %v804_v60  ;;  %v813_v22 = vpack.c.bf16 %v805_v61, %v805_v61 }
  0x35   : > { %3657 = vmatmul.mubr.msk.bf16.vlgmr.msra.gmra.mxu1 %vm671_vm8, %v4293_v12  ;;  %v736_v23 = vsel %vm650_vm3, %v735_v9, %v734_v18  ;;  %v814_v24 = vpack.c.bf16 %v806_v4, %v806_v4  ;;  %v815_v25 = vpack.c.bf16 %v807_v5, %v807_v5  ;;  %v816_v26 = vpack.c.bf16 %v808_v11, %v808_v11 }
  0x36   : > { %3661 = vmatpush3.bf16.msra.mxu1 %v4290_v7  ;;  %3662 = vmatprep.mubr.msk.bf16.mxu1 %vm4088_vm0, %v4087_v1  ;;  %v738_v27 = vsel %vm653_vm4, %v737_v10, %v736_v23  ;;  %v817_v28 = vpack.c.bf16 %v809_v16, %v809_v16  ;;  %v818_v29 = vpack.c.bf16 %v810_v17, %v810_v17  ;;  %v828_v30 = vunpack.c.l.b16 %v812_v21  ;;  %v1072_v21 = vld [vmem:[%s4258_s29 + $0x14] sm:$0x1] }
  0x37   : > { %3672 = vmatprep.subr.bf16.mxu1 %v4087_v1  ;;  %v740_v31 = vsel %vm656_vm5, %v739_v14, %v738_v27  ;;  %v819_v32 = vpack.c.bf16 %v811_v20, %v811_v20  ;;  %v829_v33 = vunpack.c.l.b16 %v813_v22  ;;  %v830_v34 = vunpack.c.l.b16 %v814_v24  ;;  %v1071_v20 = vld [vmem:[%s4258_s29 + $0xc] sm:$0x1]  ;;  %v1074_v27 = vld [vmem:[%s4258_s29 + $0x24] sm:$0x1] }
  0x38   : > { %v742_v38 = vsel %vm659_vm6, %v741_v15, %v740_v31  ;;  %v831_v39 = vunpack.c.l.b16 %v815_v25  ;;  %v832_v40 = vunpack.c.l.b16 %v816_v26  ;;  %v833_v41 = vunpack.c.l.b16 %v817_v28  ;;  %v1073_v26 = vld [vmem:[%s4258_s29 + $0x1c] sm:$0x1] }
  0x39   : > { %v744_v45 = vsel %vm662_vm7, %v743_v19, %v742_v38  ;;  %v834_v46 = vunpack.c.l.b16 %v818_v29  ;;  %v835_v47 = vunpack.c.l.b16 %v819_v32  ;;  %v836_v48 = vrot.slane %v829_v33, 7  ;;  %v1070_v19 = vld [vmem:[%s4258_s29 + $0x4] sm:$0x1]  ;;  %v1075_v32 = vld [vmem:[%s4258_s29 + $0x2c] sm:$0x1] }
  0x3a   : > { %v745_v51 = vpack.c.b16 %v744_v45, %v744_v45  ;;  %v838_v52 = vrot.slane %v830_v34, 6  ;;  %v840_v53 = vrot.slane %v831_v39, 5  ;;  %v842_v54 = vrot.slane %v832_v40, 4 }
  0x3b   : > { %v837_v55 = vsel %vm644_vm1, %v836_v48, %v828_v30  ;;  %v844_v56 = vrot.slane %v833_v41, 3  ;;  %v846_v57 = vrot.slane %v834_v46, 2  ;;  %v848_v58 = vrot.slane %v835_v47, 1 }
  0x3c   : > { %v839_v59 = vsel %vm647_vm2, %v838_v52, %v837_v55  ;;  %v945_v60 = vpack.c.bf16 %v937_v35, %v937_v35  ;;  %v946_v61 = vpack.c.bf16 %v938_v36, %v938_v36  ;;  %v947_v62 = vpack.c.bf16 %v939_v37, %v939_v37  ;;  %v1076_v36 = vld [vmem:[%s4258_s29 + $0x34] sm:$0x1]  ;;  %v1077_v37 = vld [vmem:[%s4258_s29 + $0x3c] sm:$0x1]  ;;  %v1204_v55 = vld [vmem:[%s4258_s29 + $0xd] sm:$0x1] }
  0x3d   : > { %3663 = vmatmul.mubr.msk.bf16.vlgmr.msra.gmra.mxu1 %vm671_vm8, %v745_v51  ;;  %v841_v63 = vsel %vm650_vm3, %v840_v53, %v839_v59  ;;  %v948_v2 = vpack.c.bf16 %v940_v42, %v940_v42  ;;  %v949_v3 = vpack.c.bf16 %v941_v43, %v941_v43  ;;  %v950_v4 = vpack.c.bf16 %v942_v44, %v942_v44 }
  0x3e   : > { %3673 = vmatpush3.bf16.msra.mxu1 %v4290_v7  ;;  %v843_v5 = vsel %vm653_vm4, %v842_v54, %v841_v63  ;;  %3674 = vmatprep.mubr.msk.bf16.mxu1 %vm4088_vm0, %v4087_v1  ;;  %v951_v6 = vpack.c.bf16 %v943_v49, %v943_v49  ;;  %v952_v8 = vpack.c.bf16 %v944_v50, %v944_v50  ;;  %v961_v9 = vunpack.c.l.b16 %v945_v60  ;;  %v1203_v54 = vld [vmem:[%s4258_s29 + $0x5] sm:$0x1]  ;;  %v1205_v60 = vld [vmem:[%s4258_s29 + $0x15] sm:$0x1] }
  0x3f   : > { %v845_v10 = vsel %vm656_vm5, %v844_v56, %v843_v5  ;;  %3684 = vmatprep.subr.bf16.mxu1 %v4087_v1  ;;  %v962_v11 = vunpack.c.l.b16 %v946_v61  ;;  %v963_v13 = vunpack.c.l.b16 %v947_v62  ;;  %v964_v14 = vunpack.c.l.b16 %v948_v2  ;;  %v1206_v61 = vld [vmem:[%s4258_s29 + $0x1d] sm:$0x1]  ;;  %v1207_v62 = vld [vmem:[%s4258_s29 + $0x25] sm:$0x1]  ;;  %v1208_v5 = vld [vmem:[%s4258_s29 + $0x2d] sm:$0x1] }
  0x40   : > { %v847_v15 = vsel %vm659_vm6, %v846_v57, %v845_v10  ;;  %v965_v16 = vunpack.c.l.b16 %v949_v3  ;;  %v966_v17 = vunpack.c.l.b16 %v950_v4  ;;  %v967_v18 = vunpack.c.l.b16 %v951_v6 }
  0x41   : > { %v849_v22 = vsel %vm662_vm7, %v848_v58, %v847_v15  ;;  %v968_v23 = vunpack.c.l.b16 %v952_v8  ;;  %v969_v24 = vrot.slane %v962_v11, 7  ;;  %v971_v25 = vrot.slane %v963_v13, 6  ;;  %v1209_v11 = vld [vmem:[%s4258_s29 + $0x35] sm:$0x1]  ;;  %v1210_v15 = vld [vmem:[%s4258_s29 + $0x3d] sm:$0x1] }
  0x42   : > { %v4336_v28 = vpack.c.b16 %v849_v22, %v849_v22  ;;  %v973_v29 = vrot.slane %v964_v14, 5  ;;  %v975_v30 = vrot.slane %v965_v16, 4  ;;  %v977_v31 = vrot.slane %v966_v17, 3 }
  0x43   : > { %v970_v33 = vsel %vm644_vm1, %v969_v24, %v961_v9  ;;  %v979_v34 = vrot.slane %v967_v18, 2  ;;  %v981_v35 = vrot.slane %v968_v23, 1  ;;  %v1078_v38 = vpack.c.bf16 %v1070_v19, %v1070_v19 }
  0x44   : > { %3669 = vmatmul.mubr.msk.bf16.vlgmr.msra.gmra.mxu0 %vm671_vm8, %v4336_v28  ;;  %v972_v39 = vsel %vm647_vm2, %v971_v25, %v970_v33  ;;  %v1079_v40 = vpack.c.bf16 %v1071_v20, %v1071_v20  ;;  %v1080_v41 = vpack.c.bf16 %v1072_v21, %v1072_v21  ;;  %v1081_v42 = vpack.c.bf16 %v1073_v26, %v1073_v26 }
  0x45   : > { %3679 = vmatpush3.bf16.msra.mxu0 %v4238_v0  ;;  %3675 = vmatmul.mubr.msk.bf16.vlgmr.msra.gmra.mxu1 %vm671_vm8, %v4293_v12  ;;  %v974_v43 = vsel %vm650_vm3, %v973_v29, %v972_v39  ;;  %v1082_v44 = vpack.c.bf16 %v1074_v27, %v1074_v27  ;;  %v1083_v45 = vpack.c.bf16 %v1075_v32, %v1075_v32  ;;  %v1094_v46 = vunpack.c.l.b16 %v1078_v38 }
  0x46   : > { %3685 = vmatpush3.bf16.msra.mxu1 %v4290_v7  ;;  %3680 = vmatprep.mubr.msk.bf16.mxu0 %vm4088_vm0, %v4087_v1  ;;  %v976_v47 = vsel %vm653_vm4, %v975_v30, %v974_v43  ;;  %v1084_v48 = vpack.c.bf16 %v1076_v36, %v1076_v36  ;;  %v1085_v49 = vpack.c.bf16 %v1077_v37, %v1077_v37  ;;  %v1095_v50 = vunpack.c.l.b16 %v1079_v40 }
  0x47   : > { %v978_v12 = vsel %vm656_vm5, %v977_v31, %v976_v47  ;;  %3690 = vmatprep.subr.bf16.mxu0 %v4087_v1  ;;  %3686 = vmatprep.mubr.msk.bf16.mxu1 %vm4088_vm0, %v4087_v1  ;;  %v1096_v51 = vunpack.c.l.b16 %v1080_v41  ;;  %v1097_v52 = vunpack.c.l.b16 %v1081_v42  ;;  %v1098_v53 = vunpack.c.l.b16 %v1082_v44 }
  0x48   : > { %v980_v56 = vsel %vm659_vm6, %v979_v34, %v978_v12  ;;  %3696 = vmatprep.subr.bf16.mxu1 %v4087_v1  ;;  %v1099_v57 = vunpack.c.l.b16 %v1083_v45  ;;  %v1100_v58 = vunpack.c.l.b16 %v1084_v48  ;;  %v1101_v59 = vunpack.c.l.b16 %v1085_v49 }
  0x49   : > { %v982_v63 = vsel %vm662_vm7, %v981_v35, %v980_v56  ;;  %v1102_v2 = vrot.slane %v1095_v50, 7  ;;  %v1104_v3 = vrot.slane %v1096_v51, 6  ;;  %v1106_v4 = vrot.slane %v1097_v52, 5  ;;  %v1448_v52 = vld [vmem:[%s4258_s29 + $0x8] sm:$0x1] }
  0x4a   : > { %v983_v6 = vpack.c.b16 %v982_v63, %v982_v63  ;;  %v1108_v8 = vrot.slane %v1098_v53, 4  ;;  %v1110_v9 = vrot.slane %v1099_v57, 3  ;;  %v1112_v10 = vrot.slane %v1100_v58, 2  ;;  %v1343_v53 = vld [vmem:[%s5006_s9] sm:$0xf]  ;;  %s576_s9 = scalar_lea.vmem %s5007_s18, %s3501_s21  ;;  %s4090_s21 = smov 40  }
  0x4b   : > { %v1103_v13 = vsel %vm644_vm1, %v1102_v2, %v1094_v46  ;;  %v1114_v14 = vrot.slane %v1101_v59, 1  ;;  %v1211_v16 = vpack.c.bf16 %v1203_v54, %v1203_v54  ;;  %v1212_v17 = vpack.c.bf16 %v1204_v55, %v1204_v55  ;;  %v3953_v54 = vld [vmem:[%s5005_s8] sm:$0xff]   ;;  %v1449_v55 = vld [vmem:[%s4258_s29 + $0x10] sm:$0x1]  ;;  %s4877_s18 = sshll.u32 %s4206_s28, 7 }
  0x4c   : > { %3681 = vmatmul.mubr.msk.bf16.vlgmr.msra.gmra.mxu0 %vm671_vm8, %v983_v6  ;;  %v1105_v18 = vsel %vm647_vm2, %v1104_v3, %v1103_v13  ;;  %v1213_v19 = vpack.c.bf16 %v1205_v60, %v1205_v60  ;;  %v1214_v20 = vpack.c.bf16 %v1206_v61, %v1206_v61  ;;  %v1215_v21 = vpack.c.bf16 %v1207_v62, %v1207_v62  ;;  %v1447_v58 = vld [vmem:[%s4258_s29] sm:$0x1]  ;;  %v1450_v60 = vld [vmem:[%s4258_s29 + $0x18] sm:$0x1]  ;;  %v1452_v3 = vld [vmem:[%s4258_s29 + $0x28] sm:$0x1] }
  0x4d   : > { %3691 = vmatpush3.bf16.msra.mxu0 %v4238_v0  ;;  %3687 = vmatmul.mubr.msk.bf16.vlgmr.msra.gmra.mxu1 %vm671_vm8, %v4336_v28  ;;  %v1107_v22 = vsel %vm650_vm3, %v1106_v4, %v1105_v18  ;;  %v1216_v23 = vpack.c.bf16 %v1208_v5, %v1208_v5  ;;  %v1217_v24 = vpack.c.bf16 %v1209_v11, %v1209_v11  ;;  %v1227_v25 = vunpack.c.l.b16 %v1211_v16  ;;  %v1451_v61 = vld [vmem:[%s4258_s29 + $0x20] sm:$0x1]  ;;  %v1454_v13 = vld [vmem:[%s4258_s29 + $0x38] sm:$0x1] }
  0x4e   : > { %3697 = vmatpush3.bf16.msra.mxu1 %v4290_v7  ;;  %3692 = vmatprep.mubr.msk.bf16.mxu0 %vm4088_vm0, %v4087_v1  ;;  %v1109_v26 = vsel %vm653_vm4, %v1108_v8, %v1107_v22  ;;  %v1218_v27 = vpack.c.bf16 %v1210_v15, %v1210_v15  ;;  %v1228_v29 = vunpack.c.l.b16 %v1212_v17  ;;  %v1229_v30 = vunpack.c.l.b16 %v1213_v19  ;;  %v4429_v2 = vld [vmem:[%s576_s9] sm:$0xff]  ;;  %s4577_s9 = sshll.u32 %s4989_s2, 3 }
  0x4f   : > { %v1111_v31 = vsel %vm656_vm5, %v1110_v9, %v1109_v26  ;;  %3702 = vmatprep.subr.bf16.mxu0 %v4087_v1  ;;  %3698 = vmatprep.mubr.msk.bf16.mxu1 %vm4088_vm0, %v4087_v1  ;;  %v1230_v28 = vunpack.c.l.b16 %v1214_v20  ;;  %v1231_v32 = vunpack.c.l.b16 %v1215_v21  ;;  %v1232_v33 = vunpack.c.l.b16 %v1216_v23  ;;  %v1453_v9 = vld [vmem:[%s4258_s29 + $0x30] sm:$0x1]  ;;  %v4442_v21 = vld [vmem:[%s5008_s3] sm:$0xff]   ;;  %s4582_s19 = scalar_lea.vmem [#allocation2], %s4577_s9 }
  0x50   : > { %v1113_v34 = vsel %vm659_vm6, %v1112_v10, %v1111_v31  ;;  %3708 = vmatprep.subr.bf16.mxu1 %v4087_v1  ;;  %v1233_v35 = vunpack.c.l.b16 %v1217_v24  ;;  %v1234_v36 = vunpack.c.l.b16 %v1218_v27  ;;  %v1235_v37 = vrot.slane %v1228_v29, 7  ;;  %585 = vst.msk [vmem:[%s4582_s19] sm:$0xff] %vm584_vm10, %v4429_v2 }
  0x51   : > { %v1115_v38 = vsel %vm662_vm7, %v1114_v14, %v1113_v34  ;;  %v1237_v39 = vrot.slane %v1229_v30, 6  ;;  %v1239_v40 = vrot.slane %v1230_v28, 5  ;;  %v1241_v41 = vrot.slane %v1231_v32, 4 }
  0x52   : > { %v1116_v42 = vpack.c.b16 %v1115_v38, %v1115_v38  ;;  %v1236_v43 = vsel %vm644_vm1, %v1235_v37, %v1227_v25  ;;  %v1243_v44 = vrot.slane %v1232_v33, 3  ;;  %v1245_v46 = vrot.slane %v1233_v35, 2  ;;  %v1644_v37 = vld [vmem:[%s4258_s29 + $0xa] sm:$0x1] }
  0x53   : > { %v1238_v45 = vsel %vm647_vm2, %v1237_v39, %v1236_v43  ;;  %v1247_v48 = vrot.slane %v1234_v36, 1  ;;  %v1458_v56 = vpack.c.bf16 %v1448_v52, %v1448_v52  ;;  %v1350_v57 = vsel %vm1348_vm9, %v1343_v53, 0  ;;  %v1643_v36 = vld [vmem:[%s4258_s29 + $0x2] sm:$0x1]  ;;  %v4460_v38 = vld [vmem:[%s5008_s3 + $0x8] sm:$0xff]  }
  0x54   : > { %3693 = vmatmul.mubr.msk.bf16.vlgmr.msra.gmra.mxu0 %vm671_vm8, %v1116_v42  ;;  %v1240_v47 = vsel %vm650_vm3, %v1239_v40, %v1238_v45  ;;  %v1459_v59 = vpack.c.bf16 %v1449_v55, %v1449_v55  ;;  %v1457_v62 = vpack.c.bf16 %v1447_v58, %v1447_v58  ;;  %v1460_v4 = vpack.c.bf16 %v1450_v60, %v1450_v60  ;;  %v1645_v40 = vld [vmem:[%s4258_s29 + $0x12] sm:$0x1]  ;;  %v1648_v43 = vld [vmem:[%s4258_s29 + $0x2a] sm:$0x1]  ;;  %v1650_v45 = vld [vmem:[%s4258_s29 + $0x3a] sm:$0x1] }
  0x55   : > { %3703 = vmatpush3.bf16.msra.mxu0 %v4238_v0  ;;  %3699 = vmatmul.mubr.msk.bf16.vlgmr.msra.gmra.mxu1 %vm671_vm8, %v983_v6  ;;  %v1242_v49 = vsel %vm653_vm4, %v1241_v41, %v1240_v47  ;;  %v1572_v63 = vunpack.c.l.b16 %v1458_v56  ;;  %v1461_v5 = vpack.c.bf16 %v1451_v61, %v1451_v61  ;;  %v586_v8 = vpack.c.bf16 %v4429_v2, %v4429_v2  ;;  %v1646_v41 = vld [vmem:[%s4258_s29 + $0x1a] sm:$0x1]  ;;  %v1831_v56 = vld [vmem:[%s4258_s29 + $0x3] sm:$0x1]  ;;  %v1833_v58 = vld [vmem:[%s4258_s29 + $0x13] sm:$0x1] }
  0x56   : > { %3709 = vmatpush3.bf16.msra.mxu1 %v4290_v7  ;;  %3704 = vmatprep.mubr.msk.bf16.mxu0 %vm4088_vm0, %v4087_v1  ;;  %v1244_v50 = vsel %vm656_vm5, %v1243_v44, %v1242_v49  ;;  %v3952_v7 = vld [vmem:[%s5005_s8 + $0x8] sm:$0xff]   ;;  %v1573_v6 = vunpack.c.l.b16 %v1459_v59  ;;  %v1462_v10 = vpack.c.bf16 %v1452_v3, %v1452_v3  ;;  %v1571_v11 = vunpack.c.l.b16 %v1457_v62  ;;  %v1649_v44 = vld [vmem:[%s4258_s29 + $0x32] sm:$0x1]  ;;  %v1834_v62 = vld [vmem:[%s4258_s29 + $0x1b] sm:$0x1] }
  0x57   : > { %v1246_v12 = vsel %vm659_vm6, %v1245_v46, %v1244_v50  ;;  %3710 = vmatprep.mubr.msk.bf16.mxu1 %vm4088_vm0, %v4087_v1  ;;  %3720 = vmatprep.subr.bf16.mxu1 %v4087_v1  ;;  %v1463_v14 = vpack.c.bf16 %v1453_v9, %v1453_v9  ;;  %v1574_v15 = vunpack.c.l.b16 %v1460_v4  ;;  %v1575_v16 = vunpack.c.l.b16 %v1461_v5  ;;  %v1836_v3 = vld [vmem:[%s4258_s29 + $0x2b] sm:$0x1] }
  0x58   : > { %v1248_v0 = vsel %vm662_vm7, %v1247_v48, %v1246_v12  ;;  %3714 = vmatprep.subr.bf16.mxu0 %v4087_v1  ;;  %v1579_v17 = vrot.slane %v1572_v63, 7  ;;  %v1464_v18 = vpack.c.bf16 %v1454_v13, %v1454_v13  ;;  %v1576_v19 = vunpack.c.l.b16 %v1462_v10  ;;  %v1835_v63 = vld [vmem:[%s4258_s29 + $0x23] sm:$0x1]  ;;  %v1838_v13 = vld [vmem:[%s4258_s29 + $0x3b] sm:$0x1] }
  0x59   : > { %v1249_v51 = vpack.c.b16 %v1248_v0, %v1248_v0  ;;  %v1581_v20 = vrot.slane %v1573_v6, 6  ;;  %v1577_v22 = vunpack.c.l.b16 %v1463_v14  ;;  %v1583_v24 = vrot.slane %v1574_v15, 5 }
  0x5a   : > { %v1580_v23 = vsel %vm644_vm1, %v1579_v17, %v1571_v11  ;;  %v1585_v25 = vrot.slane %v1575_v16, 4  ;;  %v1578_v26 = vunpack.c.l.b16 %v1464_v18  ;;  %v1587_v29 = vrot.slane %v1576_v19, 3 }
  0x5b   : > { %v1582_v27 = vsel %vm647_vm2, %v1581_v20, %v1580_v23  ;;  %v1589_v31 = vrot.slane %v1577_v22, 2  ;;  %v1653_v46 = vpack.c.bf16 %v1643_v36, %v1643_v36  ;;  %v1654_v47 = vpack.c.bf16 %v1644_v37, %v1644_v37 }
  0x5c   : > { %3705 = vmatmul.mubr.msk.bf16.vlgmr.msra.gmra.mxu0 %vm671_vm8, %v1249_v51  ;;  %v1584_v30 = vsel %vm650_vm3, %v1583_v24, %v1582_v27  ;;  %v1591_v32 = vrot.slane %v1578_v26, 1  ;;  %v1655_v48 = vpack.c.bf16 %v1645_v40, %v1645_v40  ;;  %v1656_v49 = vpack.c.bf16 %v1646_v41, %v1646_v41 }
  0x5d   : > { %3711 = vmatmul.mubr.msk.bf16.vlgmr.msra.gmra.mxu1 %vm671_vm8, %v1116_v42  ;;  %3716 = vmatprep.mubr.msk.bf16.mxu0 %vm4088_vm0, %v4087_v1  ;;  %v1586_v28 = vsel %vm653_vm4, %v1585_v25, %v1584_v30  ;;  %v1647_v42 = vld [vmem:[%s4258_s29 + $0x22] sm:$0x1]  ;;  %v1658_v12 = vpack.c.bf16 %v1648_v43, %v1648_v43  ;;  %v1659_v0 = vpack.c.bf16 %v1649_v44, %v1649_v44  ;;  %v1669_v52 = vunpack.c.l.b16 %v1653_v46 }
  0x5e   : > { %3724 = vmatprep.mubr.msk.bf16.mxu1 %vm4088_vm0, %v4087_v1  ;;  %3721 = vmatpush3.bf16.msra.mxu1 %v3952_v7  ;;  %v1588_v33 = vsel %vm656_vm5, %v1587_v29, %v1586_v28  ;;  %v1657_v50 = vpack.c.bf16 %v1647_v42, %v1647_v42  ;;  %v1660_v51 = vpack.c.bf16 %v1650_v45, %v1650_v45  ;;  %v1670_v7 = vunpack.c.l.b16 %v1654_v47  ;;  %v2006_v47 = vld [vmem:[%s4258_s29 + $0xc] sm:$0x1] }
  0x5f   : > { %3722 = vmatprep.subr.bf16.mxu1 %v4087_v1  ;;  %3715 = vmatpush3.bf16.msra.mxu0 %v1350_v57  ;;  %v1590_v34 = vsel %vm659_vm6, %v1589_v31, %v1588_v33  ;;  %v1671_v53 = vunpack.c.l.b16 %v1655_v48  ;;  %v1832_v57 = vld [vmem:[%s4258_s29 + $0xb] sm:$0x1]  ;;  %v1674_v59 = vunpack.c.l.b16 %v1658_v12  ;;  %v1675_v60 = vunpack.c.l.b16 %v1659_v0  ;;  %v4495_v48 = vld [vmem:[%s5008_s3 + $0x10] sm:$0xff]   ;;  %s565_s3 = scalar_lea.vmem [#allocation4], %s4577_s9 }
  0x60   : > { %3728 = vmatprep.subr.bf16.mxu0 %v4087_v1  ;;  %v1592_v35 = vsel %vm662_vm7, %v1591_v32, %v1590_v34  ;;  %v1673_v55 = vunpack.c.l.b16 %v1657_v50  ;;  %v1676_v61 = vunpack.c.l.b16 %v1660_v51  ;;  %v1677_v4 = vrot.slane %v1670_v7, 7  ;;  %v2007_v12 = vld [vmem:[%s4258_s29 + $0x14] sm:$0x1]  ;;  %s3349_s30 = sshll.u32 %s565_s3, 4  ;;  %s3350_s30 = int_to_ptr.vmem [resolvable:$true] %s3349_s30 }
  0x61   : > { %v1593_v39 = vpack.c.b16 %v1592_v35, %v1592_v35  ;;  %v1679_v5 = vrot.slane %v1671_v53, 6  ;;  %v1685_v10 = vrot.slane %v1674_v59, 3  ;;  %v1687_v11 = vrot.slane %v1675_v60, 2  ;;  %v2008_v53 = vld [vmem:[%s4258_s29 + $0x1c] sm:$0x1] }
  0x62   : > { %3723 = vmatpush3.bf16.msra.mxu1 %v3953_v54  ;;  %v1672_v54 = vunpack.c.l.b16 %v1656_v49  ;;  %v1683_v9 = vrot.slane %v1673_v55, 4  ;;  %v1678_v14 = vsel %vm644_vm1, %v1677_v4, %v1669_v52  ;;  %v1689_v15 = vrot.slane %v1676_v61, 1  ;;  %v2005_v52 = vld [vmem:[%s4258_s29 + $0x4] sm:$0x1]  ;;  %v2010_v61 = vld [vmem:[%s4258_s29 + $0x2c] sm:$0x1] }
  0x63   : > { %3734 = vmatprep.subr.bf16.mxu1 %v4087_v1  ;;  %v1839_v16 = vpack.c.bf16 %v1831_v56, %v1831_v56  ;;  %v1840_v17 = vpack.c.bf16 %v1832_v57, %v1832_v57  ;;  %v1680_v18 = vsel %vm647_vm2, %v1679_v5, %v1678_v14  ;;  %v1841_v19 = vpack.c.bf16 %v1833_v58, %v1833_v58  ;;  %v2009_v56 = vld [vmem:[%s4258_s29 + $0x24] sm:$0x1]  ;;  %v2011_v4 = vld [vmem:[%s4258_s29 + $0x34] sm:$0x1] }
  0x64   : > { %v1681_v6 = vrot.slane %v1672_v54, 5  ;;  %v1842_v20 = vpack.c.bf16 %v1834_v62, %v1834_v62  ;;  %v1843_v22 = vpack.c.bf16 %v1835_v63, %v1835_v63  ;;  %v1844_v24 = vpack.c.bf16 %v1836_v3, %v1836_v3 }
  0x65   : > { %3725 = vmatmul.mubr.msk.bf16.vlgmr.msra.gmra.mxu1 %vm584_vm10, %v586_v8  ;;  %v1837_v8 = vld [vmem:[%s4258_s29 + $0x33] sm:$0x1]  ;;  %v1846_v26 = vpack.c.bf16 %v1838_v13, %v1838_v13  ;;  %v1855_v29 = vunpack.c.l.b16 %v1839_v16  ;;  %v1856_v30 = vunpack.c.l.b16 %v1840_v17  ;;  %v1857_v31 = vunpack.c.l.b16 %v1841_v19 }
  0x66   : > { %3736 = vmatprep.mubr.msk.bf16.mxu1 %vm4088_vm0, %v4087_v1  ;;  %3735 = vmatpush3.bf16.msra.mxu1 %v4442_v21  ;;  %v1682_v23 = vsel %vm650_vm3, %v1681_v6, %v1680_v18  ;;  %v1845_v25 = vpack.c.bf16 %v1837_v8, %v1837_v8  ;;  %v1858_v32 = vunpack.c.l.b16 %v1842_v20  ;;  %v1859_v33 = vunpack.c.l.b16 %v1843_v22 }
  0x67   : > { %3746 = vmatprep.subr.bf16.mxu1 %v4087_v1  ;;  %v1684_v27 = vsel %vm653_vm4, %v1683_v9, %v1682_v23  ;;  %v1860_v34 = vunpack.c.l.b16 %v1844_v24  ;;  %v1862_v37 = vunpack.c.l.b16 %v1846_v26  ;;  %v1865_v41 = vrot.slane %v1857_v31, 6  ;;  %v2180_v24 = vld [vmem:[%s4258_s29 + $0xd] sm:$0x1] }
  0x68   : > { %v1686_v28 = vsel %vm656_vm5, %v1685_v10, %v1684_v27  ;;  %v1861_v36 = vunpack.c.l.b16 %v1845_v25  ;;  %v1867_v42 = vrot.slane %v1858_v32, 5  ;;  %v1869_v43 = vrot.slane %v1859_v33, 4  ;;  %v2012_v10 = vld [vmem:[%s4258_s29 + $0x3c] sm:$0x1]  ;;  %v2181_v27 = vld [vmem:[%s4258_s29 + $0x15] sm:$0x1] }
  0x69   : > { %v1688_v35 = vsel %vm659_vm6, %v1687_v11, %v1686_v28  ;;  %v1871_v46 = vrot.slane %v1860_v34, 3  ;;  %v2014_v0 = vpack.c.bf16 %v2006_v47, %v2006_v47  ;;  %v1875_v7 = vrot.slane %v1862_v37, 1  ;;  %v2179_v28 = vld [vmem:[%s4258_s29 + $0x5] sm:$0x1]  ;;  %v2182_v32 = vld [vmem:[%s4258_s29 + $0x1d] sm:$0x1] }
  0x6a   : > { %v1690_v40 = vsel %vm662_vm7, %v1689_v15, %v1688_v35  ;;  %v1873_v50 = vrot.slane %v1861_v36, 2  ;;  %v2015_v54 = vpack.c.bf16 %v2007_v12, %v2007_v12  ;;  %v2013_v57 = vpack.c.bf16 %v2005_v52, %v2005_v52  ;;  %v2183_v36 = vld [vmem:[%s4258_s29 + $0x25] sm:$0x1] }
  0x6b   : > { %v4488_v44 = vpack.c.b16 %v1690_v40, %v1690_v40  ;;  %v2016_v58 = vpack.c.bf16 %v2008_v53, %v2008_v53  ;;  %v2030_v59 = vunpack.c.l.b16 %v2014_v0  ;;  %v2017_v62 = vpack.c.bf16 %v2009_v56, %v2009_v56  ;;  %v2186_v0 = vld [vmem:[%s4258_s29 + $0x3d] sm:$0x1] }
  0x6c   : > { %v2031_v63 = vunpack.c.l.b16 %v2015_v54  ;;  %v2018_v5 = vpack.c.bf16 %v2010_v61, %v2010_v61  ;;  %v2029_v6 = vunpack.c.l.b16 %v2013_v57  ;;  %v2019_v11 = vpack.c.bf16 %v2011_v4, %v2011_v4 }
  0x6d   : > { %3737 = vmatmul.mubr.msk.bf16.vlgmr.msra.gmra.mxu1 %vm671_vm8, %v1593_v39  ;;  %v1863_v39 = vrot.slane %v1856_v30, 7  ;;  %v2032_v8 = vunpack.c.l.b16 %v2016_v58  ;;  %v2033_v13 = vunpack.c.l.b16 %v2017_v62  ;;  %v2037_v14 = vrot.slane %v2030_v59, 7 }
  0x6e   : > { %3747 = vmatpush3.bf16.msra.mxu1 %v4460_v38  ;;  %3748 = vmatprep.mubr.msk.bf16.mxu1 %vm4088_vm0, %v4087_v1  ;;  %v2020_v16 = vpack.c.bf16 %v2012_v10, %v2012_v10  ;;  %v2034_v17 = vunpack.c.l.b16 %v2018_v5  ;;  %v2039_v18 = vrot.slane %v2031_v63, 6  ;;  %v2035_v19 = vunpack.c.l.b16 %v2019_v11 }
  0x6f   : > { %3758 = vmatprep.subr.bf16.mxu1 %v4087_v1  ;;  %v1864_v45 = vsel %vm644_vm1, %v1863_v39, %v1855_v29  ;;  %v2038_v20 = vsel %vm644_vm1, %v2037_v14, %v2029_v6  ;;  %v2041_v22 = vrot.slane %v2032_v8, 5  ;;  %v2043_v23 = vrot.slane %v2033_v13, 4 }
  0x70   : > { %v1866_v49 = vsel %vm647_vm2, %v1865_v41, %v1864_v45  ;;  %v2040_v25 = vsel %vm647_vm2, %v2039_v18, %v2038_v20  ;;  %v2045_v26 = vrot.slane %v2034_v17, 3  ;;  %v2188_v29 = vpack.c.bf16 %v2180_v24, %v2180_v24  ;;  %v2184_v41 = vld [vmem:[%s4258_s29 + $0x2d] sm:$0x1] }
  0x71   : > { %v1868_v51 = vsel %vm650_vm3, %v1867_v42, %v1866_v49  ;;  %v2036_v30 = vunpack.c.l.b16 %v2020_v16  ;;  %v2042_v31 = vsel %vm650_vm3, %v2041_v22, %v2040_v25  ;;  %v2189_v33 = vpack.c.bf16 %v2181_v27, %v2181_v27 }
  0x72   : > { %v1870_v55 = vsel %vm653_vm4, %v1869_v43, %v1868_v51  ;;  %v2044_v34 = vsel %vm653_vm4, %v2043_v23, %v2042_v31  ;;  %v2047_v35 = vrot.slane %v2035_v19, 2  ;;  %v2187_v37 = vpack.c.bf16 %v2179_v28, %v2179_v28  ;;  %v1466_v31 = vld [vmem:[%s4258_s29 + $0x9] sm:$0x1] }
  0x73   : > { %v1872_v60 = vsel %vm656_vm5, %v1871_v46, %v1870_v55  ;;  %v2190_v39 = vpack.c.bf16 %v2182_v32, %v2182_v32  ;;  %v2046_v40 = vsel %vm656_vm5, %v2045_v26, %v2044_v34  ;;  %v2191_v42 = vpack.c.bf16 %v2183_v36, %v2183_v36  ;;  %v2185_v46 = vld [vmem:[%s4258_s29 + $0x35] sm:$0x1]  ;;  %v1467_v34 = vld [vmem:[%s4258_s29 + $0x11] sm:$0x1] }
  0x74   : > { %v1874_v3 = vsel %vm659_vm6, %v1873_v50, %v1872_v60  ;;  %v2204_v43 = vunpack.c.l.b16 %v2188_v29  ;;  %v2205_v45 = vunpack.c.l.b16 %v2189_v33  ;;  %v2192_v47 = vpack.c.bf16 %v2184_v41, %v2184_v41  ;;  %v1468_v41 = vld [vmem:[%s4258_s29 + $0x19] sm:$0x1] }
  0x75   : > { %3749 = vmatmul.mubr.msk.bf16.vlgmr.msra.gmra.mxu1 %vm671_vm8, %v4488_v44  ;;  %v1876_v9 = vsel %vm662_vm7, %v1875_v7, %v1874_v3  ;;  %v2203_v49 = vunpack.c.l.b16 %v2187_v37  ;;  %v2206_v50 = vunpack.c.l.b16 %v2190_v39  ;;  %v2049_v12 = vrot.slane %v2036_v30, 1  ;;  %v1465_v37 = vld [vmem:[%s4258_s29 + $0x1] sm:$0x1] }
  0x76   : > { %3759 = vmatpush3.bf16.msra.mxu1 %v4495_v48  ;;  %3760 = vmatprep.mubr.msk.bf16.mxu1 %vm4088_vm0, %v4087_v1  ;;  %v4516_v15 = vpack.c.b16 %v1876_v9, %v1876_v9  ;;  %v2193_v51 = vpack.c.bf16 %v2185_v46, %v2185_v46  ;;  %v2207_v7 = vunpack.c.l.b16 %v2191_v42  ;;  %v2211_v52 = vrot.slane %v2204_v43, 7 }
  0x77   : > { %3770 = vmatprep.subr.bf16.mxu1 %v4087_v1  ;;  %v2048_v53 = vsel %vm659_vm6, %v2047_v35, %v2046_v40  ;;  %v2194_v54 = vpack.c.bf16 %v2186_v0, %v2186_v0  ;;  %v2208_v55 = vunpack.c.l.b16 %v2192_v47  ;;  %v2213_v56 = vrot.slane %v2205_v45, 6 }
  0x78   : > { %v2209_v57 = vunpack.c.l.b16 %v2193_v51  ;;  %v2212_v58 = vsel %vm644_vm1, %v2211_v52, %v2203_v49  ;;  %v2215_v59 = vrot.slane %v2206_v50, 5  ;;  %v2217_v60 = vrot.slane %v2207_v7, 4  ;;  %v1469_v50 = vld [vmem:[%s4258_s29 + $0x21] sm:$0x1] }
  0x79   : > { %v2214_v61 = vsel %vm647_vm2, %v2213_v56, %v2212_v58  ;;  %v2219_v62 = vrot.slane %v2208_v55, 3  ;;  %v2050_v3 = vsel %vm662_vm7, %v2049_v12, %v2048_v53  ;;  %v2210_v4 = vunpack.c.l.b16 %v2194_v54  ;;  %v1470_v58 = vld [vmem:[%s4258_s29 + $0x29] sm:$0x1] }
  0x7a   : > { %v2216_v63 = vsel %vm650_vm3, %v2215_v59, %v2214_v61  ;;  %v2221_v6 = vrot.slane %v2209_v57, 2  ;;  %v4550_v9 = vpack.c.b16 %v2050_v3, %v2050_v3  ;;  %v1476_v35 = vpack.c.bf16 %v1466_v31, %v1466_v31 }
  0x7b   : > { %v2218_v5 = vsel %vm653_vm4, %v2217_v60, %v2216_v63  ;;  %v2223_v10 = vrot.slane %v2210_v4, 1  ;;  %v1477_v42 = vpack.c.bf16 %v1467_v34, %v1467_v34  ;;  %v1475_v45 = vpack.c.bf16 %v1465_v37, %v1465_v37  ;;  %v3508_v60 = vld [vmem:[%s5009_s5] ss:$0 sm:$0xff]  ;;  %s4889_s5 = scalar_lea.hbm %s4985_s15, %s4877_s18 }
  0x7c   : > { %v2220_v8 = vsel %vm656_vm5, %v2219_v62, %v2218_v5  ;;  %v1492_v46 = vunpack.c.l.b16 %v1476_v35  ;;  %v1478_v12 = vpack.c.bf16 %v1468_v41, %v1468_v41  ;;  %v1479_v59 = vpack.c.bf16 %v1469_v50, %v1469_v50 }
  0x7d   : > { %3761 = vmatmul.mubr.msk.bf16.vlgmr.msra.gmra.mxu1 %vm671_vm8, %v4516_v15  ;;  %v2222_v11 = vsel %vm659_vm6, %v2221_v6, %v2220_v8  ;;  %v1493_v7 = vunpack.c.l.b16 %v1477_v42  ;;  %v1491_v53 = vunpack.c.l.b16 %v1475_v45  ;;  %v1471_v8 = vld [vmem:[%s4258_s29 + $0x31] sm:$0x1]  ;;  %vm3265_vm15 = vcmask 523264  }
  0x7e   : > { %3771 = vmatpush3.bf16.msra.mxu1 %v4442_v21  ;;  %3772 = vmatprep.mubr.msk.bf16.mxu1 %vm4088_vm0, %v4087_v1  ;;  %v2224_v13 = vsel %vm662_vm7, %v2223_v10, %v2222_v11  ;;  %v1499_v54 = vrot.slane %v1492_v46, 7  ;;  %v1494_v62 = vunpack.c.l.b16 %v1478_v12  ;;  %v1480_v10 = vpack.c.bf16 %v1470_v58, %v1470_v58 }
  0x7f   : > { %3782 = vmatprep.subr.bf16.mxu1 %v4087_v1  ;;  %v2225_v14 = vpack.c.b16 %v2224_v13, %v2224_v13  ;;  %v1501_v5 = vrot.slane %v1493_v7, 6 }
  0x80   : > { %v1500_v11 = vsel %vm644_vm1, %v1499_v54, %v1491_v53 }
  0x85   : > { %3773 = vmatmul.mubr.msk.bf16.vlgmr.msra.gmra.mxu1 %vm671_vm8, %v4488_v44 }
  0x86   : > { %3783 = vmatpush3.bf16.msra.mxu1 %v4460_v38  ;;  %3784 = vmatprep.mubr.msk.bf16.mxu1 %vm4088_vm0, %v4087_v1 }
  0x87   : > { %3794 = vmatprep.subr.bf16.mxu1 %v4087_v1 }
  0x8d   : > { %3785 = vmatmul.mubr.msk.bf16.vlgmr.msra.gmra.mxu1 %vm671_vm8, %v4550_v9 }
  0x8e   : > { %3795 = vmatpush3.bf16.msra.mxu1 %v4495_v48  ;;  %3796 = vmatprep.mubr.msk.bf16.mxu1 %vm4088_vm0, %v4087_v1 }
  0x8f   : > { %3806 = vmatprep.subr.bf16.mxu1 %v4087_v1 }
  0x95   : > { %3797 = vmatmul.mubr.msk.bf16.vlgmr.msra.gmra.mxu1 %vm671_vm8, %v2225_v14 }
  0x96   : > { %3808 = vmatprep.mubr.msk.bf16.mxu1 %vm4088_vm0, %v4087_v1 }
  0xf5   : > { %v709_v16 = vpop.f32.mrf.mxu1 }
  0xf7   : > { %v3658_v17 = vpop.f32.mrf.mxu1 }
  0xf8   : > { %v1495_v17 = vunpack.c.l.b16 %v1479_v59 }
  0xf9   : > { %v712_v18 = vpop.f32.mrf.mxu1 }
  0xfb   : > { %v3659_v19 = vpop.f32.mrf.mxu1 }
  0xfc   : > { %v1503_v19 = vrot.slane %v1494_v62, 5 }
  0xfd   : > { %v789_v20 = vpop.f32.mrf.mxu1 }
  0xfe   : > { %v790_v55 = vadd.f32 %v789_v20, %v709_v16 }
  0xff   : > { %v3664_v22 = vpop.f32.mrf.mxu1 }
 0x100   : > { %v802_v13 = vadd.f32 %v3508_v60, %v790_v55 }
 0x101   : > { %v792_v23 = vpop.f32.mrf.mxu1 }
 0x103   : > { %v3665_v24 = vpop.f32.mrf.mxu1 }
 0x104   : > { %v888_v25 = vpop.f32.mrf.mxu0  ;;  %v1472_v24 = vld [vmem:[%s4258_s29 + $0x39] sm:$0x1] }
 0x105   : > { %v928_v26 = vpop.f32.mrf.mxu1  ;;  %v1482_v34 = vpack.c.bf16 %v1472_v24, %v1472_v24  ;;  %v2349_v24 = vld [vmem:[%s4258_s29 + $0x19] sm:$0x1] }
 0x106   : > { %v3670_v27 = vpop.f32.mrf.mxu0  ;;  %v929_v0 = vadd.f32 %v928_v26, %v888_v25  ;;  %v1481_v25 = vpack.c.bf16 %v1471_v8, %v1471_v8  ;;  %v1502_v26 = vsel %vm647_vm2, %v1501_v5, %v1500_v11 }
 0x107   : > { %v3676_v29 = vpop.f32.mrf.mxu1  ;;  %v1504_v35 = vsel %vm650_vm3, %v1503_v19, %v1502_v26  ;;  %v1498_v50 = vunpack.c.l.b16 %v1482_v34 }
 0x108   : > { %v891_v30 = vpop.f32.mrf.mxu0  ;;  %v934_v63 = vadd.f32 %v3508_v60, %v929_v0  ;;  %v1496_v29 = vunpack.c.l.b16 %v1480_v10  ;;  %v1497_v41 = vunpack.c.l.b16 %v1481_v25 }
 0x109   : > { %v931_v28 = vpop.f32.mrf.mxu1  ;;  %v803_v30 = vmax.f32 %v802_v13, 0.0  ;;  %v1511_v55 = vrot.slane %v1498_v50, 1 }
 0x10a   : > { %v3671_v32 = vpop.f32.mrf.mxu0  ;;  %v935_v20 = vmax.f32 %v934_v63, 0.0  ;;  %v1509_v7 = vrot.slane %v1497_v41, 2 }
 0x10b   : > { %v3677_v33 = vpop.f32.mrf.mxu1  ;;  %v1505_v32 = vrot.slane %v1495_v17, 4 }
 0x10c   : > { %v1021_v36 = vpop.f32.mrf.mxu0 }
 0x10d   : > { %v1061_v39 = vpop.f32.mrf.mxu1  ;;  %v1506_v2 = vsel %vm653_vm4, %v1505_v32, %v1504_v35  ;;  %v2280_v35 = vld [vmem:[%s4980_s10] sm:$0xf] }
 0x10e   : > { %v3682_v40 = vpop.f32.mrf.mxu0  ;;  %v1062_v56 = vadd.f32 %v1061_v39, %v1021_v36  ;;  %v936_v36 = vmax.f32 %v803_v30, %v935_v20  ;;  %v2348_v20 = vld [vmem:[%s4258_s29 + $0x11] sm:$0x1]  ;;  %v2359_v30 = vpack.c.bf16 %v2349_v24, %v2349_v24 }
 0x10f   : > { %v3688_v43 = vpop.f32.mrf.mxu1  ;;  %v2358_v25 = vpack.c.bf16 %v2348_v20, %v2348_v20 }
 0x110   : > { %v1024_v47 = vpop.f32.mrf.mxu0  ;;  %v1067_v14 = vadd.f32 %v3508_v60, %v1062_v56  ;;  %v1507_v43 = vrot.slane %v1496_v29, 3  ;;  %v2375_v41 = vunpack.c.l.b16 %v2359_v30 }
 0x111   : > { %v1064_v49 = vpop.f32.mrf.mxu1 }
 0x112   : > { %v3683_v51 = vpop.f32.mrf.mxu0  ;;  %v1068_v31 = vmax.f32 %v1067_v14, 0.0  ;;  %v1508_v53 = vsel %vm656_vm5, %v1507_v43, %v1506_v2  ;;  %v2285_v43 = vsel %vm1348_vm9, %v2280_v35, 0  ;;  %v2624_v35 = vld [vmem:[%s4258_s29 + $0xb] sm:$0x1] }
 0x113   : > { %v3689_v52 = vpop.f32.mrf.mxu1 }
 0x114   : > { %v1154_v57 = vpop.f32.mrf.mxu0  ;;  %v1069_v45 = vmax.f32 %v936_v36, %v1068_v31  ;;  %v4654_v36 = vld [vmem:[%s5010_s4 + $0x8] sm:$0xff]  }
 0x115   : > { %v1194_v61 = vpop.f32.mrf.mxu1  ;;  %3807 = vmatpush3.bf16.msra.mxu1 %v4654_v36 }
 0x116   : > { %v3694_v3 = vpop.f32.mrf.mxu0  ;;  %v1195_v4 = vadd.f32 %v1194_v61, %v1154_v57  ;;  %v1510_v57 = vsel %vm659_vm6, %v1509_v7, %v1508_v53  ;;  %3818 = vmatprep.subr.bf16.mxu1 %v4087_v1 }
 0x117   : > { %v3700_v6 = vpop.f32.mrf.mxu1  ;;  %v1512_v58 = vsel %vm662_vm7, %v1511_v55, %v1510_v57 }
 0x118   : > { %v1157_v16 = vpop.f32.mrf.mxu0  ;;  %v1200_v23 = vadd.f32 %v3508_v60, %v1195_v4  ;;  %v1513_v59 = vpack.c.b16 %v1512_v58, %v1512_v58 }
 0x119   : > { %v1197_v18 = vpop.f32.mrf.mxu1 }
 0x11a   : > { %v3695_v22 = vpop.f32.mrf.mxu0  ;;  %v1201_v37 = vmax.f32 %v1200_v23, 0.0  ;;  %v2347_v18 = vld [vmem:[%s4258_s29 + $0x9] sm:$0x1]  ;;  %v2346_v23 = vld [vmem:[%s4258_s29 + $0x1] sm:$0x1] }
 0x11b   : > { %v3701_v27 = vpop.f32.mrf.mxu1  ;;  %v2357_v22 = vpack.c.bf16 %v2347_v18, %v2347_v18  ;;  %v2356_v29 = vpack.c.bf16 %v2346_v23, %v2346_v23  ;;  %v2531_v18 = vld [vmem:[%s4258_s29 + $0x3a] sm:$0x1] }
 0x11c   : > { %v1287_v28 = vpop.f32.mrf.mxu0  ;;  %v1202_v51 = vmax.f32 %v1069_v45, %v1201_v37  ;;  %v2350_v27 = vld [vmem:[%s4258_s29 + $0x21] sm:$0x1]  ;;  %v2352_v37 = vld [vmem:[%s4258_s29 + $0x31] sm:$0x1]  ;;  %v2353_v45 = vld [vmem:[%s4258_s29 + $0x39] sm:$0x1] }
 0x11d   : > { %v1327_v33 = vpop.f32.mrf.mxu1  ;;  %v2373_v31 = vunpack.c.l.b16 %v2357_v22  ;;  %v2360_v32 = vpack.c.bf16 %v2350_v27, %v2350_v27  ;;  %v2363_v50 = vpack.c.bf16 %v2353_v45, %v2353_v45 }
 0x11e   : > { %v3706_v39 = vpop.f32.mrf.mxu0  ;;  %v1328_v40 = vadd.f32 %v1327_v33, %v1287_v28  ;;  %v2351_v28 = vld [vmem:[%s4258_s29 + $0x29] sm:$0x1]  ;;  %v2374_v33 = vunpack.c.l.b16 %v2358_v25 }
 0x11f   : > { %v3712_v42 = vpop.f32.mrf.mxu1  ;;  %v2361_v39 = vpack.c.bf16 %v2351_v28, %v2351_v28  ;;  %v2379_v55 = vunpack.c.l.b16 %v2363_v50 }
 0x120   : > { %v1290_v46 = vpop.f32.mrf.mxu0  ;;  %v1333_v47 = vadd.f32 %v3508_v60, %v1328_v40  ;;  %v2372_v40 = vunpack.c.l.b16 %v2356_v29  ;;  %v2380_v42 = vrot.slane %v2373_v31, 7  ;;  %v2382_v2 = vrot.slane %v2374_v33, 6 }
 0x121   : > { %v1330_v49 = vpop.f32.mrf.mxu1  ;;  %v2362_v46 = vpack.c.bf16 %v2352_v37, %v2352_v37  ;;  %v2541_v29 = vpack.c.bf16 %v2531_v18, %v2531_v18  ;;  %v2625_v37 = vld [vmem:[%s4258_s29 + $0x13] sm:$0x1] }
 0x122   : > { %v3707_v12 = vpop.f32.mrf.mxu0  ;;  %v1334_v0 = vmax.f32 %v1333_v47, 0.0  ;;  %v2376_v47 = vunpack.c.l.b16 %v2360_v32 }
 0x123   : > { %v3713_v52 = vpop.f32.mrf.mxu1  ;;  %v2377_v12 = vunpack.c.l.b16 %v2361_v39  ;;  %v2378_v7 = vunpack.c.l.b16 %v2362_v46 }
 0x124   : > { %v1335_v54 = vmax.f32 %v1202_v51, %v1334_v0  ;;  %v2381_v0 = vsel %vm644_vm1, %v2380_v42, %v2372_v40  ;;  %v2384_v51 = vrot.slane %v2375_v41, 5  ;;  %v2386_v53 = vrot.slane %v2376_v47, 4  ;;  %v2623_v42 = vld [vmem:[%s4258_s29 + $0x3] sm:$0x1] }
 0x125   : > { %v2383_v52 = vsel %vm647_vm2, %v2382_v2, %v2381_v0  ;;  %v2388_v57 = vrot.slane %v2377_v12, 3  ;;  %v2557_v40 = vunpack.c.l.b16 %v2541_v29  ;;  %v2627_v2 = vld [vmem:[%s4258_s29 + $0x23] sm:$0x1]  ;;  %v2628_v0 = vld [vmem:[%s4258_s29 + $0x2b] sm:$0x1] }
 0x126   : > { %1337 = vrot.lane.b32.xlu0 %v1335_v54, %s4089_s23  ;;  %v1342_v56 = vpack.c.bf16 %v1335_v54, %v1335_v54 }
 0x128   : > { %3717 = vmatmul.mubr.msk.bf16.vlgmr.msra.gmra.mxu0 %vm1344_vm11, %v1342_v56  ;;  %v2385_v56 = vsel %vm650_vm3, %v2384_v51, %v2383_v52  ;;  %v2633_v52 = vpack.c.bf16 %v2623_v42, %v2623_v42  ;;  %v2856_v42 = vld [vmem:[%s4258_s29 + $0x24] sm:$0x1] }
 0x129   : > { %3729 = vmatpush3.bf16.msra.mxu0 %v4460_v38  ;;  %3730 = vmatprep.mubr.msk.bf16.mxu0 %vm4088_vm0, %v4087_v1  ;;  %v2387_v58 = vsel %vm653_vm4, %v2386_v53, %v2385_v56  ;;  %v2634_v53 = vpack.c.bf16 %v2624_v35, %v2624_v35  ;;  %v2629_v56 = vld [vmem:[%s4258_s29 + $0x33] sm:$0x1] }
 0x12a   : > { %3740 = vmatprep.subr.bf16.mxu0 %v4087_v1 }
 0x130   : > { %3731 = vmatmul.mubr.msk.bf16.vlgmr.msra.gmra.mxu0 %vm671_vm8, %v1513_v59 }
 0x131   : > { %3741 = vmatpush3.bf16.msra.mxu0 %v4495_v48  ;;  %3742 = vmatprep.mubr.msk.bf16.mxu0 %vm4088_vm0, %v4087_v1 }
 0x132   : > { %3752 = vmatprep.subr.bf16.mxu0 %v4087_v1 }
 0x138   : > { %3743 = vmatmul.mubr.msk.bf16.vlgmr.msra.gmra.mxu0 %vm671_vm8, %v4488_v44 }
 0x139   : > { %3753 = vmatpush3.bf16.msra.mxu0 %v4442_v21  ;;  %3754 = vmatprep.mubr.msk.bf16.mxu0 %vm4088_vm0, %v4087_v1 }
 0x13a   : > { %3764 = vmatprep.subr.bf16.mxu0 %v4087_v1 }
 0x140   : > { %3755 = vmatmul.mubr.msk.bf16.vlgmr.msra.gmra.mxu0 %vm671_vm8, %v1513_v59  ;;  %v2390_v59 = vrot.slane %v2378_v7, 2  ;;  %v2570_v7 = vrot.slane %v2557_v40, 1 }
 0x141   : > { %3765 = vmatpush3.bf16.msra.mxu0 %v4460_v38  ;;  %3766 = vmatprep.mubr.msk.bf16.mxu0 %vm4088_vm0, %v4087_v1  ;;  %v4629_v38 = vpop.f32.mrf.mxu1 }
 0x142   : > { %3776 = vmatprep.subr.bf16.mxu0 %v4087_v1 }
 0x143   : > { %v3726_v44 = vpop.f32.mrf.mxu1 }
 0x148   : > { %3767 = vmatmul.mubr.msk.bf16.vlgmr.msra.gmra.mxu0 %vm671_vm8, %v4516_v15 }
 0x149   : > { %3777 = vmatpush3.bf16.msra.mxu0 %v4495_v48  ;;  %3778 = vmatprep.mubr.msk.bf16.mxu0 %vm4088_vm0, %v4087_v1  ;;  %v1444_v48 = vpop.f32.mrf.mxu1 }
 0x14a   : > { %3788 = vmatprep.subr.bf16.mxu0 %v4087_v1  ;;  %v2389_v48 = vsel %vm656_vm5, %v2388_v57, %v2387_v58  ;;  %v2635_v57 = vpack.c.bf16 %v2625_v37, %v2625_v37 }
 0x14b   : > { %v3727_v60 = vpop.f32.mrf.mxu1 }
 0x14c   : > { %v2392_v60 = vrot.slane %v2379_v55, 1 }
 0x14d   : > { %v4631_v61 = vpop.f32.mrf.mxu1 }
 0x150   : > { %3779 = vmatmul.mubr.msk.bf16.vlgmr.msra.gmra.mxu0 %vm671_vm8, %v4550_v9  ;;  %v3738_v9 = vpop.f32.mrf.mxu1 }
 0x151   : > { %3789 = vmatpush3.bf16.msra.mxu0 %v4442_v21  ;;  %3790 = vmatprep.mubr.msk.bf16.mxu0 %vm4088_vm0, %v4087_v1  ;;  %v2391_v9 = vsel %vm659_vm6, %v2390_v59, %v2389_v48  ;;  %v2637_v59 = vpack.c.bf16 %v2627_v2, %v2627_v2  ;;  %v2638_v48 = vpack.c.bf16 %v2628_v0, %v2628_v0 }
 0x152   : > { %3800 = vmatprep.subr.bf16.mxu0 %v4087_v1  ;;  %v1640_v21 = vpop.f32.mrf.mxu1 }
 0x154   : > { %v3739_v62 = vpop.f32.mrf.mxu1 }
 0x155   : > { %v2393_v62 = vsel %vm662_vm7, %v2392_v60, %v2391_v9  ;;  %v2649_v9 = vunpack.c.l.b16 %v2633_v52 }
 0x156   : > { %v4633_v63 = vpop.f32.mrf.mxu1 }
 0x158   : > { %3791 = vmatmul.mubr.msk.bf16.vlgmr.msra.gmra.mxu0 %vm671_vm8, %v4516_v15  ;;  %v3750_v3 = vpop.f32.mrf.mxu1 }
 0x159   : > { %3802 = vmatprep.mubr.msk.bf16.mxu0 %vm4088_vm0, %v4087_v1  ;;  %3801 = vmatpush3.bf16.msra.mxu0 %v2285_v43  ;;  %v4674_v3 = vld [vmem:[%s5010_s4 + $0x10] sm:$0xff]   ;;  %v2626_v43 = vld [vmem:[%s4258_s29 + $0x1b] sm:$0x1] }
 0x15a   : > { %v1788_v15 = vpop.f32.mrf.mxu1  ;;  %3812 = vmatprep.subr.bf16.mxu0 %v4087_v1  ;;  %v2636_v58 = vpack.c.bf16 %v2626_v43, %v2626_v43 }
 0x15b   : > { %v2524_v15 = vld [vmem:[%s4258_s29 + $0x2] sm:$0x1] }
 0x15c   : > { %v3751_v4 = vpop.f32.mrf.mxu1  ;;  %v2534_v20 = vpack.c.bf16 %v2524_v15, %v2524_v15 }
 0x15d   : > { %v2525_v4 = vld [vmem:[%s4258_s29 + $0xa] sm:$0x1] }
 0x15e   : > { %v4635_v5 = vpop.f32.mrf.mxu1  ;;  %v2535_v22 = vpack.c.bf16 %v2525_v4, %v2525_v4  ;;  %v2550_v30 = vunpack.c.l.b16 %v2534_v20  ;;  %v2630_v4 = vld [vmem:[%s4258_s29 + $0x3b] sm:$0x1] }
 0x160   : > { %v3762_v6 = vpop.f32.mrf.mxu1  ;;  %v2551_v31 = vunpack.c.l.b16 %v2535_v22 }
 0x161   : > { %v4678_v6 = vpack.c.b16 %v2393_v62, %v2393_v62  ;;  %v2651_v62 = vunpack.c.l.b16 %v2635_v57 }
 0x162   : > { %v1918_v8 = vpop.f32.mrf.mxu1  ;;  %v2558_v41 = vrot.slane %v2551_v31, 7 }
 0x163   : > { %v2526_v8 = vld [vmem:[%s4258_s29 + $0x12] sm:$0x1]  ;;  %3809 = vmatmul.mubr.msk.bf16.vlgmr.msra.gmra.mxu1 %vm671_vm8, %v4678_v6  ;;  %v2659_v20 = vrot.slane %v2651_v62, 6 }
 0x164   : > { %v3763_v10 = vpop.f32.mrf.mxu1  ;;  %3819 = vmatpush3.bf16.msra.mxu1 %v4674_v3  ;;  %3820 = vmatprep.mubr.msk.bf16.mxu1 %vm4088_vm0, %v4087_v1  ;;  %v2536_v23 = vpack.c.bf16 %v2526_v8, %v2526_v8  ;;  %v2639_v8 = vpack.c.bf16 %v2629_v56, %v2629_v56 }
 0x165   : > { %v2527_v10 = vld [vmem:[%s4258_s29 + $0x1a] sm:$0x1]  ;;  %3830 = vmatprep.subr.bf16.mxu1 %v4087_v1 }
 0x166   : > { %v4637_v11 = vpop.f32.mrf.mxu1  ;;  %v2537_v24 = vpack.c.bf16 %v2527_v10, %v2527_v10  ;;  %v2552_v28 = vunpack.c.l.b16 %v2536_v23  ;;  %v2652_v10 = vunpack.c.l.b16 %v2636_v58 }
 0x168   : > { %v3774_v13 = vpop.f32.mrf.mxu1  ;;  %v2553_v32 = vunpack.c.l.b16 %v2537_v24  ;;  %v2560_v45 = vrot.slane %v2552_v28, 6  ;;  %v2661_v22 = vrot.slane %v2652_v10, 5  ;;  %v2640_v24 = vpack.c.bf16 %v2630_v4, %v2630_v4 }
 0x16a   : > { %v2002_v14 = vpop.f32.mrf.mxu1  ;;  %v2562_v46 = vrot.slane %v2553_v32, 5 }
 0x16b   : > { %v2528_v14 = vld [vmem:[%s4258_s29 + $0x22] sm:$0x1] }
 0x16c   : > { %v3775_v17 = vpop.f32.mrf.mxu1  ;;  %v2538_v25 = vpack.c.bf16 %v2528_v14, %v2528_v14 }
 0x16d   : > { %v2530_v17 = vld [vmem:[%s4258_s29 + $0x32] sm:$0x1] }
 0x16e   : > { %v4641_v19 = vpop.f32.mrf.mxu1  ;;  %v2540_v27 = vpack.c.bf16 %v2530_v17, %v2530_v17  ;;  %v2554_v33 = vunpack.c.l.b16 %v2538_v25 }
 0x170   : > { %v3786_v26 = vpop.f32.mrf.mxu1  ;;  %v2556_v39 = vunpack.c.l.b16 %v2540_v27  ;;  %v2564_v47 = vrot.slane %v2554_v33, 4  ;;  %v2655_v27 = vunpack.c.l.b16 %v2639_v8  ;;  %v2852_v33 = vld [vmem:[%s4258_s29 + $0x4] sm:$0x1] }
 0x172   : > { %v2136_v34 = vpop.f32.mrf.mxu1  ;;  %v2568_v12 = vrot.slane %v2556_v39, 2  ;;  %v2860_v39 = vpack.c.bf16 %v2852_v33, %v2852_v33 }
 0x174   : > { %v3787_v49 = vpop.f32.mrf.mxu1  ;;  %v2876_v2 = vunpack.c.l.b16 %v2860_v39 }
 0x175   : > { %v2559_v49 = vsel %vm644_vm1, %v2558_v41, %v2550_v30  ;;  %v2854_v30 = vld [vmem:[%s4258_s29 + $0x14] sm:$0x1]  ;;  %v2656_v41 = vunpack.c.l.b16 %v2640_v24 }
 0x176   : > { %v4664_v54 = vpop.f32.mrf.mxu1  ;;  %v2561_v51 = vsel %vm647_vm2, %v2560_v45, %v2559_v49  ;;  %v2862_v35 = vpack.c.bf16 %v2854_v30, %v2854_v30  ;;  %v2667_v45 = vrot.slane %v2655_v27, 2  ;;  %v2857_v49 = vld [vmem:[%s4258_s29 + $0x2c] sm:$0x1] }
 0x177   : > { %v2563_v55 = vsel %vm650_vm3, %v2562_v46, %v2561_v51  ;;  %v2669_v0 = vrot.slane %v2656_v41, 1 }
 0x178   : > { %v3798_v44 = vpop.f32.mrf.mxu1  ;;  %v2878_v46 = vunpack.c.l.b16 %v2862_v35 }
 0x179   : > { %v2565_v44 = vsel %vm653_vm4, %v2564_v47, %v2563_v55  ;;  %v2865_v55 = vpack.c.bf16 %v2857_v49, %v2857_v49 }
 0x17a   : > { %v2266_v21 = vpop.f32.mrf.mxu1  ;;  %v2886_v52 = vrot.slane %v2878_v46, 6  ;;  %v2328_v46 = vld [vmem:[%s4258_s29] sm:$0x1] }
 0x17b   : > { %v2650_v21 = vunpack.c.l.b16 %v2634_v53  ;;  %v2858_v53 = vld [vmem:[%s4258_s29 + $0x34] sm:$0x1] }
 0x17c   : > { %v3799_v13 = vpop.f32.mrf.mxu1 }
 0x17d   : > { %v2653_v13 = vunpack.c.l.b16 %v2637_v59  ;;  %v2657_v17 = vrot.slane %v2650_v21, 7 }
 0x17f   : > { %v2663_v23 = vrot.slane %v2653_v13, 4  ;;  %v2658_v25 = vsel %vm644_vm1, %v2657_v17, %v2649_v9  ;;  %v2881_v9 = vunpack.c.l.b16 %v2865_v55 }
 0x180   : > { %v2660_v29 = vsel %vm647_vm2, %v2659_v20, %v2658_v25 }
 0x181   : > { %v2662_v28 = vsel %vm650_vm3, %v2661_v22, %v2660_v29  ;;  %v2892_v10 = vrot.slane %v2881_v9, 3 }
 0x182   : > { %v2664_v37 = vsel %vm653_vm4, %v2663_v23, %v2662_v28 }
 0x198   : > { %v1338_v16 = vpop.permute.xlu0 %1337 }
 0x199   : > { %1341 = vst.msk [vmem:[%s4582_s19] sm:$0xff] %vm1340_vm12, %v1338_v16  ;;  %v2529_v16 = vld [vmem:[%s4258_s29 + $0x2a] sm:$0x1] }
 0x19a   : > { %v2539_v26 = vpack.c.bf16 %v2529_v16, %v2529_v16  ;;  %v2654_v16 = vunpack.c.l.b16 %v2638_v48  ;;  %v2866_v48 = vpack.c.bf16 %v2858_v53, %v2858_v53 }
 0x19c   : > { %v2555_v34 = vunpack.c.l.b16 %v2539_v26  ;;  %v2853_v26 = vld [vmem:[%s4258_s29 + $0xc] sm:$0x1]  ;;  %v2665_v32 = vrot.slane %v2654_v16, 3  ;;  %v2882_v8 = vunpack.c.l.b16 %v2866_v48 }
 0x19d   : > { %v2861_v31 = vpack.c.bf16 %v2853_v26, %v2853_v26 }
 0x19e   : > { %v2566_v50 = vrot.slane %v2555_v34, 3  ;;  %v2855_v34 = vld [vmem:[%s4258_s29 + $0x1c] sm:$0x1]  ;;  %v2666_v47 = vsel %vm656_vm5, %v2665_v32, %v2664_v37  ;;  %v2894_v16 = vrot.slane %v2882_v8, 2 }
 0x19f   : > { %v2877_v40 = vunpack.c.l.b16 %v2861_v31  ;;  %v2863_v43 = vpack.c.bf16 %v2855_v34, %v2855_v34 }
 0x1a0   : > { %v2567_v60 = vsel %vm656_vm5, %v2566_v50, %v2565_v44  ;;  %v2864_v50 = vpack.c.bf16 %v2856_v42, %v2856_v42  ;;  %v2859_v44 = vld [vmem:[%s4258_s29 + $0x3c] sm:$0x1] }
 0x1a1   : > { %v2569_v15 = vsel %vm659_vm6, %v2568_v12, %v2567_v60  ;;  %v2884_v12 = vrot.slane %v2877_v40, 7  ;;  %v2879_v51 = vunpack.c.l.b16 %v2863_v43  ;;  %v2329_v40 = vld [vmem:[%s4258_s29 + $0x8] sm:$0x1]  ;;  %v2330_v43 = vld [vmem:[%s4258_s29 + $0x10] sm:$0x1] }
 0x1a2   : > { %v2571_v14 = vsel %vm662_vm7, %v2570_v7, %v2569_v15  ;;  %v2668_v7 = vsel %vm659_vm6, %v2667_v45, %v2666_v47  ;;  %v2880_v57 = vunpack.c.l.b16 %v2864_v50  ;;  %v2867_v15 = vpack.c.bf16 %v2859_v44, %v2859_v44 }
 0x1a3   : > { %v4707_v18 = vpack.c.b16 %v2571_v14, %v2571_v14  ;;  %v2885_v56 = vsel %vm644_vm1, %v2884_v12, %v2876_v2  ;;  %v2670_v58 = vsel %vm662_vm7, %v2669_v0, %v2668_v7  ;;  %v2888_v59 = vrot.slane %v2879_v51, 5  ;;  %v2331_v2 = vld [vmem:[%s4258_s29 + $0x18] sm:$0x1] }
 0x1a4   : > { %v2887_v60 = vsel %vm647_vm2, %v2886_v52, %v2885_v56  ;;  %v4738_v21 = vpack.c.b16 %v2670_v58, %v2670_v58  ;;  %v2890_v62 = vrot.slane %v2880_v57, 4  ;;  %v2883_v14 = vunpack.c.l.b16 %v2867_v15  ;;  %v2332_v52 = vld [vmem:[%s4258_s29 + $0x20] sm:$0x1] }
 0x1a5   : > { %3821 = vmatmul.mubr.msk.bf16.vlgmr.msra.gmra.mxu1 %vm671_vm8, %v4707_v18  ;;  %v2889_v4 = vsel %vm650_vm3, %v2888_v59, %v2887_v60  ;;  %v2339_v45 = vpack.c.bf16 %v2329_v40, %v2329_v40  ;;  %v2340_v49 = vpack.c.bf16 %v2330_v43, %v2330_v43  ;;  %v2338_v12 = vpack.c.bf16 %v2328_v46, %v2328_v46  ;;  %v2333_v60 = vld [vmem:[%s4258_s29 + $0x28] sm:$0x1] }
 0x1a6   : > { %3831 = vmatpush3.bf16.msra.mxu1 %v4654_v36  ;;  %3832 = vmatprep.mubr.msk.bf16.mxu1 %vm4088_vm0, %v4087_v1  ;;  %v2891_v13 = vsel %vm653_vm4, %v2890_v62, %v2889_v4  ;;  %v2896_v20 = vrot.slane %v2883_v14, 1  ;;  %v2341_v53 = vpack.c.bf16 %v2331_v2, %v2331_v2  ;;  %v2342_v9 = vpack.c.bf16 %v2332_v52, %v2332_v52  ;;  %v2334_v14 = vld [vmem:[%s4258_s29 + $0x30] sm:$0x1] }
 0x1a7   : > { %3842 = vmatprep.subr.bf16.mxu1 %v4087_v1  ;;  %v2893_v17 = vsel %vm656_vm5, %v2892_v10, %v2891_v13  ;;  %v2453_v0 = vunpack.c.l.b16 %v2339_v45  ;;  %v2454_v55 = vunpack.c.l.b16 %v2340_v49  ;;  %v2452_v57 = vunpack.c.l.b16 %v2338_v12  ;;  %v3527_v10 = vld [vmem:[%s5011_s6] ss:$0 sm:$0xff] }
 0x1a8   : > { %v2895_v22 = vsel %vm659_vm6, %v2894_v16, %v2893_v17  ;;  %v2455_v15 = vunpack.c.l.b16 %v2341_v53  ;;  %v2343_v16 = vpack.c.bf16 %v2333_v60, %v2333_v60  ;;  %v2456_v17 = vunpack.c.l.b16 %v2342_v9 }
 0x1a9   : > { %v2460_v58 = vrot.slane %v2453_v0, 7  ;;  %v2462_v8 = vrot.slane %v2454_v55, 6 }
 0x1ad   : > { %3833 = vmatmul.mubr.msk.bf16.vlgmr.msra.gmra.mxu1 %vm671_vm8, %v4707_v18 }
 0x1ae   : > { %3843 = vmatpush3.bf16.msra.mxu1 %v4674_v3  ;;  %3844 = vmatprep.mubr.msk.bf16.mxu1 %vm4088_vm0, %v4087_v1 }
 0x1af   : > { %3854 = vmatprep.subr.bf16.mxu1 %v4087_v1 }
 0x1b5   : > { %3845 = vmatmul.mubr.msk.bf16.vlgmr.msra.gmra.mxu1 %vm671_vm8, %v4738_v21 }
 0x1b6   : > { %3855 = vmatpush3.bf16.msra.mxu1 %v4654_v36  ;;  %3856 = vmatprep.mubr.msk.bf16.mxu1 %vm4088_vm0, %v4087_v1  ;;  %v2897_v36 = vsel %vm662_vm7, %v2896_v20, %v2895_v22  ;;  %v2464_v20 = vrot.slane %v2455_v15, 5  ;;  %v3071_v15 = vld [vmem:[%s4258_s29 + $0x25] sm:$0x1] }
 0x1b7   : > { %3866 = vmatprep.subr.bf16.mxu1 %v4087_v1  ;;  %v4757_v23 = vpack.c.b16 %v2897_v36, %v2897_v36 }
 0x1bd   : > { %3857 = vmatmul.mubr.msk.bf16.vlgmr.msra.gmra.mxu1 %vm671_vm8, %v4738_v21 }
 0x1be   : > { %3867 = vmatpush3.bf16.msra.mxu1 %v4674_v3  ;;  %3868 = vmatprep.mubr.msk.bf16.mxu1 %vm4088_vm0, %v4087_v1 }
 0x1bf   : > { %3878 = vmatprep.subr.bf16.mxu1 %v4087_v1 }
 0x1c5   : > { %3869 = vmatmul.mubr.msk.bf16.vlgmr.msra.gmra.mxu1 %vm671_vm8, %v4757_v23 }
 0x1c6   : > { %3880 = vmatprep.mubr.msk.bf16.mxu1 %vm4088_vm0, %v4087_v1 }
 0x1e8   : > { %v4763_v24 = vpop.f32.mrf.mxu0 }
 0x1ea   : > { %v3718_v25 = vpop.f32.mrf.mxu0 }
 0x1eb   : > { %v2335_v25 = vld [vmem:[%s4258_s29 + $0x38] sm:$0x1] }
 0x1ec   : > { %v1389_v3 = vpop.f32.mrf.mxu0 }
 0x1ed   : > { %v2344_v3 = vpack.c.bf16 %v2334_v14, %v2334_v14  ;;  %v3079_v14 = vpack.c.bf16 %v3071_v15, %v3071_v15 }
 0x1ee   : > { %v3719_v26 = vpop.f32.mrf.mxu0 }
 0x1ef   : > { %v2458_v40 = vunpack.c.l.b16 %v2344_v3 }
 0x1f0   : > { %v1557_v27 = vpop.f32.mrf.mxu0 }
 0x1f1   : > { %v1638_v59 = vadd.f32 %v4631_v61, %v1557_v27  ;;  %v2461_v61 = vsel %vm644_vm1, %v2460_v58, %v2452_v57  ;;  %v3068_v57 = vld [vmem:[%s4258_s29 + $0xd] sm:$0x1]  ;;  %v3069_v58 = vld [vmem:[%s4258_s29 + $0x15] sm:$0x1] }
 0x1f2   : > { %v3732_v29 = vpop.f32.mrf.mxu0  ;;  %v2463_v26 = vsel %vm647_vm2, %v2462_v8, %v2461_v61  ;;  %v3077_v60 = vpack.c.bf16 %v3069_v58, %v3069_v58 }
 0x1f3   : > { %v2457_v29 = vunpack.c.l.b16 %v2343_v16 }
 0x1f4   : > { %v1560_v30 = vpop.f32.mrf.mxu0 }
 0x1f6   : > { %v3733_v31 = vpop.f32.mrf.mxu0 }
 0x1f8   : > { %v1735_v28 = vpop.f32.mrf.mxu0 }
 0x1fa   : > { %v3744_v32 = vpop.f32.mrf.mxu0 }
 0x1fc   : > { %v1738_v33 = vpop.f32.mrf.mxu0 }
 0x1fd   : > { %v2345_v33 = vpack.c.bf16 %v2335_v25, %v2335_v25 }
 0x1fe   : > { %v3745_v34 = vpop.f32.mrf.mxu0 }
 0x1ff   : > { %v2465_v34 = vsel %vm650_vm3, %v2464_v20, %v2463_v26  ;;  %v2459_v2 = vunpack.c.l.b16 %v2345_v33 }
 0x200   : > { %v1825_v35 = vpop.f32.mrf.mxu0 }
 0x201   : > { %v1826_v51 = vadd.f32 %v1825_v35, %v4633_v63  ;;  %v1741_v63 = vadd.f32 %v1735_v28, %v1638_v59  ;;  %v2466_v28 = vrot.slane %v2456_v17, 4  ;;  %v3076_v59 = vpack.c.bf16 %v3068_v57, %v3068_v57 }
 0x202   : > { %v3756_v37 = vpop.f32.mrf.mxu0 }
 0x203   : > { %v1921_v44 = vadd.f32 %v4635_v5, %v1826_v51  ;;  %v1749_v22 = vadd.f32 %v3527_v10, %v1741_v63  ;;  %v2467_v46 = vsel %vm653_vm4, %v2466_v28, %v2465_v34  ;;  %v2472_v51 = vrot.slane %v2459_v2, 1 }
 0x204   : > { %v1828_v39 = vpop.f32.mrf.mxu0 }
 0x205   : > { %v1922_v5 = vadd.f32 %v3527_v10, %v1921_v44  ;;  %v1750_v35 = vmax.f32 %v1749_v22, 0.0  ;;  %v3067_v44 = vld [vmem:[%s4258_s29 + $0x5] sm:$0x1]  ;;  %v3074_v22 = vld [vmem:[%s4258_s29 + $0x3d] sm:$0x1] }
 0x206   : > { %v3757_v41 = vpop.f32.mrf.mxu0  ;;  %v3075_v9 = vpack.c.bf16 %v3067_v44, %v3067_v44 }
 0x207   : > { %v1923_v30 = vmax.f32 %v1922_v5, 0.0  ;;  %v3073_v5 = vld [vmem:[%s4258_s29 + $0x35] sm:$0x1] }
 0x208   : > { %v1959_v42 = vpop.f32.mrf.mxu0  ;;  %v3091_v8 = vunpack.c.l.b16 %v3075_v9 }
 0x209   : > { %v2000_v48 = vadd.f32 %v4637_v11, %v1959_v42  ;;  %v2468_v42 = vrot.slane %v2457_v29, 3  ;;  %v1924_v43 = vmax.f32 %v1750_v35, %v1923_v30 }
 0x20a   : > { %v3768_v47 = vpop.f32.mrf.mxu0 }
 0x20b   : > { %v2469_v12 = vsel %vm656_vm5, %v2468_v42, %v2467_v46 }
 0x20c   : > { %v1962_v50 = vpop.f32.mrf.mxu0 }
 0x20d   : > { %v2470_v50 = vrot.slane %v2458_v40, 2 }
 0x20e   : > { %v3769_v7 = vpop.f32.mrf.mxu0 }
 0x20f   : > { %v2471_v52 = vsel %vm659_vm6, %v2470_v50, %v2469_v12 }
 0x210   : > { %v2089_v56 = vpop.f32.mrf.mxu0  ;;  %v2473_v53 = vsel %vm662_vm7, %v2472_v51, %v2471_v52 }
 0x211   : > { %v2095_v4 = vadd.f32 %v2089_v56, %v2000_v48  ;;  %v2474_v55 = vpack.c.b16 %v2473_v53, %v2473_v53  ;;  %v3960_v56 = vld [vmem:[%s5010_s4 + $0x18] sm:$0xff]  }
 0x212   : > { %v3780_v62 = vpop.f32.mrf.mxu0  ;;  %v3070_v48 = vld [vmem:[%s4258_s29 + $0x1d] sm:$0x1] }
 0x213   : > { %v2096_v36 = vadd.f32 %v3527_v10, %v2095_v4  ;;  %v3092_v62 = vunpack.c.l.b16 %v3076_v59  ;;  %v3078_v63 = vpack.c.bf16 %v3070_v48, %v3070_v48  ;;  %v3093_v4 = vunpack.c.l.b16 %v3077_v60 }
 0x214   : > { %v2092_v13 = vpop.f32.mrf.mxu0  ;;  %v1442_v60 = vadd.f32 %v4629_v38, %v4763_v24 }
 0x215   : > { %v2097_v37 = vmax.f32 %v2096_v36, 0.0  ;;  %v3072_v13 = vld [vmem:[%s4258_s29 + $0x2d] sm:$0x1]  ;;  %v3094_v16 = vunpack.c.l.b16 %v3078_v63  ;;  %v3101_v61 = vrot.slane %v3093_v4, 6  ;;  %v3081_v36 = vpack.c.bf16 %v3073_v5, %v3073_v5  ;;  %s3317_s29 = sand.u32 1, %s4206_s28   ;;  %s4092_s28 = smov [#allocation4]  }
 0x216   : > { %v3781_v11 = vpop.f32.mrf.mxu0  ;;  %v3080_v17 = vpack.c.bf16 %v3072_v13, %v3072_v13  ;;  %s4891_s6 = scalar_lea.sflag [#allocation5], %s3317_s29  ;;  %s3973_s8 = sshll.u32 %s4092_s28, 4  ;;  %s3974_s8 = int_to_ptr.vmem [resolvable:$false] %s3973_s8 }
 0x217   : > { %v2098_v49 = vmax.f32 %v1924_v43, %v2097_v37  ;;  %v3095_v11 = vunpack.c.l.b16 %v3079_v14  ;;  %v3103_v20 = vrot.slane %v3094_v16, 5  ;;  %v3097_v30 = vunpack.c.l.b16 %v3081_v36  ;;  %s3975_s23 = scalar_lea.vmem %s3974_s8, 256  ;;  %p3976_p0 = scmp.lt.s32.totalorder %s3350_s30, %s3974_s8 }
 0x218   : > { %v2173_v27 = vpop.f32.mrf.mxu0  ;;  %v3096_v3 = vunpack.c.l.b16 %v3080_v17 }
 0x219   : > { %v2174_v31 = vadd.f32 %v2173_v27, %v4641_v19  ;;  %v3105_v26 = vrot.slane %v3095_v11, 4  ;;  %v3082_v27 = vpack.c.bf16 %v3074_v22, %v3074_v22 }
 0x21a   : > { %v3792_v32 = vpop.f32.mrf.mxu0 }
 0x21b   : > { %v2269_v39 = vadd.f32 %v4664_v54, %v2174_v31  ;;  %v3958_v54 = vld [vmem:[%s5010_s4] sm:$0xff]   ;;  %v3107_v31 = vrot.slane %v3096_v3, 3  ;;  %v3098_v28 = vunpack.c.l.b16 %v3082_v27  ;;  %v3109_v32 = vrot.slane %v3097_v30, 2 }
 0x21c   : > { %v2176_v41 = vpop.f32.mrf.mxu0 }
 0x21d   : > { %v2270_v45 = vadd.f32 %v3527_v10, %v2269_v39  ;;  %v3099_v10 = vrot.slane %v3092_v62, 7  ;;  %v3111_v34 = vrot.slane %v3098_v28, 1 }
 0x21e   : > { %v3793_v47 = vpop.f32.mrf.mxu0 }
 0x21f   : > { %v2271_v19 = vmax.f32 %v2270_v45, 0.0 }
 0x221   : > { %v2272_v0 = vmax.f32 %v2098_v49, %v2271_v19 }
 0x223   : > { %2274 = vrot.lane.b32.xlu0 %v2272_v0, %s4090_s21  ;;  %v2279_v7 = vpack.c.bf16 %v2272_v0, %v2272_v0  ;;  %v2438_v39 = vpop.f32.mrf.mxu1 }
 0x225   : > { %3803 = vmatmul.mubr.msk.bf16.vlgmr.msra.gmra.mxu0 %vm1344_vm11, %v2279_v7  ;;  %v3810_v40 = vpop.f32.mrf.mxu1 }
 0x226   : > { %3813 = vmatpush3.bf16.msra.mxu0 %v3958_v54  ;;  %3814 = vmatprep.mubr.msk.bf16.mxu0 %vm4088_vm0, %v4087_v1 }
 0x227   : > { %3824 = vmatprep.subr.bf16.mxu0 %v4087_v1  ;;  %v2441_v41 = vpop.f32.mrf.mxu1 }
 0x229   : > { %v3811_v42 = vpop.f32.mrf.mxu1 }
 0x22d   : > { %3815 = vmatmul.mubr.msk.bf16.vlgmr.msra.gmra.mxu0 %vm671_vm8, %v2474_v55 }
 0x22e   : > { %3825 = vmatpush3.bf16.msra.mxu0 %v3960_v56  ;;  %3826 = vmatprep.mubr.msk.bf16.mxu0 %vm4088_vm0, %v4087_v1 }
 0x22f   : > { %3836 = vmatprep.subr.bf16.mxu0 %v4087_v1 }
 0x235   : > { %3827 = vmatmul.mubr.msk.bf16.vlgmr.msra.gmra.mxu0 %vm671_vm8, %v4738_v21  ;;  %v3100_v21 = vsel %vm644_vm1, %v3099_v10, %v3091_v8 }
 0x236   : > { %3837 = vmatpush3.bf16.msra.mxu0 %v3958_v54  ;;  %3838 = vmatprep.mubr.msk.bf16.mxu0 %vm4088_vm0, %v4087_v1  ;;  %v3102_v25 = vsel %vm647_vm2, %v3101_v61, %v3100_v21 }
 0x237   : > { %3848 = vmatprep.subr.bf16.mxu0 %v4087_v1  ;;  %v3104_v29 = vsel %vm650_vm3, %v3103_v20, %v3102_v25 }
 0x23d   : > { %3839 = vmatmul.mubr.msk.bf16.vlgmr.msra.gmra.mxu0 %vm671_vm8, %v4678_v6  ;;  %v3106_v6 = vsel %vm653_vm4, %v3105_v26, %v3104_v29 }
 0x23e   : > { %3849 = vmatpush3.bf16.msra.mxu0 %v3960_v56  ;;  %3850 = vmatprep.mubr.msk.bf16.mxu0 %vm4088_vm0, %v4087_v1  ;;  %v3108_v33 = vsel %vm656_vm5, %v3107_v31, %v3106_v6 }
 0x23f   : > { %3860 = vmatprep.subr.bf16.mxu0 %v4087_v1  ;;  %v3110_v35 = vsel %vm659_vm6, %v3109_v32, %v3108_v33  ;;  %v3546_v33 = vld [vmem:[%s5012_s7] ss:$0 sm:$0xff]  ;;  %s3969_s7 = scalar_lea.vmem %s3350_s30, 128 }
 0x240   : > { %p3970_p11 = scmp.ne.s32.totalorder %s3350_s30, %s3969_s7  ;;  %p3977_p1 = scmp.lt.s32.totalorder %s3975_s23, %s3969_s7 }
 0x242   : > { %p3971_p12 = pnand %p3970_p11, %p4225_p5  ;;  %p3978_p2 = por %p3977_p1, %p3976_p0 }
 0x244   : > { %p3972_p13 = pneg %p3971_p12 }
 0x245   : > { %3851 = vmatmul.mubr.msk.bf16.vlgmr.msra.gmra.mxu0 %vm671_vm8, %v4757_v23  ;;  %v3112_v23 = vsel %vm662_vm7, %v3111_v34, %v3110_v35 }
 0x246   : > { %3861 = vmatpush3.bf16.msra.mxu0 %v3958_v54  ;;  %3862 = vmatprep.mubr.msk.bf16.mxu0 %vm4088_vm0, %v4087_v1  ;;  %v3113_v37 = vpack.c.b16 %v3112_v23, %v3112_v23  ;;  %p3979_p3 = pnand %p3978_p2, %p3972_p13 }
 0x247   : > { %3872 = vmatprep.subr.bf16.mxu0 %v4087_v1 }
 0x24d   : > { %3863 = vmatmul.mubr.msk.bf16.vlgmr.msra.gmra.mxu0 %vm671_vm8, %v4707_v18 }
 0x24e   : > { %3873 = vmatpush3.bf16.msra.mxu0 %v3960_v56  ;;  %3874 = vmatprep.mubr.msk.bf16.mxu0 %vm4088_vm0, %v4087_v1  ;;  %v3168_v56 = vld [vmem:[%s4981_s11] sm:$0xf] }
 0x24f   : > { %3884 = vmatprep.subr.bf16.mxu0 %v4087_v1  ;;  %v3173_v58 = vsel %vm1348_vm9, %v3168_v56, 0 }
 0x250   : > { %3879 = vmatpush3.bf16.msra.mxu1 %v3173_v58 }
 0x255   : > { %3875 = vmatmul.mubr.msk.bf16.vlgmr.msra.gmra.mxu0 %vm671_vm8, %v3113_v37 }
 0x256   : > { %3892 = vmatprep.mubr.msk.bf16.mxu0 %vm4088_vm0, %v4087_v1 }
 0x265   : > { %v2616_v43 = vpop.f32.mrf.mxu1 }
 0x267   : > { %v3822_v18 = vpop.f32.mrf.mxu1 }
 0x269   : > { %v2619_v45 = vpop.f32.mrf.mxu1 }
 0x26b   : > { %v3823_v46 = vpop.f32.mrf.mxu1 }
 0x26d   : > { %v2765_v47 = vpop.f32.mrf.mxu1 }
 0x26f   : > { %v3834_v2 = vpop.f32.mrf.mxu1 }
 0x271   : > { %v2768_v49 = vpop.f32.mrf.mxu1 }
 0x273   : > { %v3835_v19 = vpop.f32.mrf.mxu1 }
 0x275   : > { %v2845_v50 = vpop.f32.mrf.mxu1 }
 0x277   : > { %v3846_v12 = vpop.f32.mrf.mxu1 }
 0x278   : > { %v3961_v12 = vld [vmem:[%s4983_s13 + $0x18] sm:$0xff]  }
 0x279   : > { %v2848_v0 = vpop.f32.mrf.mxu1  ;;  %3885 = vmatpush3.bf16.msra.mxu0 %v3961_v12 }
 0x27a   : > { %v3962_v0 = vld [vmem:[%s4983_s13 + $0x10] sm:$0xff]   ;;  %3886 = vmatprep.subr.bf16.mxu0 %v4087_v1 }
 0x27b   : > { %v3847_v54 = vpop.f32.mrf.mxu1 }
 0x27c   : > { %v3963_v54 = vld [vmem:[%s4983_s13 + $0x8] sm:$0xff]  }
 0x27d   : > { %v2980_v51 = vpop.f32.mrf.mxu1  ;;  %3887 = vmatpush3.bf16.msra.mxu0 %v3962_v0 }
 0x27e   : > { %3888 = vmatprep.subr.bf16.mxu0 %v4087_v1 }
 0x27f   : > { %v3858_v52 = vpop.f32.mrf.mxu1 }
 0x281   : > { %v2983_v53 = vpop.f32.mrf.mxu1  ;;  %3889 = vmatpush3.bf16.msra.mxu0 %v3963_v54 }
 0x282   : > { %3890 = vmatprep.subr.bf16.mxu0 %v4087_v1  ;;  %v3556_v53 = vld [vmem:[%s4982_s12] ss:$0 sm:$0xff] }
 0x283   : > { %v3859_v55 = vpop.f32.mrf.mxu1 }
 0x285   : > { %v3060_v57 = vpop.f32.mrf.mxu1 }
 0x287   : > { %v3870_v59 = vpop.f32.mrf.mxu1 }
 0x289   : > { %v3063_v44 = vpop.f32.mrf.mxu1 }
 0x28b   : > { %v3871_v48 = vpop.f32.mrf.mxu1 }
 0x295   : > { %v2275_v7 = vpop.permute.xlu0 %2274 }
 0x296   : > { %2278 = vst.msk [vmem:[%s4582_s19] sm:$0xff] %vm2277_vm13, %v2275_v7 }
 0x2e5   : > { %v2321_v9 = vpop.f32.mrf.mxu0 }
 0x2e6   : > { %v4848_v62 = vadd.f32 %v2321_v9, %v1442_v60 }
 0x2e7   : > { %v3804_v15 = vpop.f32.mrf.mxu0 }
 0x2e9   : > { %v2324_v63 = vpop.f32.mrf.mxu0 }
 0x2eb   : > { %v3805_v4 = vpop.f32.mrf.mxu0 }
 0x2ed   : > { %v2518_v8 = vpop.f32.mrf.mxu0 }
 0x2ee   : > { %v2519_v3 = vadd.f32 %v2518_v8, %v2438_v39 }
 0x2ef   : > { %v3816_v10 = vpop.f32.mrf.mxu0 }
 0x2f0   : > { %v2622_v30 = vadd.f32 %v2616_v43, %v2519_v3 }
 0x2f1   : > { %v2521_v13 = vpop.f32.mrf.mxu0 }
 0x2f3   : > { %v3817_v14 = vpop.f32.mrf.mxu0 }
 0x2f5   : > { %v2715_v16 = vpop.f32.mrf.mxu0 }
 0x2f6   : > { %v2721_v28 = vadd.f32 %v2715_v16, %v2622_v30 }
 0x2f7   : > { %v3828_v61 = vpop.f32.mrf.mxu0 }
 0x2f8   : > { %v2729_v37 = vadd.f32 %v3546_v33, %v2721_v28 }
 0x2f9   : > { %v2718_v5 = vpop.f32.mrf.mxu0 }
 0x2fa   : > { %v2730_v45 = vmax.f32 %v2729_v37, 0.0 }
 0x2fb   : > { %v3829_v17 = vpop.f32.mrf.mxu0 }
 0x2fd   : > { %v2805_v21 = vpop.f32.mrf.mxu0 }
 0x2fe   : > { %v2806_v24 = vadd.f32 %v2805_v21, %v2765_v47 }
 0x2ff   : > { %v3840_v11 = vpop.f32.mrf.mxu0 }
 0x300   : > { %v2851_v27 = vadd.f32 %v2845_v50, %v2806_v24 }
 0x301   : > { %v2808_v20 = vpop.f32.mrf.mxu0 }
 0x303   : > { %v3841_v22 = vpop.f32.mrf.mxu0 }
 0x305   : > { %v2936_v36 = vpop.f32.mrf.mxu0 }
 0x306   : > { %v2942_v31 = vadd.f32 %v2936_v36, %v2851_v27 }
 0x307   : > { %v3852_v38 = vpop.f32.mrf.mxu0 }
 0x308   : > { %v2943_v35 = vadd.f32 %v3546_v33, %v2942_v31 }
 0x309   : > { %v2939_v25 = vpop.f32.mrf.mxu0 }
 0x30a   : > { %v2944_v42 = vmax.f32 %v2943_v35, 0.0 }
 0x30b   : > { %v3853_v26 = vpop.f32.mrf.mxu0 }
 0x30c   : > { %v2945_v2 = vmax.f32 %v2730_v45, %v2944_v42 }
 0x30d   : > { %v3020_v29 = vpop.f32.mrf.mxu0 }
 0x30e   : > { %v3021_v32 = vadd.f32 %v3020_v29, %v2980_v51  ;;  %v3964_v51 = vld [vmem:[%s4983_s13] sm:$0xff]  }
 0x30f   : > { %v3864_v6 = vpop.f32.mrf.mxu0  ;;  %3891 = vmatpush3.bf16.msra.mxu0 %v3964_v51 }
 0x310   : > { %v3066_v40 = vadd.f32 %v3060_v57, %v3021_v32 }
 0x311   : > { %v3023_v34 = vpop.f32.mrf.mxu0 }
 0x313   : > { %v3865_v23 = vpop.f32.mrf.mxu0 }
 0x315   : > { %v3151_v41 = vpop.f32.mrf.mxu0 }
 0x316   : > { %v3157_v39 = vadd.f32 %v3151_v41, %v3066_v40 }
 0x317   : > { %v3876_v18 = vpop.f32.mrf.mxu0 }
 0x318   : > { %v3158_v46 = vadd.f32 %v3546_v33, %v3157_v39 }
 0x319   : > { %v3154_v43 = vpop.f32.mrf.mxu0 }
 0x31a   : > { %v3159_v47 = vmax.f32 %v3158_v46, 0.0 }
 0x31b   : > { %v3877_v49 = vpop.f32.mrf.mxu0 }
 0x31c   : > { %v3160_v19 = vmax.f32 %v2945_v2, %v3159_v47 }
 0x31e   : > { %3162 = vrot.lane.b32.xlu1 %v3160_v19, %s4091_s22  ;;  %v3167_v50 = vpack.c.bf16 %v3160_v19, %v3160_v19  ;;  %s4883_s22 = scalar_lea.hbm %s4986_s16, %s4877_s18 }
 0x320   : > { %3881 = vmatmul.mubr.msk.bf16.vlgmr.msra.gmra.mxu1 %vm1344_vm11, %v3167_v50 }
 0x390   : > { %v3163_v7 = vpop.permute.xlu1 %3162 }
 0x391   : > { %3166 = vst.msk [vmem:[%s4582_s19] sm:$0xff] %vm3165_vm14, %v3163_v7 }
 0x3e0   : > { %v3209_v52 = vpop.f32.mrf.mxu1 }
 0x3e1   : > { %v3215_v55 = vadd.f32 %v3209_v52, %v4848_v62 }
 0x3e2   : > { %v3882_v56 = vpop.f32.mrf.mxu1 }
 0x3e3   : > { %v3223_v57 = vadd.f32 %v3556_v53, %v3215_v55 }
 0x3e4   : > { %v3212_v58 = vpop.f32.mrf.mxu1 }
 0x3e5   : > { %3965 = vtanh.f32 %v3223_v57 }
 0x3e6   : > { %v3883_v59 = vpop.f32.mrf.mxu1 }
 0x3f2   : > { %v3966_v1 = vpop.eup %3965 }
 0x3f3   : > { %v3225_v44 = vpack.c.bf16 %v3966_v1, %v3966_v1  ;;  %3310 = vst.msk [vmem:[%s565_s3] sm:$0xff] %vm3265_vm15, %v3966_v1 }
 0x3f5   : > { %3893 = vmatmul.mubr.msk.bf16.vlgmr.msra.gmra.mxu0 %vm3265_vm15, %v3225_v44 }
 0x3f6   : > { %3982 = shalt.err (!%p3979_p3)
}
 0x3f7   : > { %s3983_s4 = scalar_lea.hbm %s4883_s22, 128  ;;  %s3987_s21 = scalar_lea.hbm %s4986_s16, 256 }
 0x3f8   : > { %p3984_p4 = scmp.ne.s32.totalorder %s4883_s22, %s3983_s4  ;;  %p3988_p9 = scmp.lt.s32.totalorder %s4883_s22, %s4986_s16 }
 0x3f9   : > { %p3989_p10 = scmp.lt.s32.totalorder %s3987_s21, %s3983_s4 }
 0x3fa   : > { %p3985_p7 = pnand %p3984_p4, %p4225_p5 }
 0x3fb   : > { %p3990_p11 = por %p3989_p10, %p3988_p9 }
 0x3fc   : > { %p3986_p8 = pneg %p3985_p7 }
 0x3fe   : > { %p3991_p12 = pnand %p3990_p11, %p3986_p8 }
 0x400   : > { %3994 = shalt.err (!%p3991_p12)
}
 0x401   : > { %3897 = dma.vmem_to_hbm [thread:$0]  (%p4225_p5), %s3350_s30, 128, %s4883_s22, %s4891_s6  }
 0x402   : > { %s3336_s7 = sshll.u32 %s4582_s19, 4  ;;  %s5013_s8 = sand.u32 1, %s4077_s25   ;;  %s3337_s7 = int_to_ptr.vmem [resolvable:$true] %s3336_s7 }
 0x403   : > { %s3313_s23 = scalar_lea.sflag [#allocation3], %s5013_s8  ;;  %s3995_s3 = scalar_lea.vmem %s3337_s7, 128 }
 0x404   : > { %p3996_p13 = scmp.ne.s32.totalorder %s3337_s7, %s3995_s3  ;;  %s4093_s4 = smov [#allocation2]  }
 0x405   : > { %s3999_s29 = sshll.u32 %s4093_s4, 4  ;;  %s4000_s29 = int_to_ptr.vmem [resolvable:$false] %s3999_s29 }
 0x406   : > { %p3997_p0 = pnand %p3996_p13, %p4225_p5  ;;  %s4001_s21 = scalar_lea.vmem %s4000_s29, 256 }
 0x407   : > { %p4002_p2 = scmp.lt.s32.totalorder %s3337_s7, %s4000_s29  ;;  %p4003_p3 = scmp.lt.s32.totalorder %s4001_s21, %s3995_s3 }
 0x408   : > { %p3998_p1 = pneg %p3997_p0 }
 0x409   : > { %p4004_p4 = por %p4003_p3, %p4002_p2 }
 0x40b   : > { %p4005_p7 = pnand %p4004_p4, %p3998_p1 }
 0x40d   : > { %4008 = shalt.err (!%p4005_p7)
}
 0x40e   : > { %s4009_s19 = scalar_lea.hbm %s4889_s5, 128  ;;  %s4013_s2 = scalar_lea.hbm %s4985_s15, 256 }
 0x40f   : > { %p4010_p8 = scmp.ne.s32.totalorder %s4889_s5, %s4009_s19  ;;  %p4014_p11 = scmp.lt.s32.totalorder %s4889_s5, %s4985_s15 }
 0x410   : > { %p4015_p12 = scmp.lt.s32.totalorder %s4013_s2, %s4009_s19 }
 0x411   : > { %p4011_p9 = pnand %p4010_p8, %p4225_p5 }
 0x412   : > { %p4016_p13 = por %p4015_p12, %p4014_p11 }
 0x413   : > { %p4012_p10 = pneg %p4011_p9 }
 0x415   : > { %p4017_p0 = pnand %p4016_p13, %p4012_p10 }
 0x417   : > { %4020 = shalt.err (!%p4017_p0)
}
 0x418   : > { %3896 = dma.vmem_to_hbm [thread:$0]  (%p4225_p5), %s3337_s7, 128, %s4889_s5, %s3313_s23   ;;  %v3557_v48 = vld [vmem:[%s4984_s14] ss:$0 sm:$0xff] }
 0x419   : > { %s572_s29 = scalar_lea.vmem [#allocation6], %s4577_s9  ;;  %s3360_s30 = scalar_lea.hbm %s4987_s17, %s4877_s18 }
 0x41a   : > { %s3362_s21 = sshll.u32 %s572_s29, 4  ;;  %s4094_s7 = smov [#allocation6]   ;;  %s3363_s21 = int_to_ptr.vmem [resolvable:$true] %s3362_s21 }
 0x41b   : > { %s4021_s5 = scalar_lea.vmem %s3363_s21, 128  ;;  %s4025_s23 = sshll.u32 %s4094_s7, 4  ;;  %s4026_s23 = int_to_ptr.vmem [resolvable:$false] %s4025_s23 }
 0x41c   : > { %p4022_p1 = scmp.ne.s32.totalorder %s3363_s21, %s4021_s5  ;;  %s4027_s2 = scalar_lea.vmem %s4026_s23, 256 }
 0x41d   : > { %p4028_p4 = scmp.lt.s32.totalorder %s3363_s21, %s4026_s23  ;;  %p4029_p7 = scmp.lt.s32.totalorder %s4027_s2, %s4021_s5 }
 0x41e   : > { %p4023_p2 = pnand %p4022_p1, %p4225_p5 }
 0x41f   : > { %p4030_p8 = por %p4029_p7, %p4028_p4 }
 0x420   : > { %p4024_p3 = pneg %p4023_p2 }
 0x422   : > { %p4031_p9 = pnand %p4030_p8, %p4024_p3 }
 0x4b5   : > { %v3303_v60 = vpop.f32.mrf.mxu0 }
 0x4b6   : > { %v3304_v9 = vadd.f32 %v3557_v48, %v3303_v60 }
 0x4b7   : > { %v3894_v62 = vpop.f32.mrf.mxu0 }
 0x4b8   : > { %3967 = vtanh.f32 %v3304_v9 }
 0x4b9   : > { %v3306_v15 = vpop.f32.mrf.mxu0 }
 0x4bb   : > { %v3895_v63 = vpop.f32.mrf.mxu0 }
 0x4c5   : > { %v3968_v4 = vpop.eup %3967 }
 0x4c6   : > { %3311 = vst.msk [vmem:[%s572_s29] sm:$0xff] %vm584_vm10, %v3968_v4 }
 0x4c7   : > { %4034 = shalt.err (!%p4031_p9)
}
 0x4c8   : > { %s4035_s9 = scalar_lea.hbm %s3360_s30, 128  ;;  %s4039_s8 = scalar_lea.hbm %s4987_s17, 256 }
 0x4c9   : > { %p4036_p10 = scmp.ne.s32.totalorder %s3360_s30, %s4035_s9  ;;  %p4040_p13 = scmp.lt.s32.totalorder %s3360_s30, %s4987_s17 }
 0x4ca   : > { %p4041_p0 = scmp.lt.s32.totalorder %s4039_s8, %s4035_s9 }
 0x4cb   : > { %p4037_p11 = pnand %p4036_p10, %p4225_p5 }
 0x4cc   : > { %p4042_p1 = por %p4041_p0, %p4040_p13 }
 0x4cd   : > { %p4038_p12 = pneg %p4037_p11 }
 0x4cf   : > { %p4043_p2 = pnand %p4042_p1, %p4038_p12 }
 0x4d1   : > { %4046 = shalt.err (!%p4043_p2)
}
 0x4d2   : > { %3898 = dma.vmem_to_hbm [thread:$0]  (%p4225_p5), %s3363_s21, 128, %s3360_s30, %s4891_s6  }
 0x4d3 PF: > { %p3912_p3 = scmp.ge.s32.totalorder %s4085_s27, 2  ;;  %s3374_s29 = sand.u32 1, %s4073_s24  }
 0x4d4   : > { %s3375_s19 = scalar_lea.sflag [#allocation3], %s3374_s29 }
 0x4d5   : > { %p3903_p4 = pnand %p3912_p3, %p4229_p6 }
 0x4d7   : > { %p3904_p7 = pneg %p3903_p4 }
 0x4d9   : > { %4064 = dma.done.wait (%p3904_p7), %s3375_s19, 128  }
 0x4da   : > { %4066 = vsyncadd (%p3904_p7), %s3375_s19, 4294967168  ;;  %s5014_s22 = sadd.s32 4294967294, %s4085_s27  }
 0x4db   : > { %s3383_s5 = sand.u32 1, %s5014_s22  }
 0x4dc   : > { %s3384_s7 = scalar_lea.sflag [#allocation5], %s3383_s5 }
 0x4dd   : > { %4068 = dma.done.wait (%p3904_p7), %s3384_s7, 256  }
 0x4de   : > { %4070 = vsyncadd (%p3904_p7), %s3384_s7, 4294967040  ;;  %s5015_s6 = sld [smem:[#allocation9_spill]]  ;;  %p31_p5 = scmp.ge.s32.totalorder %s4210_s0, 4  }
 0x4df   : > { %s5016_s24 = smov %s4077_s25  ;;  %s5017_s25 = smov %s4081_s26 }
 0x4e0   : > { %s5019_s27 = smov %s4210_s0  ;;  %33 = sbr.rel (!%p31_p5) target bundleno = 16 (0x10), region = 150 }
 0x4e4   : > { %s5018_s26 = smov %s5015_s6 }
 0x4e5   :  { %3398 = vsyncpa [#allocation3], 1 }
 0x4e6   :  { %3400 = vsyncpa [#allocation3 + $0x1], 1 }
 0x4e7   :  { %3401 = vsyncpa [#allocation5], 1 }
 0x4e8   :  { %3403 = vsyncpa [#allocation5 + $0x1], 1 }

</bundles_post_ra>
